<compile_context>
chip_gen: v5e
topology: v5e:2x2
jax: 0.10.0
libtpu: 0.0.40
codegen_flags: <defaults>
</compile_context>

<pallas_src>
import functools

import jax
import jax.numpy as jnp
from jax.experimental import pallas as pl
from jax.experimental.pallas import tpu as pltpu


# ----------------------------------------------------------------------------
# tiling helpers
# ----------------------------------------------------------------------------
def _pick_row_tile(h, cap=8):
    """Largest divisor of h that is <= cap (row dim of the input tile)."""
    for t in range(min(h, cap), 0, -1):
        if h % t == 0:
            return t
    return h


def _pick_bn_tile(m, cap=512):
    """Largest divisor of m <= cap that is a multiple of 8 (sublane dim)."""
    for t in range(min(m, cap), 0, -1):
        if m % t == 0 and t % 8 == 0:
            return t
    return m  # full block is always a legal block shape


# ----------------------------------------------------------------------------
# Kernel 1: ConvTranspose2d(k=4, s=2, p=1) via output-parity decomposition.
#
# out[n, 2p+ry, 2q+rx, :] = sum_{dy,dx in {0,1}} xp[n, p+ry+dy, q+rx+dx, :]
#                                              @ W[:, :, 3-ry-2dy, 3-rx-2dx]
# where xp is x padded by 1 on each spatial side (zeros).
# ----------------------------------------------------------------------------
def _deconv_kernel(x_ref, h0_ref, h1_ref, w_ref, b_ref, y_ref, ps_ref,
                   slab_ref, patch_ref, *, TH, W, Cin, Cout, add_bias):
    # x_ref    : (1, TH, Wp, Cin)      bf16  main input row slab (padded coords)
    # h0_ref   : (1, 1,  Wp, Cin)      bf16  halo row (padded row i*TH + TH)
    # h1_ref   : (1, 1,  Wp, Cin)      bf16  halo row (padded row i*TH + TH + 1)
    # w_ref    : (4, 4*Cin, Cout)      bf16  fused per-parity taps
    # b_ref    : (1, Cout)             f32   conv bias (used only if add_bias)
    # y_ref    : (1, TH, 2, W, 2*Cout) f32   packed output (free reshape -> NHWC)
    # ps_ref   : (1, 1, 2, Cout)       f32   per-tile [sum, sum_of_squares]
    # slab_ref : (TH+2, Wp, Cin)       bf16  scratch: rows incl. halo
    # patch_ref: (TH, W, 4*Cin)        bf16  scratch: per-parity im2col patch
    slab_ref[0:TH] = x_ref[0]
    slab_ref[TH:TH + 1] = h0_ref[0]
    slab_ref[TH + 1:TH + 2] = h1_ref[0]

    s_acc = jnp.zeros((1, Cout), jnp.float32)
    q_acc = jnp.zeros((1, Cout), jnp.float32)
    for ry in range(2):
        for rx in range(2):
            par = ry * 2 + rx
            # Stage the 4 taps of this parity into one (TH, W, 4*Cin) patch.
            for dy in range(2):
                for dx in range(2):
                    d = dy * 2 + dx
                    patch_ref[:, :, d * Cin:(d + 1) * Cin] = (
                        slab_ref[ry + dy:ry + dy + TH, rx + dx:rx + dx + W, :])
            patch = patch_ref[...].reshape(TH * W, 4 * Cin)
            # Single fused MXU contraction per parity, f32 accumulation.
            out_par = jnp.dot(patch, w_ref[par],
                              preferred_element_type=jnp.float32)   # (TH*W, Cout)
            if add_bias:
                out_par = out_par + b_ref[...]
            # Cheap per-channel partial stats for the fused BatchNorm.
            s_acc = s_acc + jnp.sum(out_par, axis=0, keepdims=True)
            q_acc = q_acc + jnp.sum(out_par * out_par, axis=0, keepdims=True)
            # Lane-dense packed store: channel c of parity rx sits at lane rx*Cout+c.
            y_ref[0, :, ry, :, rx * Cout:(rx + 1) * Cout] = (
                out_par.reshape(TH, W, Cout))
    ps_ref[0, 0, 0:1, :] = s_acc
    ps_ref[0, 0, 1:2, :] = q_acc


def conv_transpose2d_pallas(x_nhwc, w_pt, bias, *, add_bias, row_tile=8):
    """ConvTranspose2d(kernel=4, stride=2, padding=1), PyTorch semantics.

    x_nhwc: (N, H, W, Cin) f32;  w_pt: (Cin, Cout, 4, 4);  bias: (Cout,)
    Returns:
      y5: (N, H, 2, W, 2*Cout) f32 -- reshape(N, 2H, 2W, Cout) is the NHWC output.
      ps: (N, H//TH, 2, Cout)  f32 -- per-tile [sum, sum_sq] per channel.
    """
    N, H, W, Cin = x_nhwc.shape
    wCin, Cout, K, K2 = w_pt.shape
    assert (wCin, K, K2) == (Cin, 4, 4), "kernel specialised to k=4, s=2, p=1"

    TH = _pick_row_tile(H, row_tile)
    nRT = H // TH
    Wp = W + 2

    # Border-pad by 1 (tiny glue, no 4x dilated tensor); bf16 MXU operands.
    xp = jnp.pad(x_nhwc, ((0, 0), (1, 1), (1, 1), (0, 0))).astype(jnp.bfloat16)

    # Fused per-parity weights: parity (ry, rx) uses taps w[:, :, 3-ry-2dy, 3-rx-2dx].
    w_par = []
    for ry in range(2):
        for rx in range(2):
            blocks = [w_pt[:, :, 3 - ry - 2 * dy, 3 - rx - 2 * dx]
                      for dy in range(2) for dx in range(2)]
            w_par.append(jnp.concatenate(blocks, axis=0))          # (4*Cin, Cout)
    w_all = jnp.stack(w_par, axis=0).astype(jnp.bfloat16)          # (4, 4*Cin, Cout)
    b2 = bias.reshape(1, Cout).astype(jnp.float32)

    kernel = functools.partial(_deconv_kernel, TH=TH, W=W, Cin=Cin, Cout=Cout,
                               add_bias=add_bias)
    y5, ps = pl.pallas_call(
        kernel,
        out_shape=(jax.ShapeDtypeStruct((N, H, 2, W, 2 * Cout), jnp.float32),
                   jax.ShapeDtypeStruct((N, nRT, 2, Cout), jnp.float32)),
        grid=(N, nRT),
        in_specs=[
            pl.BlockSpec((1, TH, Wp, Cin), lambda n, i: (n, i, 0, 0)),
            pl.BlockSpec((1, 1, Wp, Cin), lambda n, i: (n, i * TH + TH, 0, 0)),
            pl.BlockSpec((1, 1, Wp, Cin), lambda n, i: (n, i * TH + TH + 1, 0, 0)),
            pl.BlockSpec((4, 4 * Cin, Cout), lambda n, i: (0, 0, 0)),
            pl.BlockSpec((1, Cout), lambda n, i: (0, 0)),
        ],
        out_specs=(
            pl.BlockSpec((1, TH, 2, W, 2 * Cout), lambda n, i: (n, i, 0, 0, 0)),
            pl.BlockSpec((1, 1, 2, Cout), lambda n, i: (n, i, 0, 0)),
        ),
        scratch_shapes=[
            pltpu.VMEM((TH + 2, Wp, Cin), jnp.bfloat16),
            pltpu.VMEM((TH, W, 4 * Cin), jnp.bfloat16),
        ],
        compiler_params=pltpu.CompilerParams(
            dimension_semantics=("parallel", "parallel")),
    )(xp, xp, xp, w_all, b2)
    return y5, ps


# ----------------------------------------------------------------------------
# Kernel 2: tiled elementwise scale/shift (BatchNorm apply pass).
# Stats come from the conv kernel's partial sums, so this is a single HBM pass.
# ----------------------------------------------------------------------------
def _scale_shift_kernel(y_ref, s_ref, t_ref, o_ref):
    o_ref[...] = y_ref[...] * s_ref[...] + t_ref[...]


def bn_apply_pallas(y2, scale2, shift2, *, row_tile=512):
    M, C2 = y2.shape
    TM = _pick_bn_tile(M, row_tile)
    return pl.pallas_call(
        _scale_shift_kernel,
        out_shape=jax.ShapeDtypeStruct((M, C2), jnp.float32),
        grid=(M // TM,),
        in_specs=[
            pl.BlockSpec((TM, C2), lambda i: (i, 0)),
            pl.BlockSpec((1, C2), lambda i: (0, 0)),
            pl.BlockSpec((1, C2), lambda i: (0, 0)),
        ],
        out_specs=pl.BlockSpec((TM, C2), lambda i: (i, 0)),
        compiler_params=pltpu.CompilerParams(dimension_semantics=("parallel",)),
    )(y2, scale2.reshape(1, C2), shift2.reshape(1, C2))


# ----------------------------------------------------------------------------
# Module wrapper (NCHW in / NCHW out, like the PyTorch module).
# ----------------------------------------------------------------------------
def upsample_conv_forward(x_nchw, params, *, batchnorm=True, dropout=False,
                          eps=1e-5):
    if dropout:
        # TODO(synk): Dropout2d(0.5) (dropout=True) would need pltpu.prng_*; default is False.
        raise NotImplementedError("dropout=True path not implemented")

    x_nhwc = jnp.transpose(x_nchw, (0, 2, 3, 1))
    # The conv bias is mathematically cancelled by BN's mean subtraction -> skip it.
    y5, ps = conv_transpose2d_pallas(x_nhwc, params["w"], params["b"],
                                     add_bias=not batchnorm)
    N, H, _, W, C2 = y5.shape
    Cout = C2 // 2
    OH, OW = 2 * H, 2 * W

    if batchnorm:
        # Training-mode BN (biased variance) from conv-emitted partial sums.
        tot = jnp.sum(ps, axis=(0, 1))                   # (2, Cout)
        m = float(N * OH * OW)
        mean = tot[0] / m
        var = jnp.maximum(tot[1] / m - mean * mean, 0.0)
        scale = params["gamma"].astype(jnp.float32) * jax.lax.rsqrt(var + eps)
        shift = params["beta"].astype(jnp.float32) - mean * scale
        # Packed layout has channel c at lane rx*Cout + c -> duplicate scale/shift.
        scale2 = jnp.concatenate([scale, scale])
        shift2 = jnp.concatenate([shift, shift])
        y2 = bn_apply_pallas(y5.reshape(N * H * 2 * W, C2), scale2, shift2)
        y_nhwc = y2.reshape(N, OH, OW, Cout)             # free reshape
    else:
        y_nhwc = y5.reshape(N, OH, OW, Cout)             # free reshape

    # Note: the reference forward() never applies self.act, so no ReLU here.
    return jnp.transpose(y_nhwc, (0, 3, 1, 2))


def init_params(key, in_channels, out_channels, kernel=4):
    kw, kb = jax.random.split(key)
    w = 0.1 * jax.random.normal(kw, (in_channels, out_channels, kernel, kernel),
                                dtype=jnp.float32)
    b = 0.1 * jax.random.normal(kb, (out_channels,), dtype=jnp.float32)
    gamma = jnp.ones((out_channels,), jnp.float32)
    beta = jnp.zeros((out_channels,), jnp.float32)
    return {"w": w, "b": b, "gamma": gamma, "beta": beta}


# ----------------------------------------------------------------------------
# Pure-JAX reference (f32, HIGHEST precision) of the PyTorch module forward.
# ----------------------------------------------------------------------------
def reference_forward(x_nchw, params, *, batchnorm=True, eps=1e-5):
    x = jnp.transpose(x_nchw, (0, 2, 3, 1)).astype(jnp.float32)
    w = params["w"].astype(jnp.float32)                     # (Cin, Cout, K, K)
    w_hwio = jnp.transpose(w, (2, 3, 0, 1))[::-1, ::-1, :, :]
    y = jax.lax.conv_general_dilated(
        x, w_hwio, window_strides=(1, 1), padding=[(2, 2), (2, 2)],
        lhs_dilation=(2, 2), dimension_numbers=("NHWC", "HWIO", "NHWC"),
        precision=jax.lax.Precision.HIGHEST)
    y = y + params["b"]
    if batchnorm:
        mean = jnp.mean(y, axis=(0, 1, 2))
        var = jnp.var(y, axis=(0, 1, 2))
        y = (y - mean) * jax.lax.rsqrt(var + eps) * params["gamma"] + params["beta"]
    return jnp.transpose(y, (0, 3, 1, 2))


if __name__ == "__main__":
    key = jax.random.PRNGKey(0)
    k_x, k_p = jax.random.split(key)

    N, Cin, H, W = 2, 4, 16, 16
    Cout = 8
    x = jax.random.normal(k_x, (N, Cin, H, W), dtype=jnp.float32)   # NCHW
    params = init_params(k_p, Cin, Cout, kernel=4)

    out = upsample_conv_forward(x, params, batchnorm=True)
    out = jax.block_until_ready(out)

    assert out.shape == (N, Cout, 2 * H, 2 * W), out.shape
    assert bool(jnp.all(jnp.isfinite(out)))

    # Compare against a bf16-quantized-operand f32 reference (the kernel uses bf16
    # MXU operands with f32 accumulation), so only accumulation-order noise remains.
    x_q = x.astype(jnp.bfloat16).astype(jnp.float32)
    params_q = dict(params, w=params["w"].astype(jnp.bfloat16).astype(jnp.float32))
    ref = reference_forward(x_q, params_q, batchnorm=True)
    err = float(jnp.max(jnp.abs(out - ref)))
    assert err < 2e-2, f"max abs error vs reference: {err}"

    print("KERNEL_OK")
</pallas_src>

<mosaic_0001>
module attributes {stable_mosaic.version = 11 : i64} {
  func.func @_deconv_kernel(%arg0: i32, %arg1: i32, %arg2: memref<1x8x18x4xbf16, #tpu.memory_space<vmem>>, %arg3: memref<1x1x18x4xbf16, #tpu.memory_space<vmem>>, %arg4: memref<1x1x18x4xbf16, #tpu.memory_space<vmem>>, %arg5: memref<4x16x8xbf16, #tpu.memory_space<vmem>>, %arg6: memref<1x8xf32, #tpu.memory_space<vmem>>, %arg7: memref<1x8x2x16x16xf32, #tpu.memory_space<vmem>>, %arg8: memref<1x1x2x8xf32, #tpu.memory_space<vmem>>, %arg9: memref<10x18x4xbf16, #tpu.memory_space<vmem>>, %arg10: memref<8x16x16xbf16, #tpu.memory_space<vmem>>) attributes {dimension_semantics = [#tpu.dimension_semantics<parallel>, #tpu.dimension_semantics<parallel>], iteration_bounds = array<i64: 2, 2>, scalar_prefetch = 0 : i64, scratch_operands = 2 : i64, tpu.core_type = #tpu.core_type<tc>, window_params = [{transform_indices = @transform_0, window_bounds = array<i64: 1, 8, 18, 4>}, {transform_indices = @transform_1, window_bounds = array<i64: 1, 1, 18, 4>}, {transform_indices = @transform_2, window_bounds = array<i64: 1, 1, 18, 4>}, {pipeline_mode = #tpu.pipeline_mode<synchronous>, transform_indices = @transform_3, window_bounds = array<i64: 4, 16, 8>}, {pipeline_mode = #tpu.pipeline_mode<synchronous>, transform_indices = @transform_4, window_bounds = array<i64: 1, 8>}, {transform_indices = @transform_5, window_bounds = array<i64: 1, 8, 2, 16, 16>}, {transform_indices = @transform_6, window_bounds = array<i64: 1, 1, 2, 8>}]} {
    %c0 = arith.constant 0 : index
    %c0_0 = arith.constant 0 : index
    %c0_1 = arith.constant 0 : index
    %c0_2 = arith.constant 0 : index
    %0 = vector.load %arg2[%c0, %c0_0, %c0_1, %c0_2] : memref<1x8x18x4xbf16, #tpu.memory_space<vmem>>, vector<1x8x18x4xbf16>
    %1 = vector.shape_cast %0 : vector<1x8x18x4xbf16> to vector<8x18x4xbf16>
    %c0_3 = arith.constant 0 : index
    %c0_4 = arith.constant 0 : index
    %c0_5 = arith.constant 0 : index
    %2 = vector.load %arg9[%c0_3, %c0_4, %c0_5] : memref<10x18x4xbf16, #tpu.memory_space<vmem>>, vector<8x18x4xbf16>
    tpu.vector_store %arg9[%c0_3, %c0_4, %c0_5], %1 {strides = array<i32>} : memref<10x18x4xbf16, #tpu.memory_space<vmem>>, vector<8x18x4xbf16>,
    %c0_6 = arith.constant 0 : index
    %c0_7 = arith.constant 0 : index
    %c0_8 = arith.constant 0 : index
    %c0_9 = arith.constant 0 : index
    %3 = vector.load %arg3[%c0_6, %c0_7, %c0_8, %c0_9] : memref<1x1x18x4xbf16, #tpu.memory_space<vmem>>, vector<1x1x18x4xbf16>
    %4 = vector.shape_cast %3 : vector<1x1x18x4xbf16> to vector<1x18x4xbf16>
    %c8 = arith.constant 8 : index
    %c0_10 = arith.constant 0 : index
    %c0_11 = arith.constant 0 : index
    %5 = vector.load %arg9[%c8, %c0_10, %c0_11] : memref<10x18x4xbf16, #tpu.memory_space<vmem>>, vector<1x18x4xbf16>
    tpu.vector_store %arg9[%c8, %c0_10, %c0_11], %4 {strides = array<i32>} : memref<10x18x4xbf16, #tpu.memory_space<vmem>>, vector<1x18x4xbf16>,
    %c0_12 = arith.constant 0 : index
    %c0_13 = arith.constant 0 : index
    %c0_14 = arith.constant 0 : index
    %c0_15 = arith.constant 0 : index
    %6 = vector.load %arg4[%c0_12, %c0_13, %c0_14, %c0_15] : memref<1x1x18x4xbf16, #tpu.memory_space<vmem>>, vector<1x1x18x4xbf16>
    %7 = vector.shape_cast %6 : vector<1x1x18x4xbf16> to vector<1x18x4xbf16>
    %c9 = arith.constant 9 : index
    %c0_16 = arith.constant 0 : index
    %c0_17 = arith.constant 0 : index
    %8 = vector.load %arg9[%c9, %c0_16, %c0_17] : memref<10x18x4xbf16, #tpu.memory_space<vmem>>, vector<1x18x4xbf16>
    tpu.vector_store %arg9[%c9, %c0_16, %c0_17], %7 {strides = array<i32>} : memref<10x18x4xbf16, #tpu.memory_space<vmem>>, vector<1x18x4xbf16>,
    %cst = arith.constant 0.000000e+00 : f32
    %9 = vector.broadcast %cst : f32 to vector<1x8xf32>
    %cst_18 = arith.constant 0.000000e+00 : f32
    %10 = vector.broadcast %cst_18 : f32 to vector<1x8xf32>
    %c0_19 = arith.constant 0 : index
    %c0_20 = arith.constant 0 : index
    %c0_21 = arith.constant 0 : index
    %11 = vector.load %arg9[%c0_19, %c0_20, %c0_21] : memref<10x18x4xbf16, #tpu.memory_space<vmem>>, vector<8x16x4xbf16>
    %c0_22 = arith.constant 0 : index
    %c0_23 = arith.constant 0 : index
    %c0_24 = arith.constant 0 : index
    %12 = vector.load %arg10[%c0_22, %c0_23, %c0_24] : memref<8x16x16xbf16, #tpu.memory_space<vmem>>, vector<8x16x4xbf16>
    tpu.vector_store %arg10[%c0_22, %c0_23, %c0_24], %11 {strides = array<i32>} : memref<8x16x16xbf16, #tpu.memory_space<vmem>>, vector<8x16x4xbf16>,
    %c0_25 = arith.constant 0 : index
    %c1 = arith.constant 1 : index
    %c0_26 = arith.constant 0 : index
    %13 = vector.load %arg9[%c0_25, %c1, %c0_26] : memref<10x18x4xbf16, #tpu.memory_space<vmem>>, vector<8x16x4xbf16>
    %c0_27 = arith.constant 0 : index
    %c0_28 = arith.constant 0 : index
    %c4 = arith.constant 4 : index
    %14 = vector.load %arg10[%c0_27, %c0_28, %c4] : memref<8x16x16xbf16, #tpu.memory_space<vmem>>, vector<8x16x4xbf16>
    tpu.vector_store %arg10[%c0_27, %c0_28, %c4], %13 {strides = array<i32>} : memref<8x16x16xbf16, #tpu.memory_space<vmem>>, vector<8x16x4xbf16>,
    %c1_29 = arith.constant 1 : index
    %c0_30 = arith.constant 0 : index
    %c0_31 = arith.constant 0 : index
    %15 = vector.load %arg9[%c1_29, %c0_30, %c0_31] : memref<10x18x4xbf16, #tpu.memory_space<vmem>>, vector<8x16x4xbf16>
    %c0_32 = arith.constant 0 : index
    %c0_33 = arith.constant 0 : index
    %c8_34 = arith.constant 8 : index
    %16 = vector.load %arg10[%c0_32, %c0_33, %c8_34] : memref<8x16x16xbf16, #tpu.memory_space<vmem>>, vector<8x16x4xbf16>
    tpu.vector_store %arg10[%c0_32, %c0_33, %c8_34], %15 {strides = array<i32>} : memref<8x16x16xbf16, #tpu.memory_space<vmem>>, vector<8x16x4xbf16>,
    %c1_35 = arith.constant 1 : index
    %c1_36 = arith.constant 1 : index
    %c0_37 = arith.constant 0 : index
    %17 = vector.load %arg9[%c1_35, %c1_36, %c0_37] : memref<10x18x4xbf16, #tpu.memory_space<vmem>>, vector<8x16x4xbf16>
    %c0_38 = arith.constant 0 : index
    %c0_39 = arith.constant 0 : index
    %c12 = arith.constant 12 : index
    %18 = vector.load %arg10[%c0_38, %c0_39, %c12] : memref<8x16x16xbf16, #tpu.memory_space<vmem>>, vector<8x16x4xbf16>
    tpu.vector_store %arg10[%c0_38, %c0_39, %c12], %17 {strides = array<i32>} : memref<8x16x16xbf16, #tpu.memory_space<vmem>>, vector<8x16x4xbf16>,
    %c0_40 = arith.constant 0 : index
    %c0_41 = arith.constant 0 : index
    %c0_42 = arith.constant 0 : index
    %19 = vector.load %arg10[%c0_40, %c0_41, %c0_42] : memref<8x16x16xbf16, #tpu.memory_space<vmem>>, vector<8x16x16xbf16>
    %20 = vector.shape_cast %19 : vector<8x16x16xbf16> to vector<128x16xbf16>
    %c0_43 = arith.constant 0 : index
    %c0_44 = arith.constant 0 : index
    %c0_45 = arith.constant 0 : index
    %21 = vector.load %arg5[%c0_43, %c0_44, %c0_45] : memref<4x16x8xbf16, #tpu.memory_space<vmem>>, vector<1x16x8xbf16>
    %22 = vector.shape_cast %21 : vector<1x16x8xbf16> to vector<16x8xbf16>
    %cst_46 = arith.constant dense<0.000000e+00> : vector<128x8xf32>
    %23 = tpu.matmul %20, %22, %cst_46 {dimension_numbers = #tpu.dot_dimension_numbers<[1], [0], [0], [1], [0, 0, 1, 1], [], []>} : vector<128x16xbf16>, vector<16x8xbf16>, vector<128x8xf32> -> vector<128x8xf32>
    %cst_47 = arith.constant dense<0.000000e+00> : vector<8xf32>
    %24 = vector.multi_reduction <add>, %23, %cst_47 [0] : vector<128x8xf32> to vector<8xf32>
    %25 = vector.shape_cast %24 : vector<8xf32> to vector<1x8xf32>
    %26 = arith.addf %9, %25 : vector<1x8xf32>
    %27 = arith.mulf %23, %23 : vector<128x8xf32>
    %cst_48 = arith.constant dense<0.000000e+00> : vector<8xf32>
    %28 = vector.multi_reduction <add>, %27, %cst_48 [0] : vector<128x8xf32> to vector<8xf32>
    %29 = vector.shape_cast %28 : vector<8xf32> to vector<1x8xf32>
    %30 = arith.addf %10, %29 : vector<1x8xf32>
    %31 = vector.shape_cast %23 : vector<128x8xf32> to vector<8x16x8xf32>
    %c0_49 = arith.constant 0 : index
    %c0_50 = arith.constant 0 : index
    %c0_51 = arith.constant 0 : index
    %c0_52 = arith.constant 0 : index
    %c0_53 = arith.constant 0 : index
    %32 = vector.load %arg7[%c0_49, %c0_50, %c0_51, %c0_52, %c0_53] : memref<1x8x2x16x16xf32, #tpu.memory_space<vmem>>, vector<1x8x1x16x8xf32>
    %33 = vector.shape_cast %32 : vector<1x8x1x16x8xf32> to vector<8x16x8xf32>
    %34 = vector.shape_cast %31 : vector<8x16x8xf32> to vector<1x8x1x16x8xf32>
    tpu.vector_store %arg7[%c0_49, %c0_50, %c0_51, %c0_52, %c0_53], %34 {strides = array<i32>} : memref<1x8x2x16x16xf32, #tpu.memory_space<vmem>>, vector<1x8x1x16x8xf32>,
    %c0_54 = arith.constant 0 : index
    %c1_55 = arith.constant 1 : index
    %c0_56 = arith.constant 0 : index
    %35 = vector.load %arg9[%c0_54, %c1_55, %c0_56] : memref<10x18x4xbf16, #tpu.memory_space<vmem>>, vector<8x16x4xbf16>
    %c0_57 = arith.constant 0 : index
    %c0_58 = arith.constant 0 : index
    %c0_59 = arith.constant 0 : index
    %36 = vector.load %arg10[%c0_57, %c0_58, %c0_59] : memref<8x16x16xbf16, #tpu.memory_space<vmem>>, vector<8x16x4xbf16>
    tpu.vector_store %arg10[%c0_57, %c0_58, %c0_59], %35 {strides = array<i32>} : memref<8x16x16xbf16, #tpu.memory_space<vmem>>, vector<8x16x4xbf16>,
    %c0_60 = arith.constant 0 : index
    %c2 = arith.constant 2 : index
    %c0_61 = arith.constant 0 : index
    %37 = vector.load %arg9[%c0_60, %c2, %c0_61] : memref<10x18x4xbf16, #tpu.memory_space<vmem>>, vector<8x16x4xbf16>
    %c0_62 = arith.constant 0 : index
    %c0_63 = arith.constant 0 : index
    %c4_64 = arith.constant 4 : index
    %38 = vector.load %arg10[%c0_62, %c0_63, %c4_64] : memref<8x16x16xbf16, #tpu.memory_space<vmem>>, vector<8x16x4xbf16>
    tpu.vector_store %arg10[%c0_62, %c0_63, %c4_64], %37 {strides = array<i32>} : memref<8x16x16xbf16, #tpu.memory_space<vmem>>, vector<8x16x4xbf16>,
    %c1_65 = arith.constant 1 : index
    %c1_66 = arith.constant 1 : index
    %c0_67 = arith.constant 0 : index
    %39 = vector.load %arg9[%c1_65, %c1_66, %c0_67] : memref<10x18x4xbf16, #tpu.memory_space<vmem>>, vector<8x16x4xbf16>
    %c0_68 = arith.constant 0 : index
    %c0_69 = arith.constant 0 : index
    %c8_70 = arith.constant 8 : index
    %40 = vector.load %arg10[%c0_68, %c0_69, %c8_70] : memref<8x16x16xbf16, #tpu.memory_space<vmem>>, vector<8x16x4xbf16>
    tpu.vector_store %arg10[%c0_68, %c0_69, %c8_70], %39 {strides = array<i32>} : memref<8x16x16xbf16, #tpu.memory_space<vmem>>, vector<8x16x4xbf16>,
    %c1_71 = arith.constant 1 : index
    %c2_72 = arith.constant 2 : index
    %c0_73 = arith.constant 0 : index
    %41 = vector.load %arg9[%c1_71, %c2_72, %c0_73] : memref<10x18x4xbf16, #tpu.memory_space<vmem>>, vector<8x16x4xbf16>
    %c0_74 = arith.constant 0 : index
    %c0_75 = arith.constant 0 : index
    %c12_76 = arith.constant 12 : index
    %42 = vector.load %arg10[%c0_74, %c0_75, %c12_76] : memref<8x16x16xbf16, #tpu.memory_space<vmem>>, vector<8x16x4xbf16>
    tpu.vector_store %arg10[%c0_74, %c0_75, %c12_76], %41 {strides = array<i32>} : memref<8x16x16xbf16, #tpu.memory_space<vmem>>, vector<8x16x4xbf16>,
    %c0_77 = arith.constant 0 : index
    %c0_78 = arith.constant 0 : index
    %c0_79 = arith.constant 0 : index
    %43 = vector.load %arg10[%c0_77, %c0_78, %c0_79] : memref<8x16x16xbf16, #tpu.memory_space<vmem>>, vector<8x16x16xbf16>
    %44 = vector.shape_cast %43 : vector<8x16x16xbf16> to vector<128x16xbf16>
    %c1_80 = arith.constant 1 : index
    %c0_81 = arith.constant 0 : index
    %c0_82 = arith.constant 0 : index
    %45 = vector.load %arg5[%c1_80, %c0_81, %c0_82] : memref<4x16x8xbf16, #tpu.memory_space<vmem>>, vector<1x16x8xbf16>
    %46 = vector.shape_cast %45 : vector<1x16x8xbf16> to vector<16x8xbf16>
    %cst_83 = arith.constant dense<0.000000e+00> : vector<128x8xf32>
    %47 = tpu.matmul %44, %46, %cst_83 {dimension_numbers = #tpu.dot_dimension_numbers<[1], [0], [0], [1], [0, 0, 1, 1], [], []>} : vector<128x16xbf16>, vector<16x8xbf16>, vector<128x8xf32> -> vector<128x8xf32>
    %cst_84 = arith.constant dense<0.000000e+00> : vector<8xf32>
    %48 = vector.multi_reduction <add>, %47, %cst_84 [0] : vector<128x8xf32> to vector<8xf32>
    %49 = vector.shape_cast %48 : vector<8xf32> to vector<1x8xf32>
    %50 = arith.addf %26, %49 : vector<1x8xf32>
    %51 = arith.mulf %47, %47 : vector<128x8xf32>
    %cst_85 = arith.constant dense<0.000000e+00> : vector<8xf32>
    %52 = vector.multi_reduction <add>, %51, %cst_85 [0] : vector<128x8xf32> to vector<8xf32>
    %53 = vector.shape_cast %52 : vector<8xf32> to vector<1x8xf32>
    %54 = arith.addf %30, %53 : vector<1x8xf32>
    %55 = vector.shape_cast %47 : vector<128x8xf32> to vector<8x16x8xf32>
    %c0_86 = arith.constant 0 : index
    %c0_87 = arith.constant 0 : index
    %c0_88 = arith.constant 0 : index
    %c0_89 = arith.constant 0 : index
    %c8_90 = arith.constant 8 : index
    %56 = vector.load %arg7[%c0_86, %c0_87, %c0_88, %c0_89, %c8_90] : memref<1x8x2x16x16xf32, #tpu.memory_space<vmem>>, vector<1x8x1x16x8xf32>
    %57 = vector.shape_cast %56 : vector<1x8x1x16x8xf32> to vector<8x16x8xf32>
    %58 = vector.shape_cast %55 : vector<8x16x8xf32> to vector<1x8x1x16x8xf32>
    tpu.vector_store %arg7[%c0_86, %c0_87, %c0_88, %c0_89, %c8_90], %58 {strides = array<i32>} : memref<1x8x2x16x16xf32, #tpu.memory_space<vmem>>, vector<1x8x1x16x8xf32>,
    %c1_91 = arith.constant 1 : index
    %c0_92 = arith.constant 0 : index
    %c0_93 = arith.constant 0 : index
    %59 = vector.load %arg9[%c1_91, %c0_92, %c0_93] : memref<10x18x4xbf16, #tpu.memory_space<vmem>>, vector<8x16x4xbf16>
    %c0_94 = arith.constant 0 : index
    %c0_95 = arith.constant 0 : index
    %c0_96 = arith.constant 0 : index
    %60 = vector.load %arg10[%c0_94, %c0_95, %c0_96] : memref<8x16x16xbf16, #tpu.memory_space<vmem>>, vector<8x16x4xbf16>
    tpu.vector_store %arg10[%c0_94, %c0_95, %c0_96], %59 {strides = array<i32>} : memref<8x16x16xbf16, #tpu.memory_space<vmem>>, vector<8x16x4xbf16>,
    %c1_97 = arith.constant 1 : index
    %c1_98 = arith.constant 1 : index
    %c0_99 = arith.constant 0 : index
    %61 = vector.load %arg9[%c1_97, %c1_98, %c0_99] : memref<10x18x4xbf16, #tpu.memory_space<vmem>>, vector<8x16x4xbf16>
    %c0_100 = arith.constant 0 : index
    %c0_101 = arith.constant 0 : index
    %c4_102 = arith.constant 4 : index
    %62 = vector.load %arg10[%c0_100, %c0_101, %c4_102] : memref<8x16x16xbf16, #tpu.memory_space<vmem>>, vector<8x16x4xbf16>
    tpu.vector_store %arg10[%c0_100, %c0_101, %c4_102], %61 {strides = array<i32>} : memref<8x16x16xbf16, #tpu.memory_space<vmem>>, vector<8x16x4xbf16>,
    %c2_103 = arith.constant 2 : index
    %c0_104 = arith.constant 0 : index
    %c0_105 = arith.constant 0 : index
    %63 = vector.load %arg9[%c2_103, %c0_104, %c0_105] : memref<10x18x4xbf16, #tpu.memory_space<vmem>>, vector<8x16x4xbf16>
    %c0_106 = arith.constant 0 : index
    %c0_107 = arith.constant 0 : index
    %c8_108 = arith.constant 8 : index
    %64 = vector.load %arg10[%c0_106, %c0_107, %c8_108] : memref<8x16x16xbf16, #tpu.memory_space<vmem>>, vector<8x16x4xbf16>
    tpu.vector_store %arg10[%c0_106, %c0_107, %c8_108], %63 {strides = array<i32>} : memref<8x16x16xbf16, #tpu.memory_space<vmem>>, vector<8x16x4xbf16>,
    %c2_109 = arith.constant 2 : index
    %c1_110 = arith.constant 1 : index
    %c0_111 = arith.constant 0 : index
    %65 = vector.load %arg9[%c2_109, %c1_110, %c0_111] : memref<10x18x4xbf16, #tpu.memory_space<vmem>>, vector<8x16x4xbf16>
    %c0_112 = arith.constant 0 : index
    %c0_113 = arith.constant 0 : index
    %c12_114 = arith.constant 12 : index
    %66 = vector.load %arg10[%c0_112, %c0_113, %c12_114] : memref<8x16x16xbf16, #tpu.memory_space<vmem>>, vector<8x16x4xbf16>
    tpu.vector_store %arg10[%c0_112, %c0_113, %c12_114], %65 {strides = array<i32>} : memref<8x16x16xbf16, #tpu.memory_space<vmem>>, vector<8x16x4xbf16>,
    %c0_115 = arith.constant 0 : index
    %c0_116 = arith.constant 0 : index
    %c0_117 = arith.constant 0 : index
    %67 = vector.load %arg10[%c0_115, %c0_116, %c0_117] : memref<8x16x16xbf16, #tpu.memory_space<vmem>>, vector<8x16x16xbf16>
    %68 = vector.shape_cast %67 : vector<8x16x16xbf16> to vector<128x16xbf16>
    %c2_118 = arith.constant 2 : index
    %c0_119 = arith.constant 0 : index
    %c0_120 = arith.constant 0 : index
    %69 = vector.load %arg5[%c2_118, %c0_119, %c0_120] : memref<4x16x8xbf16, #tpu.memory_space<vmem>>, vector<1x16x8xbf16>
    %70 = vector.shape_cast %69 : vector<1x16x8xbf16> to vector<16x8xbf16>
    %cst_121 = arith.constant dense<0.000000e+00> : vector<128x8xf32>
    %71 = tpu.matmul %68, %70, %cst_121 {dimension_numbers = #tpu.dot_dimension_numbers<[1], [0], [0], [1], [0, 0, 1, 1], [], []>} : vector<128x16xbf16>, vector<16x8xbf16>, vector<128x8xf32> -> vector<128x8xf32>
    %cst_122 = arith.constant dense<0.000000e+00> : vector<8xf32>
    %72 = vector.multi_reduction <add>, %71, %cst_122 [0] : vector<128x8xf32> to vector<8xf32>
    %73 = vector.shape_cast %72 : vector<8xf32> to vector<1x8xf32>
    %74 = arith.addf %50, %73 : vector<1x8xf32>
    %75 = arith.mulf %71, %71 : vector<128x8xf32>
    %cst_123 = arith.constant dense<0.000000e+00> : vector<8xf32>
    %76 = vector.multi_reduction <add>, %75, %cst_123 [0] : vector<128x8xf32> to vector<8xf32>
    %77 = vector.shape_cast %76 : vector<8xf32> to vector<1x8xf32>
    %78 = arith.addf %54, %77 : vector<1x8xf32>
    %79 = vector.shape_cast %71 : vector<128x8xf32> to vector<8x16x8xf32>
    %c0_124 = arith.constant 0 : index
    %c0_125 = arith.constant 0 : index
    %c1_126 = arith.constant 1 : index
    %c0_127 = arith.constant 0 : index
    %c0_128 = arith.constant 0 : index
    %80 = vector.load %arg7[%c0_124, %c0_125, %c1_126, %c0_127, %c0_128] : memref<1x8x2x16x16xf32, #tpu.memory_space<vmem>>, vector<1x8x1x16x8xf32>
    %81 = vector.shape_cast %80 : vector<1x8x1x16x8xf32> to vector<8x16x8xf32>
    %82 = vector.shape_cast %79 : vector<8x16x8xf32> to vector<1x8x1x16x8xf32>
    tpu.vector_store %arg7[%c0_124, %c0_125, %c1_126, %c0_127, %c0_128], %82 {strides = array<i32>} : memref<1x8x2x16x16xf32, #tpu.memory_space<vmem>>, vector<1x8x1x16x8xf32>,
    %c1_129 = arith.constant 1 : index
    %c1_130 = arith.constant 1 : index
    %c0_131 = arith.constant 0 : index
    %83 = vector.load %arg9[%c1_129, %c1_130, %c0_131] : memref<10x18x4xbf16, #tpu.memory_space<vmem>>, vector<8x16x4xbf16>
    %c0_132 = arith.constant 0 : index
    %c0_133 = arith.constant 0 : index
    %c0_134 = arith.constant 0 : index
    %84 = vector.load %arg10[%c0_132, %c0_133, %c0_134] : memref<8x16x16xbf16, #tpu.memory_space<vmem>>, vector<8x16x4xbf16>
    tpu.vector_store %arg10[%c0_132, %c0_133, %c0_134], %83 {strides = array<i32>} : memref<8x16x16xbf16, #tpu.memory_space<vmem>>, vector<8x16x4xbf16>,
    %c1_135 = arith.constant 1 : index
    %c2_136 = arith.constant 2 : index
    %c0_137 = arith.constant 0 : index
    %85 = vector.load %arg9[%c1_135, %c2_136, %c0_137] : memref<10x18x4xbf16, #tpu.memory_space<vmem>>, vector<8x16x4xbf16>
    %c0_138 = arith.constant 0 : index
    %c0_139 = arith.constant 0 : index
    %c4_140 = arith.constant 4 : index
    %86 = vector.load %arg10[%c0_138, %c0_139, %c4_140] : memref<8x16x16xbf16, #tpu.memory_space<vmem>>, vector<8x16x4xbf16>
    tpu.vector_store %arg10[%c0_138, %c0_139, %c4_140], %85 {strides = array<i32>} : memref<8x16x16xbf16, #tpu.memory_space<vmem>>, vector<8x16x4xbf16>,
    %c2_141 = arith.constant 2 : index
    %c1_142 = arith.constant 1 : index
    %c0_143 = arith.constant 0 : index
    %87 = vector.load %arg9[%c2_141, %c1_142, %c0_143] : memref<10x18x4xbf16, #tpu.memory_space<vmem>>, vector<8x16x4xbf16>
    %c0_144 = arith.constant 0 : index
    %c0_145 = arith.constant 0 : index
    %c8_146 = arith.constant 8 : index
    %88 = vector.load %arg10[%c0_144, %c0_145, %c8_146] : memref<8x16x16xbf16, #tpu.memory_space<vmem>>, vector<8x16x4xbf16>
    tpu.vector_store %arg10[%c0_144, %c0_145, %c8_146], %87 {strides = array<i32>} : memref<8x16x16xbf16, #tpu.memory_space<vmem>>, vector<8x16x4xbf16>,
    %c2_147 = arith.constant 2 : index
    %c2_148 = arith.constant 2 : index
    %c0_149 = arith.constant 0 : index
    %89 = vector.load %arg9[%c2_147, %c2_148, %c0_149] : memref<10x18x4xbf16, #tpu.memory_space<vmem>>, vector<8x16x4xbf16>
    %c0_150 = arith.constant 0 : index
    %c0_151 = arith.constant 0 : index
    %c12_152 = arith.constant 12 : index
    %90 = vector.load %arg10[%c0_150, %c0_151, %c12_152] : memref<8x16x16xbf16, #tpu.memory_space<vmem>>, vector<8x16x4xbf16>
    tpu.vector_store %arg10[%c0_150, %c0_151, %c12_152], %89 {strides = array<i32>} : memref<8x16x16xbf16, #tpu.memory_space<vmem>>, vector<8x16x4xbf16>,
    %c0_153 = arith.constant 0 : index
    %c0_154 = arith.constant 0 : index
    %c0_155 = arith.constant 0 : index
    %91 = vector.load %arg10[%c0_153, %c0_154, %c0_155] : memref<8x16x16xbf16, #tpu.memory_space<vmem>>, vector<8x16x16xbf16>
    %92 = vector.shape_cast %91 : vector<8x16x16xbf16> to vector<128x16xbf16>
    %c3 = arith.constant 3 : index
    %c0_156 = arith.constant 0 : index
    %c0_157 = arith.constant 0 : index
    %93 = vector.load %arg5[%c3, %c0_156, %c0_157] : memref<4x16x8xbf16, #tpu.memory_space<vmem>>, vector<1x16x8xbf16>
    %94 = vector.shape_cast %93 : vector<1x16x8xbf16> to vector<16x8xbf16>
    %cst_158 = arith.constant dense<0.000000e+00> : vector<128x8xf32>
    %95 = tpu.matmul %92, %94, %cst_158 {dimension_numbers = #tpu.dot_dimension_numbers<[1], [0], [0], [1], [0, 0, 1, 1], [], []>} : vector<128x16xbf16>, vector<16x8xbf16>, vector<128x8xf32> -> vector<128x8xf32>
    %cst_159 = arith.constant dense<0.000000e+00> : vector<8xf32>
    %96 = vector.multi_reduction <add>, %95, %cst_159 [0] : vector<128x8xf32> to vector<8xf32>
    %97 = vector.shape_cast %96 : vector<8xf32> to vector<1x8xf32>
    %98 = arith.addf %74, %97 : vector<1x8xf32>
    %99 = arith.mulf %95, %95 : vector<128x8xf32>
    %cst_160 = arith.constant dense<0.000000e+00> : vector<8xf32>
    %100 = vector.multi_reduction <add>, %99, %cst_160 [0] : vector<128x8xf32> to vector<8xf32>
    %101 = vector.shape_cast %100 : vector<8xf32> to vector<1x8xf32>
    %102 = arith.addf %78, %101 : vector<1x8xf32>
    %103 = vector.shape_cast %95 : vector<128x8xf32> to vector<8x16x8xf32>
    %c0_161 = arith.constant 0 : index
    %c0_162 = arith.constant 0 : index
    %c1_163 = arith.constant 1 : index
    %c0_164 = arith.constant 0 : index
    %c8_165 = arith.constant 8 : index
    %104 = vector.load %arg7[%c0_161, %c0_162, %c1_163, %c0_164, %c8_165] : memref<1x8x2x16x16xf32, #tpu.memory_space<vmem>>, vector<1x8x1x16x8xf32>
    %105 = vector.shape_cast %104 : vector<1x8x1x16x8xf32> to vector<8x16x8xf32>
    %106 = vector.shape_cast %103 : vector<8x16x8xf32> to vector<1x8x1x16x8xf32>
    tpu.vector_store %arg7[%c0_161, %c0_162, %c1_163, %c0_164, %c8_165], %106 {strides = array<i32>} : memref<1x8x2x16x16xf32, #tpu.memory_space<vmem>>, vector<1x8x1x16x8xf32>,
    %c0_166 = arith.constant 0 : index
    %c0_167 = arith.constant 0 : index
    %c0_168 = arith.constant 0 : index
    %c0_169 = arith.constant 0 : index
    %107 = vector.load %arg8[%c0_166, %c0_167, %c0_168, %c0_169] : memref<1x1x2x8xf32, #tpu.memory_space<vmem>>, vector<1x1x1x8xf32>
    %108 = vector.shape_cast %107 : vector<1x1x1x8xf32> to vector<1x8xf32>
    %109 = vector.shape_cast %98 : vector<1x8xf32> to vector<1x1x1x8xf32>
    tpu.vector_store %arg8[%c0_166, %c0_167, %c0_168, %c0_169], %109 {strides = array<i32>} : memref<1x1x2x8xf32, #tpu.memory_space<vmem>>, vector<1x1x1x8xf32>,
    %c0_170 = arith.constant 0 : index
    %c0_171 = arith.constant 0 : index
    %c1_172 = arith.constant 1 : index
    %c0_173 = arith.constant 0 : index
    %110 = vector.load %arg8[%c0_170, %c0_171, %c1_172, %c0_173] : memref<1x1x2x8xf32, #tpu.memory_space<vmem>>, vector<1x1x1x8xf32>
    %111 = vector.shape_cast %110 : vector<1x1x1x8xf32> to vector<1x8xf32>
    %112 = vector.shape_cast %102 : vector<1x8xf32> to vector<1x1x1x8xf32>
    tpu.vector_store %arg8[%c0_170, %c0_171, %c1_172, %c0_173], %112 {strides = array<i32>} : memref<1x1x2x8xf32, #tpu.memory_space<vmem>>, vector<1x1x1x8xf32>,
    return
  }
  func.func @transform_0(%arg0: i32, %arg1: i32) -> (i32, i32, i32, i32) {
    %c0_i32 = arith.constant 0 : i32
    %c0_i32_0 = arith.constant 0 : i32
    %c0_i32_1 = arith.constant 0 : i32
    return %arg0, %arg1, %c0_i32, %c0_i32_0 : i32, i32, i32, i32
  }
  func.func @transform_1(%arg0: i32, %arg1: i32) -> (i32, i32, i32, i32) {
    %c8_i32 = arith.constant 8 : i32
    %0 = arith.muli %arg1, %c8_i32 : i32
    %c8_i32_0 = arith.constant 8 : i32
    %1 = arith.addi %0, %c8_i32_0 : i32
    %c0_i32 = arith.constant 0 : i32
    %c0_i32_1 = arith.constant 0 : i32
    %c0_i32_2 = arith.constant 0 : i32
    return %arg0, %1, %c0_i32, %c0_i32_1 : i32, i32, i32, i32
  }
  func.func @transform_2(%arg0: i32, %arg1: i32) -> (i32, i32, i32, i32) {
    %c8_i32 = arith.constant 8 : i32
    %0 = arith.muli %arg1, %c8_i32 : i32
    %c8_i32_0 = arith.constant 8 : i32
    %1 = arith.addi %0, %c8_i32_0 : i32
    %c1_i32 = arith.constant 1 : i32
    %2 = arith.addi %1, %c1_i32 : i32
    %c0_i32 = arith.constant 0 : i32
    %c0_i32_1 = arith.constant 0 : i32
    %c0_i32_2 = arith.constant 0 : i32
    return %arg0, %2, %c0_i32, %c0_i32_1 : i32, i32, i32, i32
  }
  func.func @transform_3(%arg0: i32, %arg1: i32) -> (i32, i32, i32) {
    %c0_i32 = arith.constant 0 : i32
    %c0_i32_0 = arith.constant 0 : i32
    %c0_i32_1 = arith.constant 0 : i32
    %c0_i32_2 = arith.constant 0 : i32
    return %c0_i32, %c0_i32_0, %c0_i32_1 : i32, i32, i32
  }
  func.func @transform_4(%arg0: i32, %arg1: i32) -> (i32, i32) {
    %c0_i32 = arith.constant 0 : i32
    %c0_i32_0 = arith.constant 0 : i32
    %c0_i32_1 = arith.constant 0 : i32
    return %c0_i32, %c0_i32_0 : i32, i32
  }
  func.func @transform_5(%arg0: i32, %arg1: i32) -> (i32, i32, i32, i32, i32) {
    %c0_i32 = arith.constant 0 : i32
    %c0_i32_0 = arith.constant 0 : i32
    %c0_i32_1 = arith.constant 0 : i32
    %c0_i32_2 = arith.constant 0 : i32
    return %arg0, %arg1, %c0_i32, %c0_i32_0, %c0_i32_1 : i32, i32, i32, i32, i32
  }
  func.func @transform_6(%arg0: i32, %arg1: i32) -> (i32, i32, i32, i32) {
    %c0_i32 = arith.constant 0 : i32
    %c0_i32_0 = arith.constant 0 : i32
    %c0_i32_1 = arith.constant 0 : i32
    return %arg0, %arg1, %c0_i32, %c0_i32_0 : i32, i32, i32, i32
  }
}

</mosaic_0001>

<bundles_post_ra>
// kernel: tpu_custom_call.1
= control target key start
LH: loop header
LB: loop body
LE: loop exit
PB: predicated region body
PF: predicated region fallthrough
CT: control target
= control target key end

     0   :  { %s7485_s0 = inlined_call_operand.vmem [shape: bf16[2,18,18,4], index: 0, kind: input, shape index: {}]   ;;  %s7486_s1 = inlined_call_operand.vmem [shape: bf16[2,18,18,4], index: 1, kind: input, shape index: {}]   ;;  %s7487_s2 = inlined_call_operand.vmem [shape: bf16[2,18,18,4], index: 2, kind: input, shape index: {}]   ;;  %s7488_s3 = inlined_call_operand.vmem [shape: bf16[4,16,8], index: 3, kind: input, shape index: {}]   ;;  %s7489_s4 = inlined_call_operand.vmem [shape: f32[1,8], index: 4, kind: input, shape index: {}]   ;;  %s7490_s5 = inlined_call_operand.hbm [shape: f32[2,16,2,16,16], index: 5, kind: output, shape index: {0}]   ;;  %s7491_s6 = inlined_call_operand.hbm [shape: f32[2,2,2,8], index: 6, kind: output, shape index: {1}]  }
   0x1   :  { %7493 = sst [smem:[#allocation10_spill]] %s7485_s0 }
   0x2   :  { %12 = vsyncpa [#allocation5], 0 }
   0x3   :  { %14 = vsyncpa [#allocation5 + $0x1], 0 }
   0x4   :  { %15 = vsyncpa [#allocation7], 0 }
   0x5   :  { %17 = vsyncpa [#allocation7 + $0x1], 0  ;;  %s5479_s21 = smov 0   ;;  %s5481_s22 = smov 0  }
   0x6   :  { %s5483_s23 = smov 0   ;;  %s5485_s24 = smov 0  }
   0x7   :  { %s5487_s25 = smov 0   ;;  %s5489_s4 = smov 0  }
   0x8   :  { %s5491_s26 = smov 0   ;;  %s5493_s27 = smov 0  }
   0x9 LB: > { %s4918_s28 = sadd.s32 4294967295, %s5438_s27   ;;  %s4919_s29 = sadd.s32 4294967294, %s5438_s27   ;;  %s5438_s27 = sphi %s5493_s27, %s23_s27   ;;  %s5434_s26 = sphi %s5491_s26, %s7510_s26   ;;  %s5430_s4 = sphi %s5489_s4, %s7509_s4   ;;  %s5426_s25 = sphi %s5487_s25, %s7508_s25   ;;  %s5422_s24 = sphi %s5485_s24, %s7507_s24   ;;  %s5418_s23 = sphi %s5483_s23, %s7506_s23   ;;  %s5414_s22 = sphi %s5481_s22, %s7505_s22   ;;  %s5410_s21 = sphi %s5479_s21, %s7504_s21  }
   0xa   : > { %s32_s30 = sadd.s32 1, %s5430_s4  ;;  %s35_s7 = sadd.s32 1, %s5434_s26 }
   0xb   : > { %p33_p0 = scmp.ge.s32.totalorder %s32_s30, 2  ;;  %p188_p1 = scmp.ne.s32.totalorder %s5418_s23, %s5414_s22 }
   0xc   : > { %p189_p2 = scmp.eq.s32.totalorder %s4918_s28, 3  ;;  %p194_p5 = scmp.ne.s32.totalorder %s5414_s22, %s5410_s21 }
   0xd   : > { %s7512_s30 = smov (%p33_p0, %s32_s30), 0  ;;  %s7514_s7 = smov (!%p33_p0, %s35_s7), %s5434_s26 }
   0xe   : > { %s174_s8 = ssub.s32 %s5430_s4, %s7512_s30  ;;  %p5530_p3 = por %p189_p2, %p188_p1 }
   0xf   : > { %p37_p4 = scmp.ge.s32.totalorder %s7514_s7, 2  ;;  %p195_p6 = scmp.eq.s32.totalorder %s4919_s29, 3 }
  0x10   : > { %p4926_p7 = scmp.ge.s32.totalorder %s5438_s27, 1  ;;  %p303_p9 = scmp.lt.s32.totalorder %s5438_s27, 5 }
  0x11   : > { %s7516_s7 = smov (%p37_p4, %s7514_s7), 0  ;;  %p5539_p8 = por %p195_p6, %p194_p5 }
  0x12   : > { %s173_s11 = ssub.s32 %s5434_s26, %s7516_s7  ;;  %s178_s12 = sadd.s32 1, %s5418_s23 }
  0x13   : > { %s175_s13 = sor.u32 %s174_s8, %s173_s11  ;;  %p304_p10 = pnand %p4926_p7, %p303_p9 }
  0x14   : > { %p176_p11 = scmp.eq.s32.totalorder %s175_s13, 0  ;;  %s5551_s15 = sshll.u32 (!%p304_p10), %s5422_s24, 3 }
  0x15   : > { %307 = sbr.rel (%p304_p10) target bundleno = 1151 (0x47f), region = 40  ;;  %p376_p12 = scmp.lt.s32.totalorder (!%p304_p10), %s5426_s25, 1 }
  0x16   : > { %s5548_s14 = scalar_select %p176_p11, %s5418_s23, %s178_s12  }
  0x17   : > { %p378_p13 = scmp.lt.s32.totalorder (!%p304_p10), %s5551_s15, 17  ;;  %s7496_s0 = sld [smem:[#allocation10_spill]] (!%p304_p10) }
  0x18   : > { %s5440_s12 = smov (!%p304_p10), 4   ;;  %s392_s13 = sadd.s32 (!%p304_p10), 8, %s5551_s15 }
  0x19   : > { %p5653_p0 = scmp.lt.s32.totalorder (!%p304_p10), %s392_s13, 17 }
  0x1a   : > { %s377_s16 = scalar_select %p376_p12, %s5426_s25, 1  ;;  %vm443_vm0 = vcmask 27648   ;;  %vm446_vm1 = vcmask 24576   ;;  %vm539_vm2 = vsmask.f32 3328  ;;  %vm782_vm5 = vcmask 60448  }
  0x1b   : > { %s379_s17 = scalar_select %p378_p13, %s5551_s15, 17  ;;  %vm540_vm3 = vsmask.f32 7440  ;;  %vm1721_vm6 = vcmask 1042432   ;;  %vm1722_vm7 = vcmask 1046532   ;;  %vm880_vm9 = vcmask 93248  }
  0x1c   : > { %s5557_s18 = smul.u32 54, %s377_s16  ;;  %vm5588_vm4 = vmor %vm539_vm2, %vm540_vm3  ;;  %s7518_s13 = smov (!%p5653_p0, %s392_s13), 17  ;;  %vm1161_vm10 = vcmask 126048   ;;  %vm1242_vm11 = vcmask 130048   ;;  %vm1316_vm12 = vcmask 64512   ;;  %vm2586_vm13 = vcmask 130112  }
  0x1d   : > { %s5228_s19 = smul.u32 3, %s379_s17  ;;  %vm5819_vm8 = vmor %vm1721_vm6, %vm1722_vm7  ;;  %vm4713_vm14 = vcmask 57344  }
  0x1e   : > { %s5230_s17 = smul.u32 3, %s7518_s13  ;;  %s5442_s13 = smov 12  }
  0x1f   : > { %s382_s20 = sadd.s32 %s5557_s18, %s5228_s19 }
  0x20   : > { %s4930_s28 = sshll.u32 %s382_s20, 2  ;;  %s399_s19 = sadd.s32 %s5230_s17, %s5557_s18 }
  0x21   : > { %s5563_s11 = scalar_lea.vmem %s7496_s0, %s4930_s28  ;;  %s4932_s20 = sshll.u32 %s399_s19, 2 }
  0x22   : > { %v422_v0 = vld [vmem:[%s5563_s11 + $0xc] sm:$0xf]  ;;  %v423_v1 = vld [vmem:[%s5563_s11 + $0x10] sm:$0xf]  ;;  %v419_v2 = vld [vmem:[%s5563_s11] sm:$0xf]  ;;  %s401_s8 = scalar_lea.vmem %s7486_s1, %s4932_s20 }
  0x23   : > { %448 = vst.msk [vmem:[#allocation2 + $0xc] sm:$0xf] %vm443_vm0, %v422_v0  ;;  %v420_v3 = vld [vmem:[%s5563_s11 + $0x4] sm:$0xf]  ;;  %v424_v4 = vld [vmem:[%s5563_s11 + $0x14] sm:$0x1] }
  0x24   : > { %449 = vst.msk [vmem:[#allocation2 + $0x10] sm:$0xf] %vm443_vm0, %v423_v1  ;;  %v421_v5 = vld [vmem:[%s5563_s11 + $0x8] sm:$0x1]  ;;  %v430_v7 = vld [vmem:[%s5563_s11 + $0x2c] sm:$0x1] }
  0x25   : > { %444 = vst.msk [vmem:[#allocation2] sm:$0xf] %vm443_vm0, %v419_v2  ;;  %v429_v6 = vld [vmem:[%s5563_s11 + $0x28] sm:$0xf]  ;;  %v428_v8 = vld [vmem:[%s5563_s11 + $0x24] sm:$0xf] }
  0x26   : > { %445 = vst.msk [vmem:[#allocation2 + $0x4] sm:$0xf] %vm443_vm0, %v420_v3  ;;  %v434_v9 = vld [vmem:[%s5563_s11 + $0x3c] sm:$0xf]  ;;  %v435_v26 = vld [vmem:[%s5563_s11 + $0x40] sm:$0xf] }
  0x27   : > { %450 = vst.msk [vmem:[#allocation2 + $0x14] sm:$0x1] %vm446_vm1, %v424_v4  ;;  %v432_v41 = vld [vmem:[%s5563_s11 + $0x34] sm:$0xf]  ;;  %v433_v42 = vld [vmem:[%s5563_s11 + $0x38] sm:$0x1] }
  0x28   : > { %447 = vst.msk [vmem:[#allocation2 + $0x8] sm:$0x1] %vm446_vm1, %v421_v5  ;;  %v425_v46 = vld [vmem:[%s5563_s11 + $0x18] sm:$0xf]  ;;  %v426_v52 = vld [vmem:[%s5563_s11 + $0x1c] sm:$0xf] }
  0x29   : > { %455 = vst.msk [vmem:[#allocation2 + $0x28] sm:$0xf] %vm443_vm0, %v429_v6  ;;  %v438_v56 = vld [vmem:[%s5563_s11 + $0x4c] sm:$0xf]  ;;  %v439_v61 = vld [vmem:[%s5563_s11 + $0x50] sm:$0x1] }
  0x2a   : > { %v518_v10 = vld [vmem:[#allocation2 + $0xc] sm:$0xf]  ;;  %456 = vst.msk [vmem:[#allocation2 + $0x2c] sm:$0x1] %vm446_vm1, %v430_v7  ;;  %v437_v6 = vld [vmem:[%s5563_s11 + $0x48] sm:$0xf] }
  0x2b   : > { %v519_v11 = vld [vmem:[#allocation2 + $0x10] sm:$0xf]  ;;  %v567_v12 = vshrl.u32 %v518_v10, 16  ;;  %v570_v13 = vshll.u32 %v518_v10, 16  ;;  %454 = vst.msk [vmem:[#allocation2 + $0x24] sm:$0xf] %vm443_vm0, %v428_v8 }
  0x2c   : > { %v576_v14 = vshll.u32 %v519_v11, 16  ;;  %v580_v15 = vshrl.u32 %v519_v11, 16  ;;  %v515_v16 = vld [vmem:[#allocation2] sm:$0xf]  ;;  %460 = vst.msk [vmem:[#allocation2 + $0x3c] sm:$0xf] %vm443_vm0, %v434_v9 }
  0x2d   : > { %v569_v17 = vrot.slane %v567_v12, 4  ;;  %v572_v18 = vrot.slane %v570_v13, 5  ;;  %v516_v19 = vld [vmem:[#allocation2 + $0x4] sm:$0xf]  ;;  %v543_v20 = vshrl.u32 %v515_v16, 16  ;;  %v546_v21 = vshll.u32 %v515_v16, 16 }
  0x2e   : > { %v582_v22 = vrot.slane %v580_v15, 4  ;;  %v552_v23 = vshll.u32 %v516_v19, 16  ;;  %v556_v24 = vshrl.u32 %v516_v19, 16  ;;  %v520_v25 = vld [vmem:[#allocation2 + $0x14] sm:$0x1]  ;;  %v578_v28 = vrot.slane %v576_v14, 5 }
  0x2f   : > { %v573_v27 = vor.u32 %v572_v18, %v569_v17  ;;  %v545_v29 = vrot.slane %v543_v20, 4  ;;  %v548_v30 = vrot.slane %v546_v21, 5  ;;  %v517_v31 = vld [vmem:[#allocation2 + $0x8] sm:$0x1]  ;;  %v586_v35 = vshll.u32 %v520_v25, 16  ;;  %s6400_s28 = sand.u32 1, %s5414_s22  }
  0x30   : > { %v554_v33 = vrot.slane %v552_v23, 5  ;;  %v558_v34 = vrot.slane %v556_v24, 4  ;;  %v525_v36 = vld [vmem:[#allocation2 + $0x28] sm:$0xf]  ;;  %v583_v39 = vor.u32 %v582_v22, %v578_v28  ;;  %v562_v43 = vshll.u32 %v517_v31, 16  ;;  %s4927_s29 = sshll.u32 %s6400_s28, 8 }
  0x31   : > { %v574_v37 = vrot.slane %v573_v27, 4  ;;  %v549_v38 = vor.u32 %v548_v30, %v545_v29  ;;  %v624_v40 = vshll.u32 %v525_v36, 16  ;;  %v628_v44 = vshrl.u32 %v525_v36, 16  ;;  %v526_v50 = vld [vmem:[#allocation2 + $0x2c] sm:$0x1] }
  0x32   : > { %v524_v45 = vld [vmem:[#allocation2 + $0x24] sm:$0xf]  ;;  %v559_v49 = vor.u32 %v558_v34, %v554_v33  ;;  %461 = vst.msk [vmem:[#allocation2 + $0x40] sm:$0xf] %vm443_vm0, %v435_v26  ;;  %v584_v58 = vrot.slane %v583_v39, 4  ;;  %v588_v59 = vrot.slane %v586_v35, 5 }
  0x33   : > { %v579_v47 = vsel %vm5588_vm4, %v574_v37, %v578_v28  ;;  %v550_v48 = vrot.slane %v549_v38, 4  ;;  %v5597_v51 = vrot.slane %v624_v40, 5  ;;  %v630_v53 = vrot.slane %v628_v44, 4  ;;  %v530_v55 = vld [vmem:[#allocation2 + $0x3c] sm:$0xf] }
  0x34   : > { %738 = vrot.lane.b32.xlu1 %v579_v47, %s5440_s12  ;;  %v615_v54 = vshrl.u32 %v524_v45, 16  ;;  %v618_v60 = vshll.u32 %v524_v45, 16  ;;  %458 = vst.msk [vmem:[#allocation2 + $0x34] sm:$0xf] %vm443_vm0, %v432_v41  ;;  %v634_v63 = vshll.u32 %v526_v50, 16  ;;  %v663_v0 = vshrl.u32 %v530_v55, 16 }
  0x35   : > { %v555_v57 = vsel %vm5588_vm4, %v550_v48, %v554_v33  ;;  %v631_v62 = vor.u32 %v630_v53, %v5597_v51  ;;  %v666_v1 = vshll.u32 %v530_v55, 16  ;;  %459 = vst.msk [vmem:[#allocation2 + $0x38] sm:$0x1] %vm446_vm1, %v433_v42  ;;  %v560_v2 = vrot.slane %v559_v49, 4  ;;  %v427_v8 = vld [vmem:[%s5563_s11 + $0x20] sm:$0x1] }
  0x36   : > { %734 = vrot.lane.b32.xlu0 %v555_v57, %s5440_s12  ;;  %v564_v3 = vrot.slane %v562_v43, 5  ;;  %v617_v4 = vrot.slane %v615_v54, 4  ;;  %v620_v5 = vrot.slane %v618_v60, 5  ;;  %451 = vst.msk [vmem:[#allocation2 + $0x18] sm:$0xf] %vm443_vm0, %v425_v46  ;;  %v589_v7 = vsel %vm5588_vm4, %v584_v58, %v588_v59 }
  0x37   : > { %452 = vst.msk [vmem:[#allocation2 + $0x1c] sm:$0xf] %vm443_vm0, %v426_v52  ;;  %v632_v9 = vrot.slane %v631_v62, 4  ;;  %v636_v10 = vrot.slane %v634_v63, 5  ;;  %v665_v11 = vrot.slane %v663_v0, 4  ;;  %v668_v12 = vrot.slane %v666_v1, 5 }
  0x38   : > { %464 = vst.msk [vmem:[#allocation2 + $0x4c] sm:$0xf] %vm443_vm0, %v438_v56  ;;  %v565_v13 = vsel %vm5588_vm4, %v560_v2, %v564_v3  ;;  %v621_v14 = vor.u32 %v620_v5, %v617_v4  ;;  %v441_v15 = vld [vmem:[%s5563_s11 + $0x58] sm:$0xf]  ;;  %v442_v39 = vld [vmem:[%s5563_s11 + $0x5c] sm:$0x1] }
  0x39   : > { %465 = vst.msk [vmem:[#allocation2 + $0x50] sm:$0x1] %vm446_vm1, %v439_v61  ;;  %v5624_v17 = vld [vmem:[#allocation2 + $0x40] sm:$0xf]  ;;  %v637_v20 = vsel %vm5588_vm4, %v632_v9, %v636_v10  ;;  %v669_v21 = vor.u32 %v668_v12, %v665_v11  ;;  %v431_v44 = vld [vmem:[%s5563_s11 + $0x30] sm:$0xf] }
  0x3a   : > { %463 = vst.msk [vmem:[#allocation2 + $0x48] sm:$0xf] %vm443_vm0, %v437_v6  ;;  %v622_v24 = vrot.slane %v621_v14, 4  ;;  %v672_v29 = vshll.u32 %v5624_v17, 16  ;;  %v436_v0 = vld [vmem:[%s5563_s11 + $0x44] sm:$0x1] }
  0x3b   : > { %v528_v16 = vld [vmem:[#allocation2 + $0x34] sm:$0xf]  ;;  %453 = vst.msk [vmem:[#allocation2 + $0x20] sm:$0x1] %vm446_vm1, %v427_v8  ;;  %v670_v48 = vrot.slane %v669_v21, 4  ;;  %v676_v12 = vshrl.u32 %v5624_v17, 16 }
  0x3c   : > { %740 = vrot.lane.b32.xlu1 %v589_v7, %s5440_s12  ;;  %v648_v18 = vshll.u32 %v528_v16, 16  ;;  %v652_v19 = vshrl.u32 %v528_v16, 16  ;;  %v529_v22 = vld [vmem:[#allocation2 + $0x38] sm:$0x1]  ;;  %467 = vst.msk [vmem:[#allocation2 + $0x58] sm:$0xf] %vm443_vm0, %v441_v15  ;;  %v627_v45 = vsel %vm5588_vm4, %v622_v24, %v5597_v51 }
  0x3d   : > { %v521_v23 = vld [vmem:[#allocation2 + $0x18] sm:$0xf]  ;;  %v658_v35 = vshll.u32 %v529_v22, 16  ;;  %468 = vst.msk [vmem:[#allocation2 + $0x5c] sm:$0x1] %vm446_vm1, %v442_v39  ;;  %v5642_v53 = vrot.slane %v672_v29, 5 }
  0x3e   : > { %736 = vrot.lane.b32.xlu0 %v565_v13, %s5440_s12  ;;  %v5630_v25 = vrot.slane %v648_v18, 5  ;;  %v654_v26 = vrot.slane %v652_v19, 4  ;;  %v522_v27 = vld [vmem:[#allocation2 + $0x1c] sm:$0xf]  ;;  %v591_v28 = vshrl.u32 %v521_v23, 16  ;;  %v594_v30 = vshll.u32 %v521_v23, 16 }
  0x3f   : > { %v600_v31 = vshll.u32 %v522_v27, 16  ;;  %v604_v33 = vshrl.u32 %v522_v27, 16  ;;  %v534_v34 = vld [vmem:[#allocation2 + $0x4c] sm:$0xf]  ;;  %v660_v54 = vrot.slane %v658_v35, 5  ;;  %v675_v3 = vsel %vm5588_vm4, %v670_v48, %v5642_v53 }
  0x40   : > { %v593_v36 = vrot.slane %v591_v28, 4  ;;  %v696_v37 = vshll.u32 %v534_v34, 16  ;;  %v700_v38 = vshrl.u32 %v534_v34, 16  ;;  %v655_v40 = vor.u32 %v654_v26, %v5630_v25  ;;  %457 = vst.msk [vmem:[#allocation2 + $0x30] sm:$0xf] %vm443_vm0, %v431_v44 }
  0x41   : > { %v596_v41 = vrot.slane %v594_v30, 5  ;;  %v606_v42 = vrot.slane %v604_v33, 4  ;;  %v533_v43 = vld [vmem:[#allocation2 + $0x48] sm:$0xf]  ;;  %v602_v50 = vrot.slane %v600_v31, 5  ;;  %v678_v28 = vrot.slane %v676_v12, 4 }
  0x42   : > { %v687_v46 = vshrl.u32 %v533_v43, 16  ;;  %v523_v47 = vld [vmem:[#allocation2 + $0x20] sm:$0x1]  ;;  %v690_v52 = vshll.u32 %v533_v43, 16  ;;  %v698_v55 = vrot.slane %v696_v37, 5  ;;  %v702_v56 = vrot.slane %v700_v38, 4 }
  0x43   : > { %v597_v49 = vor.u32 %v596_v41, %v593_v36  ;;  %v656_v51 = vrot.slane %v655_v40, 4  ;;  %v535_v58 = vld [vmem:[#allocation2 + $0x50] sm:$0x1]  ;;  %v607_v59 = vor.u32 %v606_v42, %v602_v50  ;;  %v610_v60 = vshll.u32 %v523_v47, 16  ;;  %v537_v63 = vld [vmem:[#allocation2 + $0x58] sm:$0xf] }
  0x44   : > { %748 = vrot.lane.b32.xlu1 %v637_v20, %s5440_s12  ;;  %v689_v61 = vrot.slane %v687_v46, 4  ;;  %v692_v62 = vrot.slane %v690_v52, 5  ;;  %462 = vst.msk [vmem:[#allocation2 + $0x44] sm:$0x1] %vm446_vm1, %v436_v0  ;;  %v440_v2 = vld [vmem:[%s5563_s11 + $0x54] sm:$0xf]  ;;  %v703_v4 = vor.u32 %v702_v56, %v698_v55  ;;  %v679_v36 = vor.u32 %v678_v28, %v5642_v53 }
  0x45   : > { %v598_v57 = vrot.slane %v597_v49, 4  ;;  %v706_v5 = vshll.u32 %v535_v58, 16  ;;  %466 = vst.msk [vmem:[#allocation2 + $0x54] sm:$0xf] %vm443_vm0, %v440_v2  ;;  %v608_v6 = vrot.slane %v607_v59, 4  ;;  %v612_v7 = vrot.slane %v610_v60, 5 }
  0x46   : > { %746 = vrot.lane.b32.xlu0 %v627_v45, %s5440_s12  ;;  %v720_v8 = vshll.u32 %v537_v63, 16  ;;  %v661_v9 = vsel %vm5588_vm4, %v656_v51, %v660_v54  ;;  %v693_v10 = vor.u32 %v692_v62, %v689_v61  ;;  %v724_v11 = vshrl.u32 %v537_v63, 16  ;;  %v538_v24 = vld [vmem:[#allocation2 + $0x5c] sm:$0x1]  ;;  %v800_v43 = vld [vmem:[#allocation2 + $0xc] sm:$0xf] }
  0x47   : > { %v603_v1 = vsel %vm5588_vm4, %v598_v57, %v602_v50  ;;  %v527_v13 = vld [vmem:[#allocation2 + $0x30] sm:$0xf]  ;;  %v704_v14 = vrot.slane %v703_v4, 4  ;;  %v708_v15 = vrot.slane %v706_v5, 5  ;;  %v613_v19 = vsel %vm5588_vm4, %v608_v6, %v612_v7  ;;  %s7492_s11 = smov 8  }
  0x48   : > { %742 = vrot.lane.b32.xlu2 %v603_v1, %s5440_s12  ;;  %v639_v16 = vshrl.u32 %v527_v13, 16  ;;  %v642_v18 = vshll.u32 %v527_v13, 16  ;;  %v722_v20 = vrot.slane %v720_v8, 5  ;;  %v694_v21 = vrot.slane %v693_v10, 4  ;;  %v470_v48 = vld [vmem:[%s401_s8 + $0x4] sm:$0xf] }
  0x49   : > { %v726_v22 = vrot.slane %v724_v11, 4  ;;  %v709_v26 = vsel %vm5588_vm4, %v704_v14, %v708_v15  ;;  %v730_v31 = vshll.u32 %v538_v24, 16  ;;  %v680_v44 = vrot.slane %v679_v36, 4  ;;  %v469_v49 = vld [vmem:[%s401_s8] sm:$0xf] }
  0x4a   : > { %v641_v17 = vrot.slane %v639_v16, 4  ;;  %v644_v23 = vrot.slane %v642_v18, 5  ;;  %v699_v29 = vsel %vm5588_vm4, %v694_v21, %v698_v55  ;;  %v471_v53 = vld [vmem:[%s401_s8 + $0x8] sm:$0x1]  ;;  %474 = vst.msk [vmem:[#allocation2 + $0x64] sm:$0xf] %vm443_vm0, %v470_v48 }
  0x4b   : > { %v727_v30 = vor.u32 %v726_v22, %v722_v20  ;;  %v532_v34 = vld [vmem:[#allocation2 + $0x44] sm:$0x1]  ;;  %v732_v42 = vrot.slane %v730_v31, 5  ;;  %475 = vst.msk [vmem:[#allocation2 + $0x68] sm:$0x1] %vm446_vm1, %v471_v53  ;;  %s6406_s8 = scalar_lea.vmem [#allocation4], %s4927_s29 }
  0x4c   : > { %754 = vrot.lane.b32.xlu1 %v675_v3, %s5440_s12  ;;  %v645_v27 = vor.u32 %v644_v23, %v641_v17  ;;  %v536_v35 = vld [vmem:[#allocation2 + $0x54] sm:$0xf]  ;;  %v682_v38 = vshll.u32 %v532_v34, 16  ;;  %473 = vst.msk [vmem:[#allocation2 + $0x60] sm:$0xf] %vm443_vm0, %v469_v49  ;;  %s405_s29 = sadd.s32 9, %s5551_s15 }
  0x4d   : > { %v711_v39 = vshrl.u32 %v536_v35, 16  ;;  %v714_v40 = vshll.u32 %v536_v35, 16  ;;  %v728_v41 = vrot.slane %v727_v30, 4  ;;  %v803_v54 = vld [vmem:[#allocation2 + $0x1c] sm:$0xf]  ;;  %p6905_p1 = scmp.lt.s32.totalorder %s405_s29, 17 }
  0x4e   : > { %752 = vrot.lane.b32.xlu0 %v661_v9, %s5440_s12  ;;  %v646_v33 = vrot.slane %v645_v27, 4  ;;  %v684_v45 = vrot.slane %v682_v38, 5  ;;  %v802_v56 = vld [vmem:[#allocation2 + $0x18] sm:$0xf]  ;;  %v806_v57 = vld [vmem:[#allocation2 + $0x30] sm:$0xf] }
  0x4f   : > { %v713_v46 = vrot.slane %v711_v39, 4  ;;  %v716_v47 = vrot.slane %v714_v40, 5  ;;  %v805_v58 = vld [vmem:[#allocation2 + $0x28] sm:$0xf]  ;;  %v801_v59 = vld [vmem:[#allocation2 + $0x10] sm:$0xf] }
  0x50   : > { %744 = vrot.lane.b32.xlu2 %v613_v19, %s5440_s12  ;;  %v651_v37 = vsel %vm5588_vm4, %v646_v33, %v5630_v25  ;;  %v733_v25 = vsel %vm5588_vm4, %v728_v41, %v732_v42  ;;  %v685_v50 = vsel %vm5588_vm4, %v680_v44, %v684_v45  ;;  %v809_v60 = vld [vmem:[#allocation2 + $0x40] sm:$0xf]  ;;  %v808_v61 = vld [vmem:[#allocation2 + $0x3c] sm:$0xf]  ;;  %v804_v62 = vld [vmem:[#allocation2 + $0x24] sm:$0xf] }
  0x51   : > { %v717_v52 = vor.u32 %v716_v47, %v713_v46  ;;  %v900_v63 = vld [vmem:[#allocation2 + $0x18] sm:$0xf]  ;;  %v898_v0 = vld [vmem:[#allocation2 + $0x10] sm:$0xf]  ;;  %v812_v1 = vld [vmem:[#allocation2 + $0x54] sm:$0xf] }
  0x52   : > { %v946_v2 = vshrl.u32 %v900_v63, 16  ;;  %v949_v3 = vshll.u32 %v900_v63, 16  ;;  %v811_v4 = vld [vmem:[#allocation2 + $0x4c] sm:$0xf]  ;;  %v931_v5 = vshll.u32 %v898_v0, 16  ;;  %v935_v6 = vshrl.u32 %v898_v0, 16 }
  0x53   : > { %v718_v55 = vrot.slane %v717_v52, 4  ;;  %v904_v9 = vld [vmem:[#allocation2 + $0x28] sm:$0xf]  ;;  %v903_v10 = vld [vmem:[#allocation2 + $0x24] sm:$0xf]  ;;  %s7520_s29 = smov (!%p6905_p1, %s405_s29), 17 }
  0x54   : > { %760 = vrot.lane.b32.xlu1 %v709_v26, %s5440_s12  ;;  %v948_v7 = vrot.slane %v946_v2, 4  ;;  %v951_v8 = vrot.slane %v949_v3, 5  ;;  %v807_v11 = vld [vmem:[#allocation2 + $0x34] sm:$0xf]  ;;  %v5712_v12 = vld [vmem:[#allocation2 + $0x1c] sm:$0xf] }
  0x55   : > { %v723_v51 = vsel %vm5588_vm4, %v718_v55, %v722_v20  ;;  %v899_v13 = vld [vmem:[#allocation2 + $0x14] sm:$0x1]  ;;  %v5714_v14 = vrot.slane %v931_v5, 5  ;;  %v937_v15 = vrot.slane %v935_v6, 4  ;;  %v979_v16 = vshll.u32 %v904_v9, 16  ;;  %s5231_s15 = smul.u32 3, %s7520_s29 }
  0x56   : > { %758 = vrot.lane.b32.xlu0 %v699_v29, %s5440_s12  ;;  %v983_v18 = vshrl.u32 %v904_v9, 16  ;;  %v970_v19 = vshrl.u32 %v903_v10, 16  ;;  %v973_v20 = vshll.u32 %v903_v10, 16  ;;  %v815_v21 = vld [vmem:[#allocation2 + $0x64] sm:$0xf]  ;;  %v952_v22 = vor.u32 %v951_v8, %v948_v7 }
  0x57   : > { %v955_v17 = vshll.u32 %v5712_v12, 16  ;;  %v941_v23 = vshll.u32 %v899_v13, 16  ;;  %v814_v24 = vld [vmem:[#allocation2 + $0x60] sm:$0xf]  ;;  %v938_v26 = vor.u32 %v937_v15, %v5714_v14  ;;  %v897_v27 = vld [vmem:[#allocation2 + $0xc] sm:$0xf]  ;;  %s6941_s17 = sadd.s32 %s5231_s15, %s5557_s18 }
  0x58   : > { %750 = vrot.lane.b32.xlu2 %v651_v37, %s5440_s12  ;;  %v905_v28 = vld [vmem:[#allocation2 + $0x2c] sm:$0x1]  ;;  %v5720_v29 = vrot.slane %v979_v16, 5  ;;  %v985_v30 = vrot.slane %v983_v18, 4  ;;  %v972_v31 = vrot.slane %v970_v19, 4  ;;  %v975_v33 = vrot.slane %v973_v20, 5 }
  0x59   : > { %v953_v34 = vrot.slane %v952_v22, 4  ;;  %v5722_v35 = vrot.slane %v955_v17, 5  ;;  %v943_v36 = vrot.slane %v941_v23, 5  ;;  %v909_v37 = vld [vmem:[#allocation2 + $0x3c] sm:$0xf]  ;;  %v922_v39 = vshrl.u32 %v897_v27, 16 }
  0x5a   : > { %v810_v38 = vld [vmem:[#allocation2 + $0x48] sm:$0xf]  ;;  %v925_v40 = vshll.u32 %v897_v27, 16  ;;  %v485_v41 = vld [vmem:[#allocation2 + $0xc] sm:$0xf]  ;;  %v939_v42 = vrot.slane %v938_v26, 4  ;;  %v986_v45 = vor.u32 %v985_v30, %v5720_v29  ;;  %v976_v46 = vor.u32 %v975_v33, %v972_v31 }
  0x5b   : > { %501 = vst.msk [vmem:[#allocation3 + $0x8] sm:$0xf] %vm443_vm0, %v485_v41  ;;  %v483_v44 = vld [vmem:[#allocation2] sm:$0xf]  ;;  %v1018_v47 = vshrl.u32 %v909_v37, 16  ;;  %v958_v49 = vsel %vm5588_vm4, %v953_v34, %v5722_v35  ;;  %v924_v52 = vrot.slane %v922_v39, 4 }
  0x5c   : > { %832 = vrot.lane.b32.xlu1 %v800_v43, %s7492_s11  ;;  %v989_v43 = vshll.u32 %v905_v28, 16  ;;  %v907_v48 = vld [vmem:[#allocation2 + $0x34] sm:$0xf]  ;;  %499 = vst.msk [vmem:[#allocation3] sm:$0xf] %vm443_vm0, %v483_v44  ;;  %v927_v53 = vrot.slane %v925_v40, 5 }
  0x5d   : > { %v913_v63 = vld [vmem:[#allocation2 + $0x4c] sm:$0xf]  ;;  %v487_v2 = vld [vmem:[#allocation2 + $0x18] sm:$0xf]  ;;  %v486_v3 = vld [vmem:[#allocation2 + $0x10] sm:$0xf] }
  0x5e   : > { %764 = vrot.lane.b32.xlu0 %v733_v25, %s5440_s12  ;;  %v1021_v25 = vshll.u32 %v909_v37, 16  ;;  %v991_v55 = vrot.slane %v989_v43, 5  ;;  %v928_v0 = vor.u32 %v927_v53, %v924_v52  ;;  %503 = vst.msk [vmem:[#allocation3 + $0x10] sm:$0xf] %vm443_vm0, %v487_v2  ;;  %v484_v6 = vld [vmem:[#allocation2 + $0x4] sm:$0xf] }
  0x5f   : > { %v908_v9 = vld [vmem:[#allocation2 + $0x38] sm:$0x1]  ;;  %v1051_v10 = vshll.u32 %v913_v63, 16  ;;  %502 = vst.msk [vmem:[#allocation3 + $0xc] sm:$0xf] %vm443_vm0, %v486_v3  ;;  %s4934_s18 = sshll.u32 %s6941_s17, 2 }
  0x60   : > { %756 = vrot.lane.b32.xlu2 %v685_v50, %s5440_s12  ;;  %v959_v50 = vshrl.u32 %v5712_v12, 16  ;;  %v1055_v12 = vshrl.u32 %v913_v63, 16  ;;  %500 = vst.msk [vmem:[#allocation3 + $0x4] sm:$0xf] %vm443_vm0, %v484_v6  ;;  %v929_v16 = vrot.slane %v928_v0, 4  ;;  %v1013_v22 = vshll.u32 %v908_v9, 16  ;;  %s6965_s29 = scalar_lea.vmem %s7487_s2, %s4934_s18 }
  0x61   : > { %v902_v18 = vld [vmem:[#allocation2 + $0x20] sm:$0x1]  ;;  %v906_v17 = vld [vmem:[#allocation2 + $0x30] sm:$0xf]  ;;  %v5755_v27 = vrot.slane %v1051_v10, 5  ;;  %s4928_s15 = sshll.u32 %s6400_s28, 1 }
  0x62   : > { %v961_v19 = vrot.slane %v959_v50, 4  ;;  %v914_v26 = vld [vmem:[#allocation2 + $0x50] sm:$0x1]  ;;  %v1057_v28 = vrot.slane %v1055_v12, 4  ;;  %v965_v33 = vshll.u32 %v902_v18, 16  ;;  %v994_v37 = vshrl.u32 %v906_v17, 16 }
  0x63   : > { %v918_v34 = vld [vmem:[#allocation2 + $0x60] sm:$0xf]  ;;  %v488_v39 = vld [vmem:[#allocation2 + $0x1c] sm:$0xf]  ;;  %v490_v40 = vld [vmem:[#allocation2 + $0x28] sm:$0xf] }
  0x64   : > { %838 = vrot.lane.b32.xlu1 %v803_v54, %s7492_s11  ;;  %v944_v54 = vsel %vm5588_vm4, %v939_v42, %v943_v36  ;;  %v962_v36 = vor.u32 %v961_v19, %v5722_v35  ;;  %v1015_v42 = vrot.slane %v1013_v22, 5  ;;  %504 = vst.msk [vmem:[#allocation3 + $0x14] sm:$0xf] %vm443_vm0, %v488_v39  ;;  %v489_v43 = vld [vmem:[#allocation2 + $0x24] sm:$0xf]  ;;  %v996_v50 = vrot.slane %v994_v37, 4 }
  0x65   : > { %506 = vst.msk [vmem:[#allocation3 + $0x1c] sm:$0xf] %vm443_vm0, %v490_v40  ;;  %v5777_v0 = vld [vmem:[#allocation2 + $0x64] sm:$0xf]  ;;  %v493_v2 = vld [vmem:[#allocation2 + $0x3c] sm:$0xf] }
  0x66   : > { %836 = vrot.lane.b32.xlu0 %v802_v56, %s7492_s11  ;;  %v1003_v56 = vshll.u32 %v907_v48, 16  ;;  %505 = vst.msk [vmem:[#allocation3 + $0x18] sm:$0xf] %vm443_vm0, %v489_v43  ;;  %v917_v6 = vld [vmem:[#allocation2 + $0x5c] sm:$0x1]  ;;  %v1099_v9 = vshll.u32 %v5777_v0, 16 }
  0x67   : > { %509 = vst.msk [vmem:[#allocation3 + $0x28] sm:$0xf] %vm443_vm0, %v493_v2  ;;  %v915_v12 = vld [vmem:[#allocation2 + $0x54] sm:$0xf]  ;;  %v911_v19 = vld [vmem:[#allocation2 + $0x44] sm:$0x1] }
  0x68   : > { %762 = vrot.lane.b32.xlu2 %v723_v51, %s5440_s12  ;;  %v1007_v51 = vshrl.u32 %v907_v48, 16  ;;  %v963_v48 = vrot.slane %v962_v36, 4  ;;  %v1066_v22 = vshrl.u32 %v915_v12, 16  ;;  %v1674_v36 = vld [vmem:[#allocation2 + $0x4] sm:$0xf]  ;;  %s369_s20 = scalar_lea.vmem [#allocation6], %s4928_s15 }
  0x69   : > { %v495_v37 = vld [vmem:[#allocation2 + $0x48] sm:$0xf]  ;;  %v1726_v43 = vrot.slane %v1674_v36, 5  ;;  %v1688_v36 = vld [vmem:[#allocation2 + $0x3c] sm:$0xe] }
  0x6a   : > { %v1009_v5 = vrot.slane %v1007_v51, 4  ;;  %511 = vst.msk [vmem:[#allocation3 + $0x30] sm:$0xf] %vm443_vm0, %v495_v37  ;;  %v5866_v37 = vld [vmem:[#allocation2 + $0x40] sm:$0xf] }
  0x6c   : > { %844 = vrot.lane.b32.xlu1 %v806_v57, %s7492_s11  ;;  %v987_v57 = vrot.slane %v986_v45, 4  ;;  %v1061_v45 = vshll.u32 %v914_v26, 16 }
  0x6e   : > { %842 = vrot.lane.b32.xlu0 %v805_v58, %s7492_s11  ;;  %v977_v58 = vrot.slane %v976_v46, 4  ;;  %v916_v46 = vld [vmem:[#allocation2 + $0x58] sm:$0xf]  ;;  %v1063_v51 = vrot.slane %v1061_v45, 5  ;;  %v1103_v45 = vshrl.u32 %v5777_v0, 16 }
  0x6f   : > { %v920_v0 = vld [vmem:[#allocation2 + $0x68] sm:$0x1] }
  0x70   : > { %834 = vrot.lane.b32.xlu2 %v801_v59, %s7492_s11  ;;  %v1020_v59 = vrot.slane %v1018_v47, 4  ;;  %v982_v20 = vsel %vm5588_vm4, %v977_v58, %v5720_v29  ;;  %v934_v29 = vsel %vm5588_vm4, %v929_v16, %v5714_v14  ;;  %v1058_v14 = vor.u32 %v1057_v28, %v5755_v27 }
  0x71   : > { %v1090_v47 = vshrl.u32 %v918_v34, 16  ;;  %v1085_v16 = vshll.u32 %v917_v6, 16  ;;  %v1037_v28 = vshll.u32 %v911_v19, 16  ;;  %v1682_v19 = vld [vmem:[#allocation2 + $0x24] sm:$0xe] }
  0x73   : > { %v1039_v40 = vrot.slane %v1037_v28, 5  ;;  %v5859_v28 = vld [vmem:[#allocation2 + $0x34] sm:$0xf] }
  0x74   : > { %850 = vrot.lane.b32.xlu1 %v809_v60, %s7492_s11  ;;  %v1023_v60 = vrot.slane %v1021_v25, 5  ;;  %v1093_v25 = vshll.u32 %v918_v34, 16  ;;  %v496_v34 = vld [vmem:[#allocation2 + $0x4c] sm:$0xf] }
  0x75   : > { %512 = vst.msk [vmem:[#allocation3 + $0x34] sm:$0xf] %vm443_vm0, %v496_v34  ;;  %v1754_v34 = vrot.slane %v5859_v28, 5 }
  0x76   : > { %848 = vrot.lane.b32.xlu0 %v808_v61, %s7492_s11  ;;  %v813_v61 = vld [vmem:[#allocation2 + $0x58] sm:$0xf]  ;;  %v1024_v7 = vor.u32 %v1023_v60, %v1020_v59  ;;  %v1092_v59 = vrot.slane %v1090_v47, 4  ;;  %v1095_v60 = vrot.slane %v1093_v25, 5 }
  0x78   : > { %840 = vrot.lane.b32.xlu2 %v804_v62, %s7492_s11  ;;  %v5736_v62 = vld [vmem:[#allocation2 + $0x40] sm:$0xf]  ;;  %v1025_v23 = vrot.slane %v1024_v7, 4 }
  0x79   : > { %v1027_v8 = vshll.u32 %v5736_v62, 16 }
  0x7c   : > { %856 = vrot.lane.b32.xlu1 %v812_v1, %s7492_s11  ;;  %v912_v1 = vld [vmem:[#allocation2 + $0x48] sm:$0xf] }
  0x7d   : > { %v1042_v13 = vshrl.u32 %v912_v1, 16  ;;  %v1045_v15 = vshll.u32 %v912_v1, 16  ;;  %v491_v1 = vld [vmem:[#allocation2 + $0x30] sm:$0xf] }
  0x7e   : > { %854 = vrot.lane.b32.xlu0 %v811_v4, %s7492_s11  ;;  %v5739_v4 = vrot.slane %v1003_v56, 5  ;;  %v1031_v56 = vshrl.u32 %v5736_v62, 16  ;;  %507 = vst.msk [vmem:[#allocation3 + $0x20] sm:$0xf] %vm443_vm0, %v491_v1  ;;  %v1678_v1 = vld [vmem:[#allocation2 + $0x14] sm:$0x1] }
  0x7f   : > { %v1044_v30 = vrot.slane %v1042_v13, 4  ;;  %v1047_v31 = vrot.slane %v1045_v15, 5 }
  0x80   : > { %846 = vrot.lane.b32.xlu2 %v807_v11, %s7492_s11  ;;  %v992_v11 = vsel %vm5588_vm4, %v987_v57, %v991_v55  ;;  %v1079_v55 = vshrl.u32 %v916_v46, 16  ;;  %v1059_v57 = vrot.slane %v1058_v14, 4 }
  0x81   : > { %v1048_v35 = vor.u32 %v1047_v31, %v1044_v30  ;;  %v494_v30 = vld [vmem:[#allocation2 + $0x40] sm:$0xf] }
  0x82   : > { %v1081_v62 = vrot.slane %v1079_v55, 4  ;;  %v1064_v7 = vsel %vm5588_vm4, %v1059_v57, %v1063_v51  ;;  %510 = vst.msk [vmem:[#allocation3 + $0x2c] sm:$0xf] %vm443_vm0, %v494_v30  ;;  %v5823_v55 = vld [vmem:[#allocation2 + $0x10] sm:$0xf]  ;;  %v1105_v57 = vrot.slane %v1103_v45, 4 }
  0x83   : > { %v1049_v58 = vrot.slane %v1048_v35, 4  ;;  %v1728_v35 = vrot.slane %v1726_v43, 4  ;;  %v1676_v30 = vld [vmem:[#allocation2 + $0xc] sm:$0xe] }
  0x84   : > { %862 = vrot.lane.b32.xlu1 %v815_v21, %s7492_s11  ;;  %v1010_v21 = vor.u32 %v1009_v5, %v5739_v4  ;;  %v492_v5 = vld [vmem:[#allocation2 + $0x34] sm:$0xf]  ;;  %v1844_v45 = vld [vmem:[#allocation2 + $0xc] sm:$0xf] }
  0x85   : > { %508 = vst.msk [vmem:[#allocation3 + $0x24] sm:$0xf] %vm443_vm0, %v492_v5  ;;  %v1054_v13 = vsel %vm5588_vm4, %v1049_v58, %v5755_v27  ;;  %v1679_v58 = vld [vmem:[#allocation2 + $0x18] sm:$0xe] }
  0x86   : > { %860 = vrot.lane.b32.xlu0 %v814_v24, %s7492_s11  ;;  %v5753_v24 = vrot.slane %v1027_v8, 5  ;;  %v1011_v41 = vrot.slane %v1010_v21, 4  ;;  %v1096_v8 = vor.u32 %v1095_v60, %v1092_v59  ;;  %v5794_v21 = vrot.slane %v1099_v9, 5  ;;  %v5830_v59 = vld [vmem:[#allocation2 + $0x1c] sm:$0xf] }
  0x87   : > { %v4981_v2 = vrot.slane %v1679_v58, 9 }
  0x88   : > { %852 = vrot.lane.b32.xlu2 %v810_v38, %s7492_s11  ;;  %v997_v38 = vshll.u32 %v906_v17, 16  ;;  %v1030_v44 = vsel %vm5588_vm4, %v1025_v23, %v5753_v24  ;;  %v1016_v53 = vsel %vm5588_vm4, %v1011_v41, %v1015_v42  ;;  %v1069_v17 = vshll.u32 %v915_v12, 16  ;;  %v1675_v41 = vld [vmem:[#allocation2 + $0x8] sm:$0x1] }
  0x89   : > { %v1729_v47 = vrot.slane %v1675_v41, 5  ;;  %v1683_v12 = vld [vmem:[#allocation2 + $0x28] sm:$0xf] }
  0x8a   : > { %v999_v52 = vrot.slane %v997_v38, 5  ;;  %v1071_v38 = vrot.slane %v1069_v17, 5 }
  0x8b   : > { %v1730_v51 = vsel %vm5819_vm8, %v1728_v35, %v1729_v47  ;;  %v1691_v47 = vld [vmem:[#allocation2 + $0x48] sm:$0xe] }
  0x8c   : > { %1117 = vrot.lane.b32.xlu1 %v958_v49, %s5442_s13  ;;  %v967_v49 = vrot.slane %v965_v33, 5  ;;  %v1000_v63 = vor.u32 %v999_v52, %v996_v50  ;;  %v1087_v33 = vrot.slane %v1085_v16, 5  ;;  %v498_v52 = vld [vmem:[#allocation2 + $0x58] sm:$0xf]  ;;  %v1684_v16 = vld [vmem:[#allocation2 + $0x2c] sm:$0x1] }
  0x8d   : > { %514 = vst.msk [vmem:[#allocation3 + $0x3c] sm:$0xf] %vm443_vm0, %v498_v52  ;;  %v1750_v17 = vrot.slane %v1684_v16, 5  ;;  %v1851_v52 = vld [vmem:[#allocation2 + $0x28] sm:$0xf]  ;;  %v4985_v58 = vrot.slane %v1691_v47, 9 }
  0x8e   : > { %1115 = vrot.lane.b32.xlu0 %v944_v54, %s5442_s13  ;;  %v1075_v54 = vshll.u32 %v916_v46, 16  ;;  %v1001_v10 = vrot.slane %v1000_v63, 4  ;;  %v1673_v46 = vld [vmem:[#allocation2] sm:$0xe] }
  0x8f   : > { %v4979_v50 = vrot.slane %v1673_v46, 9  ;;  %v1681_v46 = vld [vmem:[#allocation2 + $0x20] sm:$0x1] }
  0x90   : > { %858 = vrot.lane.b32.xlu2 %v813_v61, %s7492_s11  ;;  %v968_v61 = vsel %vm5588_vm4, %v963_v48, %v967_v49  ;;  %v5779_v3 = vrot.slane %v1075_v54, 5  ;;  %v1006_v26 = vsel %vm5588_vm4, %v1001_v10, %v5739_v4  ;;  %v497_v49 = vld [vmem:[#allocation2 + $0x54] sm:$0xf]  ;;  %v1736_v10 = vrot.slane %v1678_v1, 5 }
  0x91   : > { %513 = vst.msk [vmem:[#allocation3 + $0x38] sm:$0xf] %vm443_vm0, %v497_v49  ;;  %v1727_v60 = vsel %vm5819_vm8, %v4979_v50, %v1726_v43  ;;  %v1869_v49 = vshrl.u32 %v1844_v45, 16  ;;  %v1872_v50 = vshll.u32 %v1844_v45, 16  ;;  %v1926_v1 = vshll.u32 %v1851_v52, 16 }
  0x92   : > { %v1082_v15 = vor.u32 %v1081_v62, %v5779_v3  ;;  %v1740_v62 = vrot.slane %v5830_v59, 5  ;;  %v5891_v59 = vld [vmem:[#allocation2 + $0x58] sm:$0xf] }
  0x94   : > { %1123 = vrot.lane.b32.xlu1 %v992_v11, %s5442_s13  ;;  %v1033_v11 = vrot.slane %v1031_v56, 4  ;;  %v1083_v31 = vrot.slane %v1082_v15, 4 }
  0x96   : > { %1121 = vrot.lane.b32.xlu0 %v982_v20, %s5442_s13  ;;  %v1097_v20 = vrot.slane %v1096_v8, 4  ;;  %v1034_v27 = vor.u32 %v1033_v11, %v5753_v24  ;;  %v1068_v24 = vrot.slane %v1066_v22, 4  ;;  %v1088_v42 = vsel %vm5588_vm4, %v1083_v31, %v1087_v33 }
  0x97   : > { %v1109_v8 = vshll.u32 %v920_v0, 16 }
  0x98   : > { %1113 = vrot.lane.b32.xlu2 %v934_v29, %s5442_s13  ;;  %v1102_v4 = vsel %vm5588_vm4, %v1097_v20, %v5794_v21  ;;  %v1035_v39 = vrot.slane %v1034_v27, 4  ;;  %v1072_v14 = vor.u32 %v1071_v38, %v1068_v24  ;;  %v1747_v20 = vrot.slane %v1683_v12, 5  ;;  %v1687_v24 = vld [vmem:[#allocation2 + $0x38] sm:$0x1] }
  0x99   : > { %v1757_v43 = vrot.slane %v1687_v24, 5 }
  0x9a   : > { %v1040_v48 = vsel %vm5588_vm4, %v1035_v39, %v1039_v40  ;;  %v1073_v56 = vrot.slane %v1072_v14, 4  ;;  %v1749_v22 = vrot.slane %v1747_v20, 4  ;;  %v4984_v39 = vrot.slane %v1688_v36, 9  ;;  %v1847_v14 = vld [vmem:[#allocation2 + $0x18] sm:$0xf] }
  0x9b   : > { %v1761_v40 = vrot.slane %v5866_v37, 5  ;;  %v1896_v0 = vshll.u32 %v1847_v14, 16  ;;  %v1696_v36 = vld [vmem:[#allocation2 + $0x5c] sm:$0x1] }
  0x9c   : > { %1129 = vrot.lane.b32.xlu1 %v1030_v44, %s5442_s13  ;;  %v1078_v6 = vsel %vm5588_vm4, %v1073_v56, %v5779_v3  ;;  %v1111_v3 = vrot.slane %v1109_v8, 5  ;;  %v1751_v33 = vsel %vm5819_vm8, %v1749_v22, %v1750_v17  ;;  %v1693_v56 = vld [vmem:[#allocation2 + $0x50] sm:$0x1]  ;;  %v1874_v8 = vrot.slane %v1872_v50, 5 }
  0x9d   : > { %v1775_v17 = vrot.slane %v5891_v59, 5 }
  0x9e   : > { %1127 = vrot.lane.b32.xlu0 %v1016_v53, %s5442_s13 }
  0x9f   : > { %v1777_v45 = vrot.slane %v1775_v17, 4 }
  0xa0   : > { %1119 = vrot.lane.b32.xlu2 %v968_v61, %s5442_s13  ;;  %v1733_v61 = vrot.slane %v5823_v55, 5  ;;  %v1743_v55 = vrot.slane %v1681_v46, 5  ;;  %v1690_v46 = vld [vmem:[#allocation2 + $0x44] sm:$0x1] }
  0xa2   : > { %v743_v18 = vpop.permute.xlu2 %742  ;;  %v1735_v9 = vrot.slane %v1733_v61, 4 }
  0xa3   : > { %787 = vst.msk [vmem:[#allocation3 + $0x10] sm:$0xf] %vm782_vm5, %v743_v18 }
  0xa4   : > { %1135 = vrot.lane.b32.xlu1 %v1064_v7, %s5442_s13  ;;  %v1106_v7 = vor.u32 %v1105_v57, %v5794_v21  ;;  %v1737_v18 = vsel %vm5819_vm8, %v1735_v9, %v1736_v10 }
  0xa6   : > { %1133 = vrot.lane.b32.xlu0 %v1054_v13, %s5442_s13  ;;  %v739_v23 = vpop.permute.xlu1 %738  ;;  %v1741_v13 = vsel %vm5819_vm8, %v4981_v2, %v1740_v62  ;;  %v1107_v15 = vrot.slane %v1106_v7, 4  ;;  %v1930_v2 = vshrl.u32 %v1851_v52, 16  ;;  %v1871_v7 = vrot.slane %v1869_v49, 4  ;;  %v5923_v49 = vld [vmem:[#allocation2 + $0x54] sm:$0xe] }
  0xa7   : > { %785 = vst.msk [vmem:[#allocation3 + $0x8] sm:$0xf] %vm782_vm5, %v739_v23  ;;  %v5926_v52 = vld [vmem:[#allocation2 + $0x40] sm:$0xf]  ;;  %v4986_v37 = vrot.slane %v5923_v49, 9 }
  0xa8   : > { %v735_v29 = vpop.permute.xlu0 %734  ;;  %1125 = vrot.lane.b32.xlu2 %v1006_v26, %s5442_s13  ;;  %v4982_v26 = vrot.slane %v1682_v19, 9  ;;  %v1112_v27 = vsel %vm5588_vm4, %v1107_v15, %v1111_v3  ;;  %v5896_v15 = vld [vmem:[#allocation2 + $0x10] sm:$0xf]  ;;  %v1898_v3 = vrot.slane %v1896_v0, 5  ;;  %v1932_v22 = vrot.slane %v1930_v2, 4 }
  0xa9   : > { %783 = vst.msk [vmem:[#allocation3] sm:$0xf] %vm782_vm5, %v735_v29  ;;  %v4980_v29 = vrot.slane %v1676_v30, 9  ;;  %v1860_v0 = vld [vmem:[#allocation2 + $0x4c] sm:$0xf] }
  0xaa   : > { %v745_v44 = vpop.permute.xlu2 %744 }
  0xab   : > { %788 = vst.msk [vmem:[#allocation3 + $0x14] sm:$0xf] %vm782_vm5, %v745_v44  ;;  %v1734_v44 = vsel %vm5819_vm8, %v4980_v29, %v1733_v61 }
  0xac   : > { %1141 = vrot.lane.b32.xlu1 %v1102_v4, %s5442_s13  ;;  %v1748_v4 = vsel %vm5819_vm8, %v4982_v26, %v1747_v20  ;;  %v1875_v26 = vor.u32 %v1874_v8, %v1871_v7 }
  0xae   : > { %1139 = vrot.lane.b32.xlu0 %v1088_v42, %s5442_s13  ;;  %v741_v25 = vpop.permute.xlu1 %740  ;;  %v1756_v42 = vrot.slane %v1754_v34, 4 }
  0xaf   : > { %786 = vst.msk [vmem:[#allocation3 + $0xc] sm:$0xf] %vm782_vm5, %v741_v25  ;;  %v1692_v25 = vld [vmem:[#allocation2 + $0x4c] sm:$0xf] }
  0xb0   : > { %v737_v53 = vpop.permute.xlu0 %736  ;;  %1131 = vrot.lane.b32.xlu2 %v1040_v48, %s5442_s13  ;;  %v1762_v48 = vsel %vm5819_vm8, %v4984_v39, %v1761_v40  ;;  %v1758_v57 = vsel %vm5819_vm8, %v1756_v42, %v1757_v43  ;;  %v1849_v43 = vld [vmem:[#allocation2 + $0x20] sm:$0x1] }
  0xb1   : > { %784 = vst.msk [vmem:[#allocation3 + $0x4] sm:$0xf] %vm782_vm5, %v737_v53  ;;  %v1742_v53 = vrot.slane %v1740_v62, 4  ;;  %v1912_v28 = vshll.u32 %v1849_v43, 16 }
  0xb2   : > { %v751_v63 = vpop.permute.xlu2 %750 }
  0xb3   : > { %791 = vst.msk [vmem:[#allocation3 + $0x20] sm:$0xf] %vm782_vm5, %v751_v63  ;;  %v1848_v63 = vld [vmem:[#allocation2 + $0x1c] sm:$0xf]  ;;  %v1744_v10 = vsel %vm5819_vm8, %v1742_v53, %v1743_v55 }
  0xb4   : > { %1782 = vrot.lane.b32.xlu1 %v1730_v51, %s5440_s12  ;;  %v1893_v51 = vshrl.u32 %v1847_v14, 16  ;;  %v1902_v16 = vshll.u32 %v1848_v63, 16  ;;  %v1876_v14 = vrot.slane %v1875_v26, 4 }
  0xb6   : > { %1780 = vrot.lane.b32.xlu0 %v1727_v60, %s5440_s12  ;;  %v749_v5 = vpop.permute.xlu1 %748  ;;  %v1768_v60 = vrot.slane %v1692_v25, 5  ;;  %v1895_v12 = vrot.slane %v1893_v51, 4 }
  0xb7   : > { %790 = vst.msk [vmem:[#allocation3 + $0x1c] sm:$0xf] %vm782_vm5, %v749_v5  ;;  %v1856_v5 = vld [vmem:[#allocation2 + $0x3c] sm:$0xf] }
  0xb8   : > { %v747_v11 = vpop.permute.xlu0 %746  ;;  %1137 = vrot.lane.b32.xlu2 %v1078_v6, %s5442_s13  ;;  %v1770_v62 = vrot.slane %v1768_v60, 4  ;;  %v1771_v6 = vrot.slane %v1693_v56, 5  ;;  %v1968_v19 = vshll.u32 %v1856_v5, 16  ;;  %v1769_v30 = vsel %vm5819_vm8, %v4985_v58, %v1768_v60 }
  0xb9   : > { %789 = vst.msk [vmem:[#allocation3 + $0x18] sm:$0xf] %vm782_vm5, %v747_v11  ;;  %v1685_v11 = vld [vmem:[#allocation2 + $0x30] sm:$0xe]  ;;  %v1899_v24 = vor.u32 %v1898_v3, %v1895_v12  ;;  %v1778_v56 = vrot.slane %v1696_v36, 5  ;;  %v1764_v60 = vrot.slane %v1690_v46, 5 }
  0xba   : > { %v757_v21 = vpop.permute.xlu2 %756  ;;  %v5948_v12 = vld [vmem:[#allocation2 + $0x34] sm:$0xf]  ;;  %v2002_v3 = vshrl.u32 %v1860_v0, 16 }
  0xbb   : > { %794 = vst.msk [vmem:[#allocation3 + $0x2c] sm:$0xf] %vm782_vm5, %v757_v21  ;;  %v5899_v21 = vrot.slane %v1926_v1, 5  ;;  %v5929_v51 = vrot.slane %v1899_v24, 4  ;;  %v1779_v8 = vsel %vm5819_vm8, %v1777_v45, %v1778_v56  ;;  %v1954_v36 = vshrl.u32 %v5948_v12, 16 }
  0xbc   : > { %1788 = vrot.lane.b32.xlu1 %v1741_v13, %s5440_s12  ;;  %v1906_v13 = vshrl.u32 %v1848_v63, 16  ;;  %v2004_v43 = vrot.slane %v2002_v3, 4  ;;  %v1428_v45 = vld [vmem:[#allocation2 + $0xc] sm:$0xf]  ;;  %v1858_v56 = vld [vmem:[#allocation2 + $0x44] sm:$0x1] }
  0xbd   : > { %v1933_v42 = vor.u32 %v1932_v22, %v5899_v21 }
  0xbe   : > { %1786 = vrot.lane.b32.xlu0 %v1737_v18, %s5440_s12  ;;  %v755_v23 = vpop.permute.xlu1 %754  ;;  %v1965_v18 = vshrl.u32 %v1856_v5, 16  ;;  %v1908_v29 = vrot.slane %v1906_v13, 4  ;;  %v1998_v13 = vshll.u32 %v1860_v0, 16  ;;  %v1865_v0 = vld [vmem:[#allocation2 + $0x60] sm:$0xf] }
  0xbf   : > { %793 = vst.msk [vmem:[#allocation3 + $0x28] sm:$0xf] %vm782_vm5, %v755_v23  ;;  %v1772_v23 = vsel %vm5819_vm8, %v1770_v62, %v1771_v6  ;;  %v1978_v62 = vshrl.u32 %v5926_v52, 16  ;;  %v2040_v3 = vshll.u32 %v1865_v0, 16 }
  0xc0   : > { %v753_v31 = vpop.permute.xlu0 %752  ;;  %1143 = vrot.lane.b32.xlu2 %v1112_v27, %s5442_s13  ;;  %v1878_v27 = vshll.u32 %v5896_v15, 16  ;;  %v1967_v39 = vrot.slane %v1965_v18, 4 }
  0xc1   : > { %792 = vst.msk [vmem:[#allocation3 + $0x24] sm:$0xf] %vm782_vm5, %v753_v31  ;;  %v4983_v31 = vrot.slane %v1685_v11, 9  ;;  %v1846_v11 = vld [vmem:[#allocation2 + $0x14] sm:$0x1] }
  0xc2   : > { %v763_v38 = vpop.permute.xlu2 %762 }
  0xc3   : > { %797 = vst.msk [vmem:[#allocation3 + $0x38] sm:$0xf] %vm782_vm5, %v763_v38  ;;  %v5909_v38 = vrot.slane %v1902_v16, 5  ;;  %v1850_v16 = vld [vmem:[#allocation2 + $0x24] sm:$0xf] }
  0xc4   : > { %1794 = vrot.lane.b32.xlu1 %v1751_v33, %s5440_s12  ;;  %v1852_v33 = vld [vmem:[#allocation2 + $0x2c] sm:$0x1]  ;;  %v1920_v22 = vshll.u32 %v1850_v16, 16 }
  0xc5   : > { %v1936_v47 = vshll.u32 %v1852_v33, 16  ;;  %v1909_v50 = vor.u32 %v1908_v29, %v5909_v38  ;;  %v1861_v33 = vld [vmem:[#allocation2 + $0x50] sm:$0x1]  ;;  %v1425_v29 = vld [vmem:[#allocation2] sm:$0xf]  ;;  %v1905_v49 = vsel %vm5588_vm4, %v5929_v51, %v5909_v38  ;;  %v1776_v38 = vsel %vm5819_vm8, %v4986_v37, %v1775_v17 }
  0xc6   : > { %1792 = vrot.lane.b32.xlu0 %v1748_v4, %s5440_s12  ;;  %v761_v41 = vpop.permute.xlu1 %760  ;;  %v1450_v24 = vshrl.u32 %v1425_v29, 16  ;;  %v5199_v37 = vld [vmem:[%s7488_s3] sm:$0xff] }
  0xc7   : > { %796 = vst.msk [vmem:[#allocation3 + $0x34] sm:$0xf] %vm782_vm5, %v761_v41  ;;  %v1970_v41 = vrot.slane %v1968_v19, 5  ;;  %v5941_v2 = vrot.slane %v1936_v47, 5  ;;  %v1910_v5 = vrot.slane %v1909_v50, 4  ;;  %1274 = vmatpush.bf16.msra.mxu0 %v5199_v37 }
  0xc8   : > { %v759_v35 = vpop.permute.xlu0 %758  ;;  %1784 = vrot.lane.b32.xlu2 %v1734_v44, %s5440_s12  ;;  %v1853_v44 = vld [vmem:[#allocation2 + $0x30] sm:$0xf] }
  0xc9   : > { %795 = vst.msk [vmem:[#allocation3 + $0x30] sm:$0xf] %vm782_vm5, %v759_v35  ;;  %v5916_v35 = vrot.slane %v1878_v27, 5  ;;  %v1941_v53 = vshrl.u32 %v1853_v44, 16  ;;  %v1944_v55 = vshll.u32 %v1853_v44, 16  ;;  %v1971_v63 = vor.u32 %v1970_v41, %v1967_v39 }
  0xca   : > { %v835_v61 = vpop.permute.xlu2 %834  ;;  %v1888_v27 = vshll.u32 %v1846_v11, 16  ;;  %v1453_v39 = vshll.u32 %v1425_v29, 16  ;;  %v1426_v44 = vld [vmem:[#allocation2 + $0x4] sm:$0xf]  ;;  %v1427_v29 = vld [vmem:[#allocation2 + $0x8] sm:$0x1] }
  0xcb   : > { %882 = vst.msk [vmem:[#allocation3 + $0x4] sm:$0xf] %vm880_vm9, %v835_v61  ;;  %v5934_v61 = vrot.slane %v1933_v42, 4  ;;  %v1881_v1 = vsel %vm5588_vm4, %v1876_v14, %v5916_v35  ;;  %v1943_v6 = vrot.slane %v1941_v53, 4  ;;  %v1946_v7 = vrot.slane %v1944_v55, 5 }
  0xcc   : > { %1800 = vrot.lane.b32.xlu1 %v1762_v48, %s5440_s12  ;;  %v1755_v48 = vsel %vm5819_vm8, %v4983_v31, %v1754_v34  ;;  %v1882_v34 = vshrl.u32 %v5896_v15, 16  ;;  %v5952_v15 = vrot.slane %v1971_v63, 4  ;;  %v1950_v31 = vshll.u32 %v5948_v12, 16  ;;  %v5973_v53 = vld [vmem:[#allocation2 + $0x10] sm:$0xf] }
  0xcd   : > { %v1452_v14 = vrot.slane %v1450_v24, 4  ;;  %v1455_v47 = vrot.slane %v1453_v39, 5  ;;  %v1477_v55 = vshll.u32 %v1428_v45, 16  ;;  %v1459_v51 = vshll.u32 %v1426_v44, 16  ;;  %v5995_v11 = vld [vmem:[#allocation2 + $0x64] sm:$0xf] }
  0xce   : > { %1798 = vrot.lane.b32.xlu0 %v1758_v57, %s5440_s12  ;;  %v833_v9 = vpop.permute.xlu1 %832  ;;  %v1763_v57 = vrot.slane %v1761_v40, 4  ;;  %v1974_v40 = vshll.u32 %v5926_v52, 16  ;;  %v1884_v19 = vrot.slane %v1882_v34, 4  ;;  %v2008_v52 = vshll.u32 %v1861_v33, 16 }
  0xcf   : > { %881 = vst.msk [vmem:[#allocation3] sm:$0xf] %vm880_vm9, %v833_v9  ;;  %v1980_v34 = vrot.slane %v1978_v62, 4  ;;  %v1479_v63 = vrot.slane %v1477_v55, 5  ;;  %v1890_v59 = vrot.slane %v1888_v27, 5  ;;  %v1463_v17 = vshrl.u32 %v1426_v44, 16 }
  0xd0   : > { %v765_v20 = vpop.permute.xlu0 %764  ;;  %1790 = vrot.lane.b32.xlu2 %v1744_v10, %s5440_s12  ;;  %v1914_v10 = vrot.slane %v1912_v28, 5  ;;  %v5954_v18 = vrot.slane %v1974_v40, 5  ;;  %v1765_v26 = vsel %vm5819_vm8, %v1763_v57, %v1764_v60  ;;  %v1885_v50 = vor.u32 %v1884_v19, %v5916_v35 }
  0xd1   : > { %798 = vst.msk [vmem:[#allocation3 + $0x3c] sm:$0xf] %vm782_vm5, %v765_v20  ;;  %v1917_v20 = vshrl.u32 %v1850_v16, 16  ;;  %v1483_v40 = vshll.u32 %v5973_v53, 16  ;;  %v1939_v33 = vsel %vm5588_vm4, %v5934_v61, %v5941_v2  ;;  %v1465_v24 = vrot.slane %v1463_v17, 4 }
  0xd2   : > { %v841_v4 = vpop.permute.xlu2 %840  ;;  %v1915_v42 = vsel %vm5588_vm4, %v1910_v5, %v1914_v10  ;;  %v1981_v10 = vor.u32 %v1980_v34, %v5954_v18  ;;  %v2046_v39 = vshll.u32 %v5995_v11, 16  ;;  %v1469_v2 = vshll.u32 %v1427_v29, 16 }
  0xd3   : > { %885 = vst.msk [vmem:[#allocation3 + $0x10] sm:$0xf] %vm880_vm9, %v841_v4  ;;  %v5962_v4 = vrot.slane %v1998_v13, 5  ;;  %v1919_v46 = vrot.slane %v1917_v20, 4  ;;  %v2037_v13 = vshrl.u32 %v1865_v0, 16  ;;  %v6009_v27 = vrot.slane %v1483_v40, 5 }
  0xd4   : > { %1806 = vrot.lane.b32.xlu1 %v1772_v23, %s5440_s12  ;;  %v1982_v44 = vrot.slane %v1981_v10, 4  ;;  %v6045_v17 = vrot.slane %v1469_v2, 5  ;;  %v1977_v10 = vsel %vm5588_vm4, %v5952_v15, %v5954_v18 }
  0xd5   : > { %v2005_v35 = vor.u32 %v2004_v43, %v5962_v4 }
  0xd6   : > { %1804 = vrot.lane.b32.xlu0 %v1769_v30, %s5440_s12  ;;  %v839_v25 = vpop.permute.xlu1 %838  ;;  %v1947_v30 = vor.u32 %v1946_v7, %v1943_v6  ;;  %v1984_v6 = vshll.u32 %v1858_v56, 16  ;;  %v5986_v7 = vrot.slane %v1885_v50, 4  ;;  %v1433_v50 = vld [vmem:[#allocation2 + $0x20] sm:$0x1]  ;;  %v6027_v56 = vrot.slane %v2046_v39, 5 }
  0xd7   : > { %884 = vst.msk [vmem:[#allocation3 + $0xc] sm:$0xf] %vm880_vm9, %v839_v25  ;;  %v1474_v25 = vshrl.u32 %v1428_v45, 16  ;;  %v6000_v20 = vrot.slane %v2005_v35, 4  ;;  %v2039_v45 = vrot.slane %v2037_v13, 4  ;;  %v1517_v40 = vshll.u32 %v1433_v50, 16 }
  0xd8   : > { %v837_v58 = vpop.permute.xlu0 %836  ;;  %1796 = vrot.lane.b32.xlu2 %v1755_v48, %s5440_s12  ;;  %v1922_v48 = vrot.slane %v1920_v22, 5  ;;  %v1948_v28 = vrot.slane %v1947_v30, 4  ;;  %v6002_v22 = vrot.slane %v1459_v51, 5  ;;  %v1891_v61 = vsel %vm5588_vm4, %v5986_v7, %v1890_v59 }
  0xd9   : > { %883 = vst.msk [vmem:[#allocation3 + $0x8] sm:$0xf] %vm880_vm9, %v837_v58  ;;  %v5975_v58 = vrot.slane %v1950_v31, 5  ;;  %v1476_v60 = vrot.slane %v1474_v25, 4  ;;  %v1986_v31 = vrot.slane %v1984_v6, 5 }
  0xda   : > { %v847_v9 = vpop.permute.xlu2 %846  ;;  %v1923_v5 = vor.u32 %v1922_v48, %v1919_v46  ;;  %v2042_v46 = vrot.slane %v2040_v3, 5  ;;  %v1466_v55 = vor.u32 %v1465_v24, %v6002_v22  ;;  %v1431_v6 = vld [vmem:[#allocation2 + $0x18] sm:$0xf]  ;;  %v6067_v24 = vrot.slane %v1517_v40, 5 }
  0xdb   : > { %888 = vst.msk [vmem:[#allocation3 + $0x1c] sm:$0xf] %vm880_vm9, %v847_v9  ;;  %v1480_v9 = vor.u32 %v1479_v63, %v1476_v60  ;;  %v1953_v19 = vsel %vm5588_vm4, %v1948_v28, %v5975_v58  ;;  %v1956_v28 = vrot.slane %v1954_v36, 4  ;;  %v6032_v60 = vld [vmem:[#allocation2 + $0x58] sm:$0xf]  ;;  %v1987_v12 = vsel %vm5588_vm4, %v1982_v44, %v1986_v31 }
  0xdc   : > { %2060 = vrot.lane.b32.xlu1 %v1881_v1, %s7492_s11  ;;  %v1456_v1 = vor.u32 %v1455_v47, %v1452_v14  ;;  %v6011_v30 = vrot.slane %v1923_v5, 4  ;;  %v1862_v14 = vld [vmem:[#allocation2 + $0x54] sm:$0xf]  ;;  %v2043_v34 = vor.u32 %v2042_v46, %v2039_v45  ;;  %v2022_v7 = vshll.u32 %v6032_v60, 16  ;;  %v1434_v31 = vld [vmem:[#allocation2 + $0x24] sm:$0xf] }
  0xdd   : > { %v6018_v43 = vrot.slane %v1480_v9, 4  ;;  %v1430_v47 = vld [vmem:[#allocation2 + $0x14] sm:$0x1]  ;;  %v2013_v35 = vshrl.u32 %v1862_v14, 16  ;;  %v2016_v51 = vshll.u32 %v1862_v14, 16  ;;  %v6043_v59 = vrot.slane %v1466_v55, 4 }
  0xde   : > { %1810 = vrot.lane.b32.xlu0 %v1779_v8, %s5440_s12  ;;  %v845_v23 = vpop.permute.xlu1 %844  ;;  %v5988_v8 = vrot.slane %v2008_v52, 5  ;;  %v1855_v52 = vld [vmem:[#allocation2 + $0x38] sm:$0x1]  ;;  %v1957_v37 = vor.u32 %v1956_v28, %v5975_v58  ;;  %v1929_v3 = vsel %vm5588_vm4, %v6011_v30, %v5899_v21  ;;  %v1498_v15 = vshrl.u32 %v1431_v6, 16  ;;  %v1437_v46 = vld [vmem:[#allocation2 + $0x30] sm:$0xf] }
  0xdf   : > { %887 = vst.msk [vmem:[#allocation3 + $0x18] sm:$0xf] %vm880_vm9, %v845_v23  ;;  %v1487_v23 = vshrl.u32 %v5973_v53, 16  ;;  %v1960_v5 = vshll.u32 %v1855_v52, 16  ;;  %v2018_v9 = vrot.slane %v2016_v51, 5  ;;  %v1501_v18 = vshll.u32 %v1431_v6, 16 }
  0xe0   : > { %v843_v41 = vpop.permute.xlu0 %842  ;;  %1802 = vrot.lane.b32.xlu2 %v1765_v26, %s5440_s12  ;;  %v6007_v26 = vrot.slane %v1456_v1, 4  ;;  %v6071_v30 = vrot.slane %v2022_v7, 5  ;;  %v1522_v45 = vshrl.u32 %v1434_v31, 16  ;;  %v1859_v14 = vld [vmem:[#allocation2 + $0x48] sm:$0xf]  ;;  %v1525_v2 = vshll.u32 %v1434_v31, 16 }
  0xe1   : > { %886 = vst.msk [vmem:[#allocation3 + $0x14] sm:$0xf] %vm880_vm9, %v843_v41  ;;  %v1432_v41 = vld [vmem:[#allocation2 + $0x1c] sm:$0xf]  ;;  %v6069_v21 = vrot.slane %v1960_v5, 5  ;;  %v2026_v28 = vshrl.u32 %v6032_v60, 16 }
  0xe2   : > { %v853_v57 = vpop.permute.xlu2 %852  ;;  %v1507_v25 = vshll.u32 %v1432_v41, 16  ;;  %v1511_v48 = vshrl.u32 %v1432_v41, 16  ;;  %v1958_v41 = vrot.slane %v1957_v37, 4  ;;  %v1462_v50 = vsel %vm5588_vm4, %v6007_v26, %v6002_v22  ;;  %v1867_v55 = vld [vmem:[#allocation2 + $0x68] sm:$0x1] }
  0xe3   : > { %891 = vst.msk [vmem:[#allocation3 + $0x28] sm:$0xf] %vm880_vm9, %v853_v57  ;;  %v2050_v57 = vshrl.u32 %v5995_v11, 16  ;;  %v1992_v51 = vshll.u32 %v1859_v14, 16  ;;  %v1524_v26 = vrot.slane %v1522_v45, 4  ;;  %v1527_v60 = vrot.slane %v1525_v2, 5 }
  0xe4   : > { %2066 = vrot.lane.b32.xlu1 %v1915_v42, %s7492_s11  ;;  %v6035_v0 = vrot.slane %v1507_v25, 5  ;;  %v1513_v1 = vrot.slane %v1511_v48, 4  ;;  %v1500_v48 = vrot.slane %v1498_v15, 4  ;;  %v1963_v22 = vsel %vm5588_vm4, %v1958_v41, %v6069_v21  ;;  %v6102_v6 = vld [vmem:[#allocation2 + $0x14] sm:$0x1] }
  0xe5   : > { %v1994_v5 = vrot.slane %v1992_v51, 5  ;;  %v1436_v31 = vld [vmem:[#allocation2 + $0x2c] sm:$0x1]  ;;  %v1528_v21 = vor.u32 %v1527_v60, %v1524_v26  ;;  %v6124_v2 = vld [vmem:[#allocation2 + $0x1c] sm:$0xf] }
  0xe6   : > { %2064 = vrot.lane.b32.xlu0 %v1905_v49, %s7492_s11  ;;  %v851_v62 = vpop.permute.xlu1 %850  ;;  %v1489_v49 = vrot.slane %v1487_v23, 4  ;;  %v6060_v23 = vld [vmem:[#allocation2 + $0x10] sm:$0xf]  ;;  %v1514_v58 = vor.u32 %v1513_v1, %v6035_v0  ;;  %v2052_v1 = vrot.slane %v2050_v57, 4 }
  0xe7   : > { %890 = vst.msk [vmem:[#allocation3 + $0x24] sm:$0xf] %vm880_vm9, %v851_v62  ;;  %v2015_v62 = vrot.slane %v2013_v35, 4  ;;  %v2174_v44 = vrot.slane %v6060_v23, 5  ;;  %v1989_v35 = vshrl.u32 %v1859_v14, 16 }
  0xe8   : > { %v849_v16 = vpop.permute.xlu0 %848  ;;  %1808 = vrot.lane.b32.xlu2 %v1776_v38, %s5440_s12  ;;  %v1493_v38 = vshll.u32 %v1430_v47, 16  ;;  %v1490_v36 = vor.u32 %v1489_v49, %v6009_v27  ;;  %v6076_v25 = vrot.slane %v1514_v58, 4  ;;  %v2011_v49 = vsel %vm5588_vm4, %v6000_v20, %v5988_v8 }
  0xe9   : > { %889 = vst.msk [vmem:[#allocation3 + $0x20] sm:$0xf] %vm880_vm9, %v849_v16  ;;  %v6056_v16 = vrot.slane %v2043_v34, 4  ;;  %v1438_v34 = vld [vmem:[#allocation2 + $0x34] sm:$0xf]  ;;  %v1991_v40 = vrot.slane %v1989_v35, 4  ;;  %v2053_v37 = vor.u32 %v2052_v1, %v6027_v56 }
  0xea   : > { %v859_v42 = vpop.permute.xlu2 %858  ;;  %v6065_v29 = vrot.slane %v1490_v36, 4  ;;  %v1529_v35 = vrot.slane %v1528_v21, 4 }
  0xeb   : > { %894 = vst.msk [vmem:[#allocation3 + $0x34] sm:$0xf] %vm880_vm9, %v859_v42  ;;  %v2054_v58 = vrot.slane %v2053_v37, 4 }
  0xec   : > { %2072 = vrot.lane.b32.xlu1 %v1953_v19, %s7492_s11  ;;  %v6058_v19 = vrot.slane %v1493_v38, 5  ;;  %v1546_v38 = vshrl.u32 %v1437_v46, 16 }
  0xee   : > { %2070 = vrot.lane.b32.xlu0 %v1939_v33, %s7492_s11  ;;  %v857_v53 = vpop.permute.xlu1 %856  ;;  %v2019_v33 = vor.u32 %v2018_v9, %v2015_v62  ;;  %v1548_v57 = vrot.slane %v1546_v38, 4  ;;  %v1555_v9 = vshll.u32 %v1438_v34, 16  ;;  %v1496_v14 = vsel %vm5588_vm4, %v6065_v29, %v6058_v19 }
  0xef   : > { %893 = vst.msk [vmem:[#allocation3 + $0x30] sm:$0xf] %vm880_vm9, %v857_v53  ;;  %v1435_v53 = vld [vmem:[#allocation2 + $0x28] sm:$0xf]  ;;  %v2028_v38 = vrot.slane %v2026_v28, 4  ;;  %v1486_v19 = vsel %vm5588_vm4, %v6018_v43, %v6009_v27 }
  0xf0   : > { %v855_v63 = vpop.permute.xlu0 %854  ;;  %2062 = vrot.lane.b32.xlu2 %v1891_v61, %s7492_s11  ;;  %v2020_v42 = vrot.slane %v2019_v33, 4  ;;  %v1503_v61 = vrot.slane %v1501_v18, 5  ;;  %v1531_v62 = vshll.u32 %v1435_v53, 16  ;;  %v1535_v7 = vshrl.u32 %v1435_v53, 16  ;;  %v1441_v28 = vld [vmem:[#allocation2 + $0x40] sm:$0xf] }
  0xf1   : > { %892 = vst.msk [vmem:[#allocation3 + $0x2c] sm:$0xf] %vm880_vm9, %v855_v63  ;;  %v1549_v63 = vshll.u32 %v1437_v46, 16  ;;  %v6109_v18 = vrot.slane %v2174_v44, 4  ;;  %v2177_v33 = vrot.slane %v6102_v6, 5  ;;  %v6130_v53 = vrot.slane %v1555_v9, 5 }
  0xf2   : > { %v1114_v13 = vpop.permute.xlu2 %1113  ;;  %v2025_v52 = vsel %vm5588_vm4, %v2020_v42, %v6071_v30  ;;  %v1504_v36 = vor.u32 %v1503_v61, %v1500_v48  ;;  %v6116_v42 = vrot.slane %v1531_v62, 5  ;;  %v1537_v45 = vrot.slane %v1535_v7, 4  ;;  %v2127_v61 = vld [vmem:[#allocation2 + $0x18] sm:$0xe] }
  0xf3   : > { %1162 = vst.msk [vmem:[#allocation3] sm:$0xf] %vm1161_vm10, %v1114_v13  ;;  %v4988_v51 = vrot.slane %v2127_v61, 9  ;;  %v1579_v62 = vshll.u32 %v1441_v28, 16  ;;  %v1583_v7 = vshrl.u32 %v1441_v28, 16 }
  0xf4   : > { %2078 = vrot.lane.b32.xlu1 %v1987_v12, %s7492_s11  ;;  %v2056_v12 = vshll.u32 %v1867_v55, 16  ;;  %v6113_v41 = vrot.slane %v1504_v36, 4  ;;  %v1439_v55 = vld [vmem:[#allocation2 + $0x38] sm:$0x1]  ;;  %v1538_v60 = vor.u32 %v1537_v45, %v6116_v42  ;;  %v6184_v45 = vld [vmem:[#allocation2 + $0x4c] sm:$0xf] }
  0xf5   : > { %v2124_v61 = vld [vmem:[#allocation2 + $0xc] sm:$0xe] }
  0xf6   : > { %2076 = vrot.lane.b32.xlu0 %v1977_v10, %s7492_s11  ;;  %v863_v39 = vpop.permute.xlu1 %862  ;;  %v1995_v10 = vor.u32 %v1994_v5, %v1991_v40  ;;  %v2058_v13 = vrot.slane %v2056_v12, 5  ;;  %v1565_v40 = vshll.u32 %v1439_v55, 16  ;;  %v1440_v5 = vld [vmem:[#allocation2 + $0x3c] sm:$0xf]  ;;  %v6182_v21 = vrot.slane %v1538_v60, 4 }
  0xf7   : > { %896 = vst.msk [vmem:[#allocation3 + $0x3c] sm:$0xf] %vm880_vm9, %v863_v39  ;;  %v1559_v39 = vshrl.u32 %v1438_v34, 16  ;;  %v1864_v34 = vld [vmem:[#allocation2 + $0x5c] sm:$0x1] }
  0xf8   : > { %v861_v47 = vpop.permute.xlu0 %860  ;;  %2068 = vrot.lane.b32.xlu2 %v1929_v3, %s7492_s11  ;;  %v1551_v3 = vrot.slane %v1549_v63, 5  ;;  %v2059_v46 = vsel %vm5588_vm4, %v2054_v58, %v2058_v13  ;;  %v1996_v48 = vrot.slane %v1995_v10, 4  ;;  %v2029_v63 = vor.u32 %v2028_v38, %v6071_v30  ;;  %v2131_v38 = vld [vmem:[#allocation2 + $0x28] sm:$0xf] }
  0xf9   : > { %895 = vst.msk [vmem:[#allocation3 + $0x38] sm:$0xf] %vm880_vm9, %v861_v47  ;;  %v1541_v47 = vshll.u32 %v1436_v31, 16  ;;  %v1570_v13 = vshrl.u32 %v1440_v5, 16  ;;  %v2188_v28 = vrot.slane %v2131_v38, 5 }
  0xfa   : > { %v6092_v8 = vld [vmem:[#allocation3] sm:$0xf]  ;;  %v1120_v20 = vpop.permute.xlu2 %1119  ;;  %v2001_v26 = vsel %vm5588_vm4, %v1996_v48, %v5962_v4  ;;  %v1534_v4 = vsel %vm5588_vm4, %v1529_v35, %v6116_v42  ;;  %v2030_v31 = vrot.slane %v2029_v63, 4 }
  0xfb   : > { %1657 = vst.msk [vmem:[#allocation3] sm:$0xf] %vm443_vm0, %v1462_v50 }
  0xfc   : > { %2084 = vrot.lane.b32.xlu1 %v2025_v52, %s7492_s11  ;;  %1165 = vst.msk [vmem:[#allocation3 + $0xc] sm:$0xf] %vm1161_vm10, %v1120_v20  ;;  %v1552_v52 = vor.u32 %v1551_v3, %v1548_v57  ;;  %v2181_v20 = vrot.slane %v6124_v2, 5  ;;  %v1573_v3 = vshll.u32 %v1440_v5, 16  ;;  %v2190_v5 = vrot.slane %v2188_v28, 4 }
  0xfe   : > { %2082 = vrot.lane.b32.xlu0 %v2011_v49, %s7492_s11  ;;  %v1118_v11 = vpop.permute.xlu1 %1117  ;;  %v2049_v49 = vsel %vm5588_vm4, %v6056_v16, %v6027_v56  ;;  %v1561_v56 = vrot.slane %v1559_v39, 4  ;;  %v1472_v16 = vsel %vm5588_vm4, %v6043_v59, %v6045_v17  ;;  %v2032_v59 = vshll.u32 %v1864_v34, 16  ;;  %v1443_v17 = vld [vmem:[#allocation2 + $0x48] sm:$0xf] }
  0xff   : > { %1164 = vst.msk [vmem:[#allocation3 + $0x8] sm:$0xf] %vm1161_vm10, %v1118_v11  ;;  %v6156_v1 = vrot.slane %v1552_v52, 4  ;;  %v6167_v11 = vld [vmem:[#allocation2 + $0x44] sm:$0x1]  ;;  %v2182_v57 = vsel %vm5819_vm8, %v4988_v51, %v2181_v20  ;;  %v1594_v9 = vshrl.u32 %v1443_v17, 16 }
 0x100   : > { %v1116_v15 = vpop.permute.xlu0 %1115  ;;  %2074 = vrot.lane.b32.xlu2 %v1963_v22, %s7492_s11  ;;  %v6149_v22 = vrot.slane %v1541_v47, 5  ;;  %v1562_v30 = vor.u32 %v1561_v56, %v6130_v53  ;;  %v1597_v10 = vshll.u32 %v1443_v17, 16  ;;  %v2034_v58 = vrot.slane %v2032_v59, 5  ;;  %v2130_v17 = vld [vmem:[#allocation2 + $0x24] sm:$0xe] }
 0x101   : > { %1163 = vst.msk [vmem:[#allocation3 + $0x4] sm:$0xf] %vm1161_vm10, %v1116_v15  ;;  %v1567_v39 = vrot.slane %v1565_v40, 5  ;;  %v1585_v47 = vrot.slane %v1583_v7, 4  ;;  %v1589_v6 = vshll.u32 %v6167_v11, 16  ;;  %v6199_v52 = vrot.slane %v1573_v3, 5 }
 0x102   : > { %v1126_v50 = vpop.permute.xlu2 %1125  ;;  %v1599_v48 = vrot.slane %v1597_v10, 5  ;;  %v2035_v55 = vsel %vm5588_vm4, %v2030_v31, %v2034_v58  ;;  %v1603_v34 = vshll.u32 %v6184_v45, 16  ;;  %v4987_v56 = vrot.slane %v2124_v61, 9  ;;  %v1448_v3 = vld [vmem:[#allocation2 + $0x5c] sm:$0x1] }
 0x103   : > { %v6136_v29 = vld [vmem:[#allocation3 + $0x8] sm:$0xf0]  ;;  %1168 = vst.msk [vmem:[#allocation3 + $0x18] sm:$0xf] %vm1161_vm10, %v1126_v50  ;;  %v6197_v50 = vrot.slane %v1570_v13, 4  ;;  %v1607_v11 = vshrl.u32 %v6184_v45, 16 }
 0x104   : > { %2090 = vrot.lane.b32.xlu1 %v2059_v46, %s7492_s11  ;;  %1660 = vst.msk [vmem:[#allocation3 + $0xc] sm:$0xf] %vm443_vm0, %v1496_v14  ;;  %v1563_v46 = vrot.slane %v1562_v30, 4  ;;  %v6187_v14 = vrot.slane %v1579_v62, 5  ;;  %v6220_v60 = vrot.slane %v1603_v34, 5  ;;  %v2175_v13 = vsel %vm5819_vm8, %v4987_v56, %v2174_v44 }
 0x105   : > { %v2135_v34 = vld [vmem:[#allocation2 + $0x38] sm:$0x1] }
 0x106   : > { %v6146_v27 = vld [vmem:[#allocation3 + $0x8] sm:$0xf]  ;;  %2088 = vrot.lane.b32.xlu0 %v2049_v49, %s7492_s11  ;;  %v1124_v43 = vpop.permute.xlu1 %1123 }
 0x107   : > { %1659 = vst.msk [vmem:[#allocation3 + $0x8] sm:$0xf] %vm443_vm0, %v1486_v19 }
 0x108   : > { %v5191_v12 = vld [vmem:[#allocation3] sm:$0xf0]  ;;  %1167 = vst.msk [vmem:[#allocation3 + $0x14] sm:$0xf] %vm1161_vm10, %v1124_v43  ;;  %v1122_v36 = vpop.permute.xlu0 %1121  ;;  %2080 = vrot.lane.b32.xlu2 %v2001_v26, %s7492_s11  ;;  %v2132_v26 = vld [vmem:[#allocation2 + $0x2c] sm:$0x1] }
 0x109   : > { %1658 = vst.msk [vmem:[#allocation3 + $0x4] sm:$0xf] %vm443_vm0, %v1472_v16  ;;  %v4938_v37 = vor.u32 %v5191_v12, %v6092_v8  ;;  %v2178_v8 = vsel %vm5819_vm8, %v6109_v18, %v2177_v33  ;;  %v1520_v18 = vsel %vm5588_vm4, %v6076_v25, %v6067_v24  ;;  %v1596_v33 = vrot.slane %v1594_v9, 4  ;;  %v1447_v25 = vld [vmem:[#allocation2 + $0x58] sm:$0xf] }
 0x10a   : > { %1166 = vst.msk [vmem:[#allocation3 + $0x10] sm:$0xf] %vm1161_vm10, %v1122_v36  ;;  %v6180_v15 = vld [vmem:[#allocation3 + $0x18] sm:$0xf]  ;;  %v1132_v42 = vpop.permute.xlu2 %1131  ;;  %v1510_v24 = vsel %vm5588_vm4, %v6113_v41, %v6035_v0  ;;  %v1446_v16 = vld [vmem:[#allocation2 + $0x54] sm:$0xf]  ;;  %v1568_v0 = vsel %vm5588_vm4, %v1563_v46, %v1567_v39  ;;  %v1586_v41 = vor.u32 %v1585_v47, %v6187_v14  ;;  %v4942_v47 = vor.u32 %v6136_v29, %v6146_v27 }
 0x10b   : > { %4971 = vmatmul.msk.bf16.vlgmr.msra.gmra.mxu0 %vm1242_vm11, %v4938_v37  ;;  %1663 = vst.msk [vmem:[#allocation3 + $0x18] sm:$0xf] %vm443_vm0, %v1534_v4  ;;  %v1600_v43 = vor.u32 %v1599_v48, %v1596_v33  ;;  %v1627_v63 = vshll.u32 %v1447_v25, 16  ;;  %v1631_v59 = vshrl.u32 %v1447_v25, 16  ;;  %v2191_v12 = vrot.slane %v2132_v26, 5 }
 0x10c   : > { %2232 = vrot.lane.b32.xlu1 %v2182_v57, %s5442_s13  ;;  %1171 = vst.msk [vmem:[#allocation3 + $0x24] sm:$0xf] %vm1161_vm10, %v1132_v42  ;;  %v4989_v36 = vrot.slane %v2130_v17, 9  ;;  %v1558_v4 = vsel %vm5588_vm4, %v6156_v1, %v6130_v53  ;;  %v1618_v62 = vshrl.u32 %v1446_v16, 16  ;;  %v1621_v7 = vshll.u32 %v1446_v16, 16 }
 0x10d   : > { %v1601_v37 = vrot.slane %v1600_v43, 4  ;;  %v2192_v57 = vsel %vm5819_vm8, %v2190_v5, %v2191_v12  ;;  %v1544_v53 = vsel %vm5588_vm4, %v6182_v21, %v6149_v22  ;;  %v6245_v31 = vrot.slane %v1627_v63, 5  ;;  %v2129_v21 = vld [vmem:[#allocation2 + $0x20] sm:$0x1]  ;;  %v1445_v42 = vld [vmem:[#allocation2 + $0x50] sm:$0x1] }
 0x10e   : > { %2230 = vrot.lane.b32.xlu0 %v2178_v8, %s5442_s13  ;;  %v1130_v49 = vpop.permute.xlu1 %1129  ;;  %v2189_v9 = vsel %vm5819_vm8, %v4989_v36, %v2188_v28  ;;  %v1633_v58 = vrot.slane %v1631_v59, 4  ;;  %v1587_v8 = vrot.slane %v1586_v41, 4  ;;  %v1591_v39 = vrot.slane %v1589_v6, 5  ;;  %v6262_v48 = vld [vmem:[#allocation2 + $0x34] sm:$0xf] }
 0x10f   : > { %v6204_v19 = vld [vmem:[#allocation3 + $0x10] sm:$0xf0]  ;;  %1170 = vst.msk [vmem:[#allocation3 + $0x20] sm:$0xf] %vm1161_vm10, %v1130_v49  ;;  %v1576_v22 = vor.u32 %v6199_v52, %v6197_v50  ;;  %v1620_v45 = vrot.slane %v1618_v62, 4  ;;  %v1623_v46 = vrot.slane %v1621_v7, 5  ;;  %v1606_v6 = vsel %vm5588_vm4, %v1601_v37, %v6220_v60 }
 0x110   : > { %1662 = vst.msk [vmem:[#allocation3 + $0x14] sm:$0xf] %vm443_vm0, %v1520_v18  ;;  %v1128_v35 = vpop.permute.xlu0 %1127  ;;  %2086 = vrot.lane.b32.xlu2 %v2035_v55, %s7492_s11  ;;  %v1609_v18 = vrot.slane %v1607_v11, 4  ;;  %v1637_v33 = vshll.u32 %v1448_v3, 16  ;;  %v1634_v61 = vor.u32 %v1633_v58, %v6245_v31  ;;  %v2183_v49 = vrot.slane %v2181_v20, 4 }
 0x111   : > { %v6212_v51 = vld [vmem:[#allocation3 + $0x10] sm:$0xf]  ;;  %1169 = vst.msk [vmem:[#allocation3 + $0x1c] sm:$0xf] %vm1161_vm10, %v1128_v35  ;;  %v2184_v50 = vrot.slane %v2129_v21, 5  ;;  %v2195_v29 = vrot.slane %v6262_v48, 5  ;;  %v1624_v38 = vor.u32 %v1623_v46, %v1620_v45  ;;  %v1592_v2 = vsel %vm5588_vm4, %v1587_v8, %v1591_v39 }
 0x112   : > { %1661 = vst.msk [vmem:[#allocation3 + $0x10] sm:$0xf] %vm443_vm0, %v1510_v24  ;;  %v1138_v40 = vpop.permute.xlu2 %1137  ;;  %v1577_v27 = vrot.slane %v1576_v22, 4  ;;  %v2198_v25 = vrot.slane %v2135_v34, 5  ;;  %v1610_v20 = vor.u32 %v1609_v18, %v6220_v60  ;;  %v1613_v35 = vshll.u32 %v1445_v42, 16 }
 0x113   : > { %v6226_v30 = vld [vmem:[#allocation3 + $0x20] sm:$0xf0]  ;;  %1174 = vst.msk [vmem:[#allocation3 + $0x30] sm:$0xf] %vm1161_vm10, %v1138_v40  ;;  %v2197_v24 = vrot.slane %v2195_v29, 4  ;;  %v1635_v56 = vrot.slane %v1634_v61, 4  ;;  %v2185_v43 = vsel %vm5819_vm8, %v2183_v49, %v2184_v50 }
 0x114   : > { %1666 = vst.msk [vmem:[#allocation3 + $0x24] sm:$0xf] %vm443_vm0, %v1568_v0  ;;  %2238 = vrot.lane.b32.xlu1 %v2192_v57, %s5442_s13  ;;  %v1639_v16 = vrot.slane %v1637_v33, 5  ;;  %v1582_v41 = vsel %vm5588_vm4, %v1577_v27, %v6187_v14  ;;  %v1625_v59 = vrot.slane %v1624_v38, 4  ;;  %v1611_v60 = vrot.slane %v1610_v20, 4 }
 0x115   : > { %v2199_v26 = vsel %vm5819_vm8, %v2197_v24, %v2198_v25  ;;  %v1615_v40 = vrot.slane %v1613_v35, 5  ;;  %v4946_v57 = vor.u32 %v6204_v19, %v6212_v51  ;;  %v2133_v51 = vld [vmem:[#allocation2 + $0x30] sm:$0xe]  ;;  %v2140_v45 = vld [vmem:[#allocation2 + $0x4c] sm:$0xf] }
 0x116   : > { %v6235_v10 = vld [vmem:[#allocation3 + $0x20] sm:$0xf]  ;;  %v1136_v1 = vpop.permute.xlu1 %1135  ;;  %2236 = vrot.lane.b32.xlu0 %v2189_v9, %s5442_s13  ;;  %v1640_v14 = vsel %vm5588_vm4, %v1635_v56, %v1639_v16  ;;  %v1630_v36 = vsel %vm5588_vm4, %v1625_v59, %v6245_v31  ;;  %v4990_v8 = vrot.slane %v2133_v51, 9  ;;  %v2209_v46 = vrot.slane %v2140_v45, 5  ;;  %v2139_v18 = vld [vmem:[#allocation2 + $0x48] sm:$0xe] }
 0x117   : > { %1665 = vst.msk [vmem:[#allocation3 + $0x20] sm:$0xf] %vm443_vm0, %v1558_v4  ;;  %v1616_v4 = vsel %vm5588_vm4, %v1611_v60, %v1615_v40  ;;  %v4992_v61 = vrot.slane %v2139_v18, 9  ;;  %v2143_v20 = vld [vmem:[#allocation2 + $0x58] sm:$0xf] }
 0x118   : > { %v6252_v23 = vld [vmem:[#allocation3 + $0x18] sm:$0xf0]  ;;  %1173 = vst.msk [vmem:[#allocation3 + $0x2c] sm:$0xf] %vm1161_vm10, %v1136_v1  ;;  %v1134_v44 = vpop.permute.xlu0 %1133  ;;  %2228 = vrot.lane.b32.xlu2 %v2175_v13, %s5442_s13  ;;  %v2137_v1 = vld [vmem:[#allocation2 + $0x40] sm:$0xf]  ;;  %v2196_v22 = vsel %vm5819_vm8, %v4990_v8, %v2195_v29 }
 0x119   : > { %1664 = vst.msk [vmem:[#allocation3 + $0x1c] sm:$0xf] %vm443_vm0, %v1544_v53  ;;  %v2136_v53 = vld [vmem:[#allocation2 + $0x3c] sm:$0xe]  ;;  %v2202_v3 = vrot.slane %v2137_v1, 5  ;;  %v4950_v42 = vor.u32 %v6252_v23, %v6180_v15  ;;  %v2211_v33 = vrot.slane %v2209_v46, 4  ;;  %v2210_v29 = vsel %vm5819_vm8, %v4992_v61, %v2209_v46 }
 0x11a   : > { %1172 = vst.msk [vmem:[#allocation3 + $0x28] sm:$0xf] %vm1161_vm10, %v1134_v44  ;;  %v6270_v52 = vld [vmem:[#allocation3 + $0x30] sm:$0xf]  ;;  %v1144_v55 = vpop.permute.xlu2 %1143  ;;  %v4991_v13 = vrot.slane %v2136_v53, 9  ;;  %v2216_v35 = vrot.slane %v2143_v20, 5 }
 0x11b   : > { %4972 = vmatmul.msk.bf16.gmra.mxu0 %vm1242_vm11, %v4942_v47  ;;  %1669 = vst.msk [vmem:[#allocation3 + $0x30] sm:$0xf] %vm443_vm0, %v1606_v6  ;;  %v2141_v6 = vld [vmem:[#allocation2 + $0x50] sm:$0x1]  ;;  %v2138_v23 = vld [vmem:[#allocation2 + $0x44] sm:$0x1] }
 0x11c   : > { %1177 = vst.msk [vmem:[#allocation3 + $0x3c] sm:$0xf] %vm1161_vm10, %v1144_v55  ;;  %v2203_v58 = vsel %vm5819_vm8, %v4991_v13, %v2202_v3  ;;  %v2212_v48 = vrot.slane %v2141_v6, 5  ;;  %v2204_v27 = vrot.slane %v2202_v3, 4  ;;  %v2205_v55 = vrot.slane %v2138_v23, 5  ;;  %v5208_v13 = vld [vmem:[%s7488_s3 + $0x8] sm:$0xff] }
 0x11d   : > { %2244 = vrot.lane.b32.xlu1 %v2203_v58, %s5442_s13  ;;  %v2144_v16 = vld [vmem:[#allocation2 + $0x5c] sm:$0x1]  ;;  %2388 = vmatpush.bf16.msra.mxu1 %v5208_v13  ;;  %v2603_v45 = vld [vmem:[#allocation2 + $0xc] sm:$0xf]  ;;  %v2607_v20 = vld [vmem:[#allocation2 + $0x24] sm:$0xf] }
 0x11e   : > { %v1142_v28 = vpop.permute.xlu1 %1141  ;;  %2242 = vrot.lane.b32.xlu0 %v2199_v26, %s5442_s13  ;;  %v2213_v50 = vsel %vm5819_vm8, %v2211_v33, %v2212_v48  ;;  %v2206_v38 = vsel %vm5819_vm8, %v2204_v27, %v2205_v55  ;;  %v2606_v33 = vld [vmem:[#allocation2 + $0x1c] sm:$0xf]  ;;  %v2604_v48 = vld [vmem:[#allocation2 + $0x10] sm:$0xf] }
 0x11f   : > { %v6283_v0 = vld [vmem:[#allocation3 + $0x28] sm:$0xf0]  ;;  %1176 = vst.msk [vmem:[#allocation3 + $0x38] sm:$0xf] %vm1161_vm10, %v1142_v28  ;;  %v2218_v28 = vrot.slane %v2216_v35, 4 }
 0x120   : > { %1668 = vst.msk [vmem:[#allocation3 + $0x2c] sm:$0xf] %vm443_vm0, %v1592_v2  ;;  %v1140_v63 = vpop.permute.xlu0 %1139  ;;  %2234 = vrot.lane.b32.xlu2 %v2185_v43, %s5442_s13  ;;  %v4954_v2 = vor.u32 %v6226_v30, %v6235_v10  ;;  %v2219_v43 = vrot.slane %v2144_v16, 5 }
 0x121   : > { %v6291_v17 = vld [vmem:[#allocation3 + $0x28] sm:$0xf]  ;;  %1175 = vst.msk [vmem:[#allocation3 + $0x34] sm:$0xf] %vm1161_vm10, %v1140_v63 }
 0x122   : > { %1667 = vst.msk [vmem:[#allocation3 + $0x28] sm:$0xf] %vm443_vm0, %v1582_v41  ;;  %v1785_v5 = vpop.permute.xlu2 %1784  ;;  %v2220_v41 = vsel %vm5819_vm8, %v2218_v28, %v2219_v43  ;;  %v4958_v60 = vor.u32 %v6283_v0, %v6291_v17  ;;  %v2142_v17 = vld [vmem:[#allocation2 + $0x54] sm:$0xe] }
 0x123   : > { %v6298_v12 = vld [vmem:[#allocation3 + $0x38] sm:$0xf0]  ;;  %1830 = vst.msk [vmem:[#allocation3 + $0x8] sm:$0xf] %vm782_vm5, %v1785_v5  ;;  %v2146_v5 = vld [vmem:[#allocation2 + $0x64] sm:$0xf] }
 0x124   : > { %1672 = vst.msk [vmem:[#allocation3 + $0x3c] sm:$0xf] %vm443_vm0, %v1640_v14  ;;  %v2145_v14 = vld [vmem:[#allocation2 + $0x60] sm:$0xe] }
 0x125   : > { %2250 = vrot.lane.b32.xlu1 %v2213_v50, %s5442_s13 }
 0x126   : > { %v6307_v62 = vld [vmem:[#allocation3 + $0x38] sm:$0xf]  ;;  %v1783_v7 = vpop.permute.xlu1 %1782  ;;  %2248 = vrot.lane.b32.xlu0 %v2210_v29, %s5442_s13 }
 0x127   : > { %1671 = vst.msk [vmem:[#allocation3 + $0x38] sm:$0xf] %vm443_vm0, %v1630_v36  ;;  %v4994_v36 = vrot.slane %v2145_v14, 9 }
 0x128   : > { %v6310_v37 = vld [vmem:[#allocation3 + $0x30] sm:$0xf0]  ;;  %v1781_v11 = vpop.permute.xlu0 %1780  ;;  %1829 = vst.msk [vmem:[#allocation3 + $0x4] sm:$0xf] %vm782_vm5, %v1783_v7  ;;  %2240 = vrot.lane.b32.xlu2 %v2196_v22, %s5442_s13 }
 0x129   : > { %1670 = vst.msk [vmem:[#allocation3 + $0x34] sm:$0xf] %vm443_vm0, %v1616_v4  ;;  %v2223_v4 = vrot.slane %v2146_v5, 5 }
 0x12a   : > { %1828 = vst.msk [vmem:[#allocation3] sm:$0xf] %vm782_vm5, %v1781_v11  ;;  %v1791_v9 = vpop.permute.xlu2 %1790 }
 0x12b   : > { %4973 = vmatmul.msk.bf16.gmra.mxu0 %vm1242_vm11, %v4946_v57  ;;  %1833 = vst.msk [vmem:[#allocation3 + $0x14] sm:$0xf] %vm782_vm5, %v1791_v9  ;;  %v2224_v11 = vsel %vm5819_vm8, %v4994_v36, %v2223_v4  ;;  %v4993_v9 = vrot.slane %v2142_v17, 9  ;;  %v2225_v22 = vrot.slane %v2223_v4, 4 }
 0x12d   : > { %2256 = vrot.lane.b32.xlu1 %v2224_v11, %s5442_s13  ;;  %v2217_v1 = vsel %vm5819_vm8, %v4993_v9, %v2216_v35 }
 0x12e   : > { %v1789_v31 = vpop.permute.xlu1 %1788  ;;  %2254 = vrot.lane.b32.xlu0 %v2220_v41, %s5442_s13 }
 0x12f   : > { %1832 = vst.msk [vmem:[#allocation3 + $0x10] sm:$0xf] %vm782_vm5, %v1789_v31  ;;  %v4962_v31 = vor.u32 %v6310_v37, %v6270_v52 }
 0x130   : > { %v1787_v19 = vpop.permute.xlu0 %1786  ;;  %2246 = vrot.lane.b32.xlu2 %v2206_v38, %s5442_s13  ;;  %v2608_v38 = vld [vmem:[#allocation2 + $0x28] sm:$0xf] }
 0x131   : > { %1831 = vst.msk [vmem:[#allocation3 + $0xc] sm:$0xf] %vm782_vm5, %v1787_v19 }
 0x132   : > { %v1797_v39 = vpop.permute.xlu2 %1796 }
 0x133   : > { %1836 = vst.msk [vmem:[#allocation3 + $0x20] sm:$0xf] %vm782_vm5, %v1797_v39  ;;  %v2147_v39 = vld [vmem:[#allocation2 + $0x68] sm:$0x1] }
 0x136   : > { %v1795_v21 = vpop.permute.xlu1 %1794 }
 0x137   : > { %1835 = vst.msk [vmem:[#allocation3 + $0x1c] sm:$0xf] %vm782_vm5, %v1795_v21  ;;  %v2226_v21 = vrot.slane %v2147_v39, 5 }
 0x138   : > { %v1793_v44 = vpop.permute.xlu0 %1792  ;;  %2252 = vrot.lane.b32.xlu2 %v2217_v1, %s5442_s13 }
 0x139   : > { %1834 = vst.msk [vmem:[#allocation3 + $0x18] sm:$0xf] %vm782_vm5, %v1793_v44  ;;  %v2227_v52 = vsel %vm5819_vm8, %v2225_v22, %v2226_v21 }
 0x13a   : > { %v1803_v47 = vpop.permute.xlu2 %1802 }
 0x13b   : > { %4974 = vmatmul.msk.bf16.gmra.mxu0 %vm1242_vm11, %v4950_v42  ;;  %1839 = vst.msk [vmem:[#allocation3 + $0x2c] sm:$0xf] %vm782_vm5, %v1803_v47  ;;  %v4966_v42 = vor.u32 %v6298_v12, %v6307_v62  ;;  %v2605_v62 = vld [vmem:[#allocation2 + $0x18] sm:$0xf] }
 0x13e   : > { %v1801_v49 = vpop.permute.xlu1 %1800 }
 0x13f   : > { %1838 = vst.msk [vmem:[#allocation3 + $0x28] sm:$0xf] %vm782_vm5, %v1801_v49 }
 0x140   : > { %v1799_v15 = vpop.permute.xlu0 %1798  ;;  %2258 = vrot.lane.b32.xlu2 %v2227_v52, %s5442_s13 }
 0x141   : > { %1837 = vst.msk [vmem:[#allocation3 + $0x24] sm:$0xf] %vm782_vm5, %v1799_v15 }
 0x142   : > { %v1809_v34 = vpop.permute.xlu2 %1808 }
 0x143   : > { %1842 = vst.msk [vmem:[#allocation3 + $0x38] sm:$0xf] %vm782_vm5, %v1809_v34 }
 0x146   : > { %v1807_v24 = vpop.permute.xlu1 %1806 }
 0x147   : > { %1841 = vst.msk [vmem:[#allocation3 + $0x34] sm:$0xf] %vm782_vm5, %v1807_v24 }
 0x148   : > { %v1805_v25 = vpop.permute.xlu0 %1804 }
 0x149   : > { %1840 = vst.msk [vmem:[#allocation3 + $0x30] sm:$0xf] %vm782_vm5, %v1805_v25 }
 0x14a   : > { %v2063_v56 = vpop.permute.xlu2 %2062 }
 0x14b   : > { %4975 = vmatmul.msk.bf16.gmra.mxu0 %vm1242_vm11, %v4954_v2  ;;  %2109 = vst.msk [vmem:[#allocation3 + $0x4] sm:$0xf] %vm880_vm9, %v2063_v56 }
 0x14e   : > { %v2061_v26 = vpop.permute.xlu1 %2060 }
 0x14f   : > { %2108 = vst.msk [vmem:[#allocation3] sm:$0xf] %vm880_vm9, %v2061_v26 }
 0x150   : > { %v1811_v63 = vpop.permute.xlu0 %1810 }
 0x151   : > { %1843 = vst.msk [vmem:[#allocation3 + $0x3c] sm:$0xf] %vm782_vm5, %v1811_v63  ;;  %v2609_v63 = vld [vmem:[#allocation2 + $0x30] sm:$0xf] }
 0x152   : > { %v2069_v30 = vpop.permute.xlu2 %2068 }
 0x153   : > { %2112 = vst.msk [vmem:[#allocation3 + $0x10] sm:$0xf] %vm880_vm9, %v2069_v30 }
 0x156   : > { %v2067_v10 = vpop.permute.xlu1 %2066 }
 0x157   : > { %2111 = vst.msk [vmem:[#allocation3 + $0xc] sm:$0xf] %vm880_vm9, %v2067_v10 }
 0x158   : > { %v2065_v59 = vpop.permute.xlu0 %2064 }
 0x159   : > { %2110 = vst.msk [vmem:[#allocation3 + $0x8] sm:$0xf] %vm880_vm9, %v2065_v59  ;;  %v2610_v59 = vld [vmem:[#allocation2 + $0x34] sm:$0xf] }
 0x15a   : > { %v2075_v40 = vpop.permute.xlu2 %2074 }
 0x15b   : > { %4976 = vmatmul.msk.bf16.gmra.mxu0 %vm1242_vm11, %v4958_v60  ;;  %2115 = vst.msk [vmem:[#allocation3 + $0x1c] sm:$0xf] %vm880_vm9, %v2075_v40 }
 0x15e   : > { %v2073_v7 = vpop.permute.xlu1 %2072 }
 0x15f   : > { %2114 = vst.msk [vmem:[#allocation3 + $0x18] sm:$0xf] %vm880_vm9, %v2073_v7 }
 0x160   : > { %v2071_v57 = vpop.permute.xlu0 %2070 }
 0x161   : > { %2113 = vst.msk [vmem:[#allocation3 + $0x14] sm:$0xf] %vm880_vm9, %v2071_v57 }
 0x162   : > { %v2081_v0 = vpop.permute.xlu2 %2080 }
 0x163   : > { %2118 = vst.msk [vmem:[#allocation3 + $0x28] sm:$0xf] %vm880_vm9, %v2081_v0 }
 0x166   : > { %v2079_v53 = vpop.permute.xlu1 %2078 }
 0x167   : > { %2117 = vst.msk [vmem:[#allocation3 + $0x24] sm:$0xf] %vm880_vm9, %v2079_v53 }
 0x168   : > { %v2077_v3 = vpop.permute.xlu0 %2076 }
 0x169   : > { %2116 = vst.msk [vmem:[#allocation3 + $0x20] sm:$0xf] %vm880_vm9, %v2077_v3  ;;  %v2612_v3 = vld [vmem:[#allocation2 + $0x40] sm:$0xf] }
 0x16a   : > { %v2087_v58 = vpop.permute.xlu2 %2086 }
 0x16b   : > { %4977 = vmatmul.msk.bf16.gmra.mxu0 %vm1242_vm11, %v4962_v31  ;;  %2121 = vst.msk [vmem:[#allocation3 + $0x34] sm:$0xf] %vm880_vm9, %v2087_v58 }
 0x16e   : > { %v2085_v19 = vpop.permute.xlu1 %2084 }
 0x16f   : > { %2120 = vst.msk [vmem:[#allocation3 + $0x30] sm:$0xf] %vm880_vm9, %v2085_v19  ;;  %v2611_v19 = vld [vmem:[#allocation2 + $0x3c] sm:$0xf] }
 0x170   : > { %v2083_v51 = vpop.permute.xlu0 %2082 }
 0x171   : > { %2119 = vst.msk [vmem:[#allocation3 + $0x2c] sm:$0xf] %vm880_vm9, %v2083_v51 }
 0x172   : > { %v2229_v8 = vpop.permute.xlu2 %2228 }
 0x173   : > { %2276 = vst.msk [vmem:[#allocation3] sm:$0xf] %vm1161_vm10, %v2229_v8 }
 0x176   : > { %v2091_v44 = vpop.permute.xlu1 %2090 }
 0x177   : > { %2123 = vst.msk [vmem:[#allocation3 + $0x3c] sm:$0xf] %vm880_vm9, %v2091_v44 }
 0x178   : > { %v2089_v37 = vpop.permute.xlu0 %2088 }
 0x179   : > { %2122 = vst.msk [vmem:[#allocation3 + $0x38] sm:$0xf] %vm880_vm9, %v2089_v37 }
 0x17a   : > { %v4999_v46 = vld [vmem:[#allocation3] sm:$0xf]  ;;  %v2235_v47 = vpop.permute.xlu2 %2234 }
 0x17b   : > { %4978 = vmatmul.msk.bf16.gmra.mxu0 %vm1242_vm11, %v4966_v42  ;;  %2619 = vst.msk [vmem:[#allocation3] sm:$0xf] %vm443_vm0, %v2603_v45 }
 0x17c   : > { %2279 = vst.msk [vmem:[#allocation3 + $0xc] sm:$0xf] %vm1161_vm10, %v2235_v47 }
 0x17e   : > { %v2233_v6 = vpop.permute.xlu1 %2232 }
 0x17f   : > { %2278 = vst.msk [vmem:[#allocation3 + $0x8] sm:$0xf] %vm1161_vm10, %v2233_v6 }
 0x180   : > { %v2231_v18 = vpop.permute.xlu0 %2230 }
 0x181   : > { %2277 = vst.msk [vmem:[#allocation3 + $0x4] sm:$0xf] %vm1161_vm10, %v2231_v18 }
 0x182   : > { %v2241_v55 = vpop.permute.xlu2 %2240 }
 0x183   : > { %v5201_v12 = vld [vmem:[#allocation3 + $0x8] sm:$0xf0]  ;;  %2282 = vst.msk [vmem:[#allocation3 + $0x18] sm:$0xf] %vm1161_vm10, %v2241_v55 }
 0x184   : > { %2622 = vst.msk [vmem:[#allocation3 + $0xc] sm:$0xf] %vm443_vm0, %v2606_v33 }
 0x186   : > { %v5003_v61 = vld [vmem:[#allocation3 + $0x8] sm:$0xf]  ;;  %v2239_v29 = vpop.permute.xlu1 %2238 }
 0x187   : > { %2621 = vst.msk [vmem:[#allocation3 + $0x8] sm:$0xf] %vm443_vm0, %v2605_v62  ;;  %v5004_v30 = vor.u32 %v5201_v12, %v5003_v61  ;;  %v2614_v62 = vld [vmem:[#allocation2 + $0x4c] sm:$0xf] }
 0x188   : > { %v5200_v49 = vld [vmem:[#allocation3] sm:$0xf0]  ;;  %v1276_v50 = vpop.f32.mrf.mxu0  ;;  %v2237_v23 = vpop.permute.xlu0 %2236  ;;  %2281 = vst.msk [vmem:[#allocation3 + $0x14] sm:$0xf] %vm1161_vm10, %v2239_v29 }
 0x189   : > { %2620 = vst.msk [vmem:[#allocation3 + $0x4] sm:$0xf] %vm443_vm0, %v2604_v48  ;;  %v5000_v15 = vor.u32 %v5200_v49, %v4999_v46  ;;  %v1355_v27 = vmul.f32 %v1276_v50, %v1276_v50  ;;  %v1317_v24 = vsel %vm1316_vm12, %v1276_v50, 0.0  ;;  %v2635_v48 = vld [vmem:[#allocation2 + $0xc] sm:$0xf] }
 0x18a   : > { %1409 = vst.msk [vmem:[%s6406_s8] sm:$0xff] %vm1316_vm12, %v1276_v50  ;;  %v6423_v10 = vld [vmem:[#allocation3 + $0x18] sm:$0xf]  ;;  %v2247_v11 = vpop.permute.xlu2 %2246  ;;  %v2613_v49 = vld [vmem:[#allocation2 + $0x48] sm:$0xf]  ;;  %v2660_v50 = vshrl.u32 %v2635_v48, 16 }
 0x18b   : > { %5033 = vmatmul.msk.bf16.vlgmr.msra.gmra.mxu1 %vm1242_vm11, %v5000_v15  ;;  %2280 = vst.msk [vmem:[#allocation3 + $0x10] sm:$0xf] %vm1161_vm10, %v2237_v23  ;;  %v1371_v28 = vsel %vm1316_vm12, %v1355_v27, 0.0  ;;  %v2663_v29 = vshll.u32 %v2635_v48, 16 }
 0x18c   : > { %2625 = vst.msk [vmem:[#allocation3 + $0x18] sm:$0xf] %vm443_vm0, %v2609_v63  ;;  %v3013_v63 = vld [vmem:[#allocation2 + $0x1c] sm:$0xf] }
 0x18d   : > { %2285 = vst.msk [vmem:[#allocation3 + $0x24] sm:$0xf] %vm1161_vm10, %v2247_v11 }
 0x18f   : > { %v5202_v16 = vld [vmem:[#allocation3 + $0x10] sm:$0xf0]  ;;  %v2245_v9 = vpop.permute.xlu1 %2244 }
 0x190   : > { %v1278_v34 = vpop.f32.mrf.mxu0  ;;  %v2243_v35 = vpop.permute.xlu0 %2242  ;;  %2624 = vst.msk [vmem:[#allocation3 + $0x14] sm:$0xf] %vm443_vm0, %v2608_v38  ;;  %v2662_v38 = vrot.slane %v2660_v50, 4 }
 0x191   : > { %v1318_v25 = vsel %vm1316_vm12, %v1278_v34, 0.0  ;;  %v1356_v2 = vmul.f32 %v1278_v34, %v1278_v34  ;;  %1410 = vst.msk [vmem:[%s6406_s8 + $0x8] sm:$0xff] %vm1316_vm12, %v1278_v34 }
 0x192   : > { %v1319_v56 = vadd.f32 %v1318_v25, %v1317_v24  ;;  %2283 = vst.msk [vmem:[#allocation3 + $0x1c] sm:$0xf] %vm1161_vm10, %v2243_v35  ;;  %v5007_v26 = vld [vmem:[#allocation3 + $0x10] sm:$0xf]  ;;  %v2665_v24 = vrot.slane %v2663_v29, 5 }
 0x193   : > { %v1372_v43 = vsel %vm1316_vm12, %v1356_v2, 0.0  ;;  %2623 = vst.msk [vmem:[#allocation3 + $0x10] sm:$0xf] %vm443_vm0, %v2607_v20  ;;  %v5008_v31 = vor.u32 %v5202_v16, %v5007_v26  ;;  %v2636_v2 = vld [vmem:[#allocation2 + $0x10] sm:$0xf] }
 0x194   : > { %v1373_v41 = vadd.f32 %v1372_v43, %v1371_v28  ;;  %2284 = vst.msk [vmem:[#allocation3 + $0x20] sm:$0xf] %vm1161_vm10, %v2245_v9  ;;  %v6438_v58 = vld [vmem:[#allocation3 + $0x20] sm:$0xf0]  ;;  %v2666_v35 = vor.u32 %v2665_v24, %v2662_v38  ;;  %v2673_v43 = vshrl.u32 %v2636_v2, 16 }
 0x195   : > { %2628 = vst.msk [vmem:[#allocation3 + $0x24] sm:$0xf] %vm443_vm0, %v2612_v3  ;;  %v3014_v9 = vld [vmem:[#allocation2 + $0x20] sm:$0x1]  ;;  %v3787_v29 = vld [vmem:[#allocation2 + $0xc] sm:$0xe] }
 0x196   : > { %v2667_v16 = vrot.slane %v2666_v35, 4  ;;  %v3056_v3 = vshll.u32 %v3014_v9, 16 }
 0x197   : > { %v2251_v46 = vpop.permute.xlu1 %2250 }
 0x198   : > { %v1281_v60 = vpop.f32.mrf.mxu0  ;;  %v2249_v47 = vpop.permute.xlu0 %2248  ;;  %2287 = vst.msk [vmem:[#allocation3 + $0x2c] sm:$0xf] %vm1161_vm10, %v2251_v46 }
 0x199   : > { %v1320_v40 = vsel %vm1316_vm12, %v1281_v60, 0.0  ;;  %v1357_v14 = vmul.f32 %v1281_v60, %v1281_v60  ;;  %1411 = vst.msk [vmem:[%s6406_s8 + $0x20] sm:$0xff] %vm1316_vm12, %v1281_v60  ;;  %v5203_v5 = vld [vmem:[#allocation3 + $0x18] sm:$0xf0] }
 0x19a   : > { %v1321_v36 = vadd.f32 %v1320_v40, %v1319_v56  ;;  %2626 = vst.msk [vmem:[#allocation3 + $0x1c] sm:$0xf] %vm443_vm0, %v2610_v59  ;;  %v5012_v12 = vor.u32 %v5203_v5, %v6423_v10  ;;  %v2669_v56 = vshll.u32 %v2636_v2, 16  ;;  %v2253_v59 = vpop.permute.xlu2 %2252  ;;  %v2916_v40 = vld [vmem:[#allocation2 + $0x18] sm:$0xf]  ;;  %v3050_v5 = vshrl.u32 %v3013_v63, 16 }
 0x19b   : > { %v1374_v4 = vsel %vm1316_vm12, %v1357_v14, 0.0  ;;  %5034 = vmatmul.msk.bf16.gmra.mxu1 %vm1242_vm11, %v5004_v30  ;;  %v6444_v22 = vld [vmem:[#allocation3 + $0x20] sm:$0xf]  ;;  %2286 = vst.msk [vmem:[#allocation3 + $0x28] sm:$0xf] %vm1161_vm10, %v2249_v47  ;;  %v3046_v14 = vshll.u32 %v3013_v63, 16  ;;  %2948 = vrot.lane.b32.xlu0 %v2916_v40, %s7492_s11 }
 0x19c   : > { %v1375_v7 = vadd.f32 %v1374_v4, %v1373_v41  ;;  %2627 = vst.msk [vmem:[#allocation3 + $0x20] sm:$0xf] %vm443_vm0, %v2611_v19  ;;  %v2671_v28 = vrot.slane %v2669_v56, 5  ;;  %v2917_v19 = vld [vmem:[#allocation2 + $0x1c] sm:$0xf] }
 0x19d   : > { %2288 = vst.msk [vmem:[#allocation3 + $0x30] sm:$0xf] %vm1161_vm10, %v2253_v59  ;;  %v6477_v11 = vrot.slane %v3046_v14, 5 }
 0x19e   : > { %v2672_v41 = vsel %vm5588_vm4, %v2667_v16, %v2671_v28 }
 0x19f   : > { %v6459_v27 = vld [vmem:[#allocation3 + $0x28] sm:$0xf0]  ;;  %2851 = vrot.lane.b32.xlu1 %v2672_v41, %s5440_s12 }
 0x1a0   : > { %v1283_v57 = vpop.f32.mrf.mxu0  ;;  %2630 = vst.msk [vmem:[#allocation3 + $0x2c] sm:$0xf] %vm443_vm0, %v2614_v62  ;;  %v2255_v60 = vpop.permute.xlu0 %2254 }
 0x1a1   : > { %v1322_v0 = vsel %vm1316_vm12, %v1283_v57, 0.0  ;;  %v1358_v17 = vmul.f32 %v1283_v57, %v1283_v57  ;;  %1412 = vst.msk [vmem:[%s6406_s8 + $0x28] sm:$0xff] %vm1316_vm12, %v1283_v57  ;;  %v3052_v57 = vrot.slane %v3050_v5, 4 }
 0x1a2   : > { %v1323_v53 = vadd.f32 %v1322_v0, %v1321_v36  ;;  %v6462_v34 = vld [vmem:[#allocation3 + $0x28] sm:$0xf]  ;;  %2289 = vst.msk [vmem:[#allocation3 + $0x34] sm:$0xf] %vm1161_vm10, %v2255_v60 }
 0x1a3   : > { %v1376_v1 = vsel %vm1316_vm12, %v1358_v17, 0.0  ;;  %2629 = vst.msk [vmem:[#allocation3 + $0x28] sm:$0xf] %vm443_vm0, %v2613_v49  ;;  %v2637_v17 = vld [vmem:[#allocation2 + $0x14] sm:$0x1] }
 0x1a4   : > { %v1377_v13 = vadd.f32 %v1376_v1, %v1375_v7  ;;  %v2675_v7 = vrot.slane %v2673_v43, 4  ;;  %v2679_v1 = vshll.u32 %v2637_v17, 16 }
 0x1a7   : > { %2950 = vrot.lane.b32.xlu1 %v2917_v19, %s7492_s11  ;;  %v4237_v19 = vld [vmem:[#allocation2 + $0x20] sm:$0x1] }
 0x1a8   : > { %v1286_v51 = vpop.f32.mrf.mxu0 }
 0x1a9   : > { %v1324_v8 = vsel %vm1316_vm12, %v1286_v51, 0.0  ;;  %v1359_v39 = vmul.f32 %v1286_v51, %v1286_v51  ;;  %1413 = vst.msk [vmem:[%s6406_s8 + $0x40] sm:$0xff] %vm1316_vm12, %v1286_v51  ;;  %v2615_v51 = vld [vmem:[#allocation2 + $0x54] sm:$0xf] }
 0x1aa   : > { %v1325_v21 = vadd.f32 %v1324_v8, %v1323_v53  ;;  %v2676_v53 = vor.u32 %v2675_v7, %v2671_v28  ;;  %v3957_v7 = vld [vmem:[#allocation2 + $0x20] sm:$0x1] }
 0x1ab   : > { %v1378_v44 = vsel %vm1316_vm12, %v1359_v39, 0.0  ;;  %5035 = vmatmul.msk.bf16.gmra.mxu1 %vm1242_vm11, %v5008_v31  ;;  %v5016_v31 = vor.u32 %v6438_v58, %v6444_v22  ;;  %v2681_v39 = vrot.slane %v2679_v1, 5  ;;  %v3999_v9 = vshll.u32 %v3957_v7, 16 }
 0x1ac   : > { %v1379_v52 = vadd.f32 %v1378_v44, %v1377_v13  ;;  %v3053_v13 = vor.u32 %v3052_v57, %v6477_v11  ;;  %v2677_v8 = vrot.slane %v2676_v53, 4  ;;  %v3058_v44 = vrot.slane %v3056_v3, 5  ;;  %v4236_v53 = vld [vmem:[#allocation2 + $0x1c] sm:$0xf] }
 0x1ad   : > { %v4285_v1 = vrot.slane %v4236_v53, 5 }
 0x1ae   : > { %v2682_v58 = vsel %vm5588_vm4, %v2677_v8, %v2681_v39 }
 0x1af   : > { %2853 = vrot.lane.b32.xlu2 %v2682_v58, %s5440_s12 }
 0x1b0   : > { %v1288_v37 = vpop.f32.mrf.mxu0 }
 0x1b1   : > { %v1326_v42 = vsel %vm1316_vm12, %v1288_v37, 0.0  ;;  %v1360_v45 = vmul.f32 %v1288_v37, %v1288_v37  ;;  %1414 = vst.msk [vmem:[%s6406_s8 + $0x48] sm:$0xff] %vm1316_vm12, %v1288_v37  ;;  %v2616_v37 = vld [vmem:[#allocation2 + $0x58] sm:$0xf] }
 0x1b2   : > { %v1327_v6 = vadd.f32 %v1326_v42, %v1325_v21  ;;  %v3054_v21 = vrot.slane %v3053_v13, 4  ;;  %v3012_v42 = vld [vmem:[#allocation2 + $0x18] sm:$0xf]  ;;  %v5020_v13 = vor.u32 %v6459_v27, %v6462_v34 }
 0x1b3   : > { %v1380_v18 = vsel %vm1316_vm12, %v1360_v45, 0.0  ;;  %v3955_v45 = vld [vmem:[#allocation2 + $0x18] sm:$0xf]  ;;  %v3040_v62 = vshll.u32 %v3012_v42, 16 }
 0x1b4   : > { %v1381_v33 = vadd.f32 %v1380_v18, %v1379_v52  ;;  %v3059_v22 = vsel %vm5588_vm4, %v3054_v21, %v3058_v44  ;;  %v3983_v49 = vshll.u32 %v3955_v45, 16  ;;  %v4287_v21 = vrot.slane %v4285_v1, 4 }
 0x1b5   : > { %3230 = vrot.lane.b32.xlu0 %v3059_v22, %s5442_s13  ;;  %v3042_v24 = vrot.slane %v3040_v62, 5  ;;  %v4288_v44 = vrot.slane %v4237_v19, 5  ;;  %v4235_v62 = vld [vmem:[#allocation2 + $0x18] sm:$0xe] }
 0x1b7   : > { %v4289_v22 = vsel %vm5819_vm8, %v4287_v21, %v4288_v44 }
 0x1b8   : > { %v1291_v61 = vpop.f32.mrf.mxu0 }
 0x1b9   : > { %v1328_v15 = vsel %vm1316_vm12, %v1291_v61, 0.0  ;;  %v1361_v23 = vmul.f32 %v1291_v61, %v1291_v61  ;;  %1415 = vst.msk [vmem:[%s6406_s8 + $0x60] sm:$0xff] %vm1316_vm12, %v1291_v61  ;;  %v3980_v61 = vshrl.u32 %v3955_v45, 16 }
 0x1ba   : > { %v1329_v55 = vadd.f32 %v1328_v15, %v1327_v6  ;;  %v6485_v6 = vld [vmem:[#allocation3 + $0x30] sm:$0xf]  ;;  %v3788_v15 = vld [vmem:[#allocation2 + $0x10] sm:$0xf] }
 0x1bb   : > { %v1382_v25 = vsel %vm1316_vm12, %v1361_v23, 0.0  ;;  %5036 = vmatmul.msk.bf16.gmra.mxu1 %vm1242_vm11, %v5012_v12  ;;  %2631 = vst.msk [vmem:[#allocation3 + $0x30] sm:$0xf] %vm443_vm0, %v2615_v51  ;;  %v3037_v12 = vshrl.u32 %v3012_v42, 16  ;;  %v5103_v23 = vrot.slane %v3787_v29, 9  ;;  %v3982_v2 = vrot.slane %v3980_v61, 4 }
 0x1bc   : > { %v1383_v20 = vadd.f32 %v1382_v25, %v1381_v33  ;;  %v6493_v33 = vld [vmem:[#allocation3 + $0x30] sm:$0xf0]  ;;  %v3956_v25 = vld [vmem:[#allocation2 + $0x1c] sm:$0xf]  ;;  %v2618_v51 = vld [vmem:[#allocation2 + $0x64] sm:$0xf] }
 0x1bd   : > { %2632 = vst.msk [vmem:[#allocation3 + $0x34] sm:$0xf] %vm443_vm0, %v2616_v37  ;;  %v3039_v38 = vrot.slane %v3037_v12, 4  ;;  %v3989_v16 = vshll.u32 %v3956_v25, 16  ;;  %v2617_v37 = vld [vmem:[#allocation2 + $0x60] sm:$0xf] }
 0x1bf   : > { %v3043_v56 = vor.u32 %v3042_v24, %v3039_v38  ;;  %v3991_v60 = vrot.slane %v3989_v16, 5  ;;  %v2640_v16 = vld [vmem:[#allocation2 + $0x20] sm:$0x1] }
 0x1c0   : > { %v1293_v26 = vpop.f32.mrf.mxu0 }
 0x1c1   : > { %v1330_v30 = vsel %vm1316_vm12, %v1293_v26, 0.0  ;;  %v1362_v10 = vmul.f32 %v1293_v26, %v1293_v26  ;;  %1416 = vst.msk [vmem:[%s6406_s8 + $0x68] sm:$0xff] %vm1316_vm12, %v1293_v26  ;;  %v3993_v26 = vshrl.u32 %v3956_v25, 16  ;;  %v3044_v59 = vrot.slane %v3043_v56, 4 }
 0x1c2   : > { %v1331_v36 = vadd.f32 %v1330_v30, %v1329_v55  ;;  %v3837_v55 = vrot.slane %v3788_v15, 5  ;;  %v2259_v30 = vpop.permute.xlu2 %2258 }
 0x1c3   : > { %v1384_v4 = vsel %vm1316_vm12, %v1362_v10, 0.0  ;;  %v2257_v10 = vpop.permute.xlu1 %2256  ;;  %2291 = vst.msk [vmem:[#allocation3 + $0x3c] sm:$0xf] %vm1161_vm10, %v2259_v30  ;;  %v3995_v5 = vrot.slane %v3993_v26, 4 }
 0x1c4   : > { %v1385_v0 = vadd.f32 %v1384_v4, %v1383_v20  ;;  %v3985_v20 = vrot.slane %v3983_v49, 5  ;;  %v3838_v35 = vsel %vm5819_vm8, %v5103_v23, %v3837_v55  ;;  %2290 = vst.msk [vmem:[#allocation3 + $0x38] sm:$0xf] %vm1161_vm10, %v2257_v10  ;;  %v3049_v4 = vsel %vm5588_vm4, %v3044_v59, %v6477_v11  ;;  %v3789_v11 = vld [vmem:[#allocation2 + $0x14] sm:$0x1] }
 0x1c5   : > { %3891 = vrot.lane.b32.xlu1 %v3838_v35, %s5440_s12  ;;  %3228 = vrot.lane.b32.xlu2 %v3049_v4, %s5442_s13  ;;  %v3996_v17 = vor.u32 %v3995_v5, %v3991_v60  ;;  %v3839_v8 = vrot.slane %v3837_v55, 4  ;;  %v3840_v39 = vrot.slane %v3789_v11, 5  ;;  %v2639_v49 = vld [vmem:[#allocation2 + $0x1c] sm:$0xf]  ;;  %v5024_v10 = vor.u32 %v6493_v33, %v6485_v6  ;;  %v3015_v5 = vld [vmem:[#allocation2 + $0x24] sm:$0xf] }
 0x1c6   : > { %v3986_v43 = vor.u32 %v3985_v20, %v3982_v2  ;;  %v2693_v55 = vshll.u32 %v2639_v49, 16  ;;  %v2697_v24 = vshrl.u32 %v2639_v49, 16  ;;  %v3061_v7 = vshrl.u32 %v3015_v5, 16 }
 0x1c7   : > { %v3997_v3 = vrot.slane %v3996_v17, 4  ;;  %v3841_v34 = vsel %vm5819_vm8, %v3839_v8, %v3840_v39 }
 0x1c8   : > { %v1296_v52 = vpop.f32.mrf.mxu0  ;;  %v3987_v14 = vrot.slane %v3986_v43, 4  ;;  %v2695_v35 = vrot.slane %v2693_v55, 5  ;;  %v3063_v33 = vrot.slane %v3061_v7, 4 }
 0x1c9   : > { %v1332_v46 = vsel %vm1316_vm12, %v1296_v52, 0.0  ;;  %v1363_v47 = vmul.f32 %v1296_v52, %v1296_v52  ;;  %1417 = vst.msk [vmem:[%s6406_s8 + $0x80] sm:$0xff] %vm1316_vm12, %v1296_v52 }
 0x1ca   : > { %v1333_v18 = vadd.f32 %v1332_v46, %v1331_v36  ;;  %v6523_v27 = vld [vmem:[#allocation3 + $0x38] sm:$0xf0] }
 0x1cb   : > { %v1386_v48 = vsel %vm1316_vm12, %v1363_v47, 0.0  ;;  %5037 = vmatmul.msk.bf16.gmra.mxu1 %vm1242_vm11, %v5016_v31  ;;  %v4001_v31 = vrot.slane %v3999_v9, 5  ;;  %2634 = vst.msk [vmem:[#allocation3 + $0x3c] sm:$0xf] %vm443_vm0, %v2618_v51  ;;  %v6529_v58 = vld [vmem:[#allocation3 + $0x38] sm:$0xf] }
 0x1cc   : > { %v1387_v50 = vadd.f32 %v1386_v48, %v1385_v0  ;;  %v3992_v0 = vsel %vm5588_vm4, %v3987_v14, %v3991_v60  ;;  %2633 = vst.msk [vmem:[#allocation3 + $0x38] sm:$0xf] %vm443_vm0, %v2617_v37  ;;  %v5111_v48 = vrot.slane %v4235_v62, 9 }
 0x1cd   : > { %4171 = vrot.lane.b32.xlu0 %v3992_v0, %s7492_s11  ;;  %v4002_v42 = vsel %vm5588_vm4, %v3997_v3, %v4001_v31  ;;  %3893 = vrot.lane.b32.xlu2 %v3841_v34, %s5440_s12 }
 0x1ce   : > { %4173 = vrot.lane.b32.xlu1 %v4002_v42, %s7492_s11  ;;  %v4286_v23 = vsel %vm5819_vm8, %v5111_v48, %v4285_v1  ;;  %v5028_v42 = vor.u32 %v6523_v27, %v6529_v58 }
 0x1d0   : > { %v1298_v28 = vpop.f32.mrf.mxu0 }
 0x1d1   : > { %v1334_v41 = vsel %vm1316_vm12, %v1298_v28, 0.0  ;;  %v1364_v63 = vmul.f32 %v1298_v28, %v1298_v28  ;;  %1418 = vst.msk [vmem:[%s6406_s8 + $0x88] sm:$0xff] %vm1316_vm12, %v1298_v28  ;;  %v2699_v28 = vrot.slane %v2697_v24, 4 }
 0x1d2   : > { %v1335_v40 = vadd.f32 %v1334_v41, %v1333_v18  ;;  %v2703_v41 = vshll.u32 %v2640_v16, 16 }
 0x1d3   : > { %v1388_v36 = vsel %vm1316_vm12, %v1364_v63, 0.0  ;;  %v2700_v63 = vor.u32 %v2699_v28, %v2695_v35 }
 0x1d4   : > { %v1389_v57 = vadd.f32 %v1388_v36, %v1387_v50  ;;  %v2638_v50 = vld [vmem:[#allocation2 + $0x18] sm:$0xf]  ;;  %v2705_v59 = vrot.slane %v2703_v41, 5  ;;  %v3958_v41 = vld [vmem:[#allocation2 + $0x24] sm:$0xf] }
 0x1d5   : > { %4341 = vrot.lane.b32.xlu0 %v4289_v22, %s5442_s13  ;;  %v2684_v25 = vshrl.u32 %v2638_v50, 16  ;;  %v2687_v2 = vshll.u32 %v2638_v50, 16  ;;  %4339 = vrot.lane.b32.xlu2 %v4286_v23, %s5442_s13  ;;  %v2918_v23 = vld [vmem:[#allocation2 + $0x24] sm:$0xf] }
 0x1d7   : > { %v2686_v43 = vrot.slane %v2684_v25, 4  ;;  %v2689_v26 = vrot.slane %v2687_v2, 5 }
 0x1d8   : > { %v1301_v52 = vpop.f32.mrf.mxu0 }
 0x1d9   : > { %v1336_v45 = vsel %vm1316_vm12, %v1301_v52, 0.0  ;;  %v1365_v46 = vmul.f32 %v1301_v52, %v1301_v52  ;;  %1419 = vst.msk [vmem:[%s6406_s8 + $0xa0] sm:$0xff] %vm1316_vm12, %v1301_v52  ;;  %v2690_v30 = vor.u32 %v2689_v26, %v2686_v43 }
 0x1da   : > { %v1337_v47 = vadd.f32 %v1336_v45, %v1335_v40  ;;  %v2701_v40 = vrot.slane %v2700_v63, 4 }
 0x1db   : > { %v1390_v18 = vsel %vm1316_vm12, %v1365_v46, 0.0  ;;  %5038 = vmatmul.msk.bf16.gmra.mxu1 %vm1242_vm11, %v5020_v13  ;;  %v2691_v14 = vrot.slane %v2690_v30, 4  ;;  %v3016_v13 = vld [vmem:[#allocation2 + $0x28] sm:$0xf]  ;;  %v3791_v30 = vld [vmem:[#allocation2 + $0x1c] sm:$0xf] }
 0x1dc   : > { %v1391_v12 = vadd.f32 %v1390_v18, %v1389_v57  ;;  %v3064_v57 = vshll.u32 %v3015_v5, 16  ;;  %v2706_v17 = vsel %vm5588_vm4, %v2701_v40, %v2705_v59  ;;  %v3070_v31 = vshll.u32 %v3016_v13, 16  ;;  %v2919_v59 = vld [vmem:[#allocation2 + $0x28] sm:$0xf] }
 0x1dd   : > { %v2696_v9 = vsel %vm5588_vm4, %v2691_v14, %v2695_v35  ;;  %2857 = vrot.lane.b32.xlu2 %v2706_v17, %s5440_s12  ;;  %v3074_v49 = vshrl.u32 %v3016_v13, 16  ;;  %v4007_v40 = vshll.u32 %v3958_v41, 16  ;;  %v3790_v14 = vld [vmem:[#allocation2 + $0x18] sm:$0xe]  ;;  %v3844_v5 = vrot.slane %v3791_v30, 5 }
 0x1de   : > { %2855 = vrot.lane.b32.xlu1 %v2696_v9, %s5440_s12  ;;  %v3066_v53 = vrot.slane %v3064_v57, 5  ;;  %v3072_v19 = vrot.slane %v3070_v31, 5  ;;  %v5104_v17 = vrot.slane %v3790_v14, 9  ;;  %v3959_v13 = vld [vmem:[#allocation2 + $0x28] sm:$0xf] }
 0x1df   : > { %v4017_v31 = vshrl.u32 %v3959_v13, 16 }
 0x1e0   : > { %v1303_v61 = vpop.f32.mrf.mxu0  ;;  %v3067_v3 = vor.u32 %v3066_v53, %v3063_v33  ;;  %v3846_v53 = vrot.slane %v3844_v5, 4 }
 0x1e1   : > { %v1338_v29 = vsel %vm1316_vm12, %v1303_v61, 0.0  ;;  %v1366_v15 = vmul.f32 %v1303_v61, %v1303_v61  ;;  %1420 = vst.msk [vmem:[%s6406_s8 + $0xa8] sm:$0xff] %vm1316_vm12, %v1303_v61 }
 0x1e2   : > { %v1339_v38 = vadd.f32 %v1338_v29, %v1337_v47  ;;  %v3068_v11 = vrot.slane %v3067_v3, 4  ;;  %v3076_v29 = vrot.slane %v3074_v49, 4 }
 0x1e3   : > { %v1392_v20 = vsel %vm1316_vm12, %v1366_v15, 0.0  ;;  %v3017_v15 = vld [vmem:[#allocation2 + $0x2c] sm:$0x1] }
 0x1e4   : > { %v1393_v56 = vadd.f32 %v1392_v20, %v1391_v12  ;;  %v3073_v21 = vsel %vm5588_vm4, %v3068_v11, %v3072_v19  ;;  %v3077_v55 = vor.u32 %v3076_v29, %v3072_v19  ;;  %v3845_v11 = vsel %vm5819_vm8, %v5104_v17, %v3844_v5  ;;  %v4240_v29 = vld [vmem:[#allocation2 + $0x2c] sm:$0x1]  ;;  %v3018_v5 = vld [vmem:[#allocation2 + $0x30] sm:$0xf] }
 0x1e5   : > { %3232 = vrot.lane.b32.xlu2 %v3073_v21, %s5442_s13  ;;  %v4238_v21 = vld [vmem:[#allocation2 + $0x24] sm:$0xe] }
 0x1e6   : > { %v3078_v16 = vrot.slane %v3077_v55, 4 }
 0x1e8   : > { %v1306_v60 = vpop.f32.mrf.mxu0 }
 0x1e9   : > { %v1340_v36 = vsel %vm1316_vm12, %v1306_v60, 0.0  ;;  %v1367_v4 = vmul.f32 %v1306_v60, %v1306_v60  ;;  %1421 = vst.msk [vmem:[%s6406_s8 + $0xc0] sm:$0xff] %vm1316_vm12, %v1306_v60  ;;  %v4004_v60 = vshrl.u32 %v3958_v41, 16 }
 0x1ea   : > { %v1341_v0 = vadd.f32 %v1340_v36, %v1339_v38  ;;  %v3080_v38 = vshll.u32 %v3017_v15, 16 }
 0x1eb   : > { %v1394_v6 = vsel %vm1316_vm12, %v1367_v4, 0.0  ;;  %5039 = vmatmul.msk.bf16.gmra.mxu1 %vm1242_vm11, %v5024_v10  ;;  %v3792_v4 = vld [vmem:[#allocation2 + $0x20] sm:$0x1]  ;;  %v4006_v9 = vrot.slane %v4004_v60, 4 }
 0x1ec   : > { %v1395_v1 = vadd.f32 %v1394_v6, %v1393_v56  ;;  %v3082_v28 = vrot.slane %v3080_v38, 5  ;;  %v4009_v6 = vrot.slane %v4007_v40, 5  ;;  %v2643_v40 = vld [vmem:[#allocation2 + $0x2c] sm:$0x1] }
 0x1ee   : > { %v3083_v10 = vsel %vm5588_vm4, %v3078_v16, %v3082_v28  ;;  %v4010_v19 = vor.u32 %v4009_v6, %v4006_v9  ;;  %v3085_v9 = vshrl.u32 %v3018_v5, 16  ;;  %v3088_v6 = vshll.u32 %v3018_v5, 16  ;;  %v5217_v5 = vld [vmem:[%s7488_s3 + $0x10] sm:$0xff] }
 0x1ef   : > { %3388 = vmatpush.bf16.msra.mxu2 %v5217_v5 }
 0x1f0   : > { %v1308_v51 = vpop.f32.mrf.mxu0 }
 0x1f1   : > { %v1342_v8 = vsel %vm1316_vm12, %v1308_v51, 0.0  ;;  %v1368_v39 = vmul.f32 %v1308_v51, %v1308_v51  ;;  %1422 = vst.msk [vmem:[%s6406_s8 + $0xc8] sm:$0xff] %vm1316_vm12, %v1308_v51  ;;  %v4013_v51 = vshll.u32 %v3959_v13, 16 }
 0x1f2   : > { %v1343_v44 = vadd.f32 %v1342_v8, %v1341_v0 }
 0x1f3   : > { %v1396_v52 = vsel %vm1316_vm12, %v1368_v39, 0.0 }
 0x1f4   : > { %v1397_v37 = vadd.f32 %v1396_v52, %v1395_v1  ;;  %v3847_v1 = vrot.slane %v3792_v4, 5  ;;  %v4019_v52 = vrot.slane %v4017_v31, 4 }
 0x1f6   : > { %v3848_v8 = vsel %vm5819_vm8, %v3846_v53, %v3847_v1 }
 0x1f8   : > { %v1311_v45 = vpop.f32.mrf.mxu0 }
 0x1f9   : > { %v1344_v46 = vsel %vm1316_vm12, %v1311_v45, 0.0  ;;  %v1369_v34 = vmul.f32 %v1311_v45, %v1311_v45  ;;  %1423 = vst.msk [vmem:[%s6406_s8 + $0xe0] sm:$0xff] %vm1316_vm12, %v1311_v45 }
 0x1fa   : > { %v1345_v47 = vadd.f32 %v1344_v46, %v1343_v44  ;;  %v4239_v44 = vld [vmem:[#allocation2 + $0x28] sm:$0xf]  ;;  %v4011_v46 = vrot.slane %v4010_v19, 4  ;;  %v3019_v19 = vld [vmem:[#allocation2 + $0x34] sm:$0xf] }
 0x1fb   : > { %v1398_v22 = vsel %vm1316_vm12, %v1369_v34, 0.0  ;;  %5040 = vmatmul.msk.bf16.gmra.mxu1 %vm1242_vm11, %v5028_v42  ;;  %v4015_v34 = vrot.slane %v4013_v51, 5 }
 0x1fc   : > { %v1399_v18 = vadd.f32 %v1398_v22, %v1397_v37  ;;  %v2641_v22 = vld [vmem:[#allocation2 + $0x24] sm:$0xf] }
 0x1fd   : > { %v4020_v49 = vor.u32 %v4019_v52, %v4015_v34  ;;  %v4016_v55 = vsel %vm5588_vm4, %v4011_v46, %v4015_v34  ;;  %v2711_v38 = vshll.u32 %v2641_v22, 16 }
 0x1ff   : > { %v4021_v16 = vrot.slane %v4020_v49, 4  ;;  %v2713_v30 = vrot.slane %v2711_v38, 5 }
 0x200   : > { %v1313_v12 = vpop.f32.mrf.mxu0 }
 0x201   : > { %v1346_v62 = vsel %vm1316_vm12, %v1313_v12, 0.0  ;;  %v1370_v48 = vmul.f32 %v1313_v12, %v1313_v12  ;;  %1424 = vst.msk [vmem:[%s6406_s8 + $0xe8] sm:$0xff] %vm1316_vm12, %v1313_v12  ;;  %v5112_v12 = vrot.slane %v4238_v21, 9  ;;  %v3098_v21 = vshrl.u32 %v3019_v19, 16 }
 0x202   : > { %v6575_v61 = vadd.f32 %v1346_v62, %v1345_v47  ;;  %v3960_v47 = vld [vmem:[#allocation2 + $0x2c] sm:$0x1]  ;;  %v4292_v62 = vrot.slane %v4239_v44, 5 }
 0x203   : > { %v1400_v27 = vsel %vm1316_vm12, %v1370_v48, 0.0  ;;  %v2642_v48 = vld [vmem:[#allocation2 + $0x28] sm:$0xf]  ;;  %v4023_v15 = vshll.u32 %v3960_v47, 16 }
 0x204   : > { %v6578_v58 = vadd.f32 %v1400_v27, %v1399_v18 }
 0x208   : > { %v2390_v50 = vpop.f32.mrf.mxu1 }
 0x209   : > { %2538 = vrot.lane.b32.xlu0 %v2390_v50, %s7492_s11  ;;  %v2468_v24 = vmul.f32 %v2390_v50, %v2390_v50  ;;  %v2430_v2 = vsel %vm1316_vm12, %v2390_v50, 0.0  ;;  %v2854_v50 = vpop.permute.xlu2 %2853 }
 0x20a   : > { %2900 = vst.msk [vmem:[#allocation3 + $0x4] sm:$0xf] %vm782_vm5, %v2854_v50 }
 0x20b   : > { %v2484_v43 = vsel %vm1316_vm12, %v2468_v24, 0.0  ;;  %v2717_v24 = vshll.u32 %v2642_v48, 16 }
 0x210   : > { %v2392_v25 = vpop.f32.mrf.mxu1 }
 0x211   : > { %v2431_v20 = vsel %vm1316_vm12, %v2392_v25, 0.0  ;;  %v2469_v35 = vmul.f32 %v2392_v25, %v2392_v25  ;;  %2952 = vrot.lane.b32.xlu0 %v2918_v23, %s7492_s11  ;;  %2540 = vrot.lane.b32.xlu1 %v2392_v25, %s7492_s11  ;;  %v2708_v23 = vshrl.u32 %v2641_v22, 16  ;;  %v2721_v25 = vshrl.u32 %v2642_v48, 16  ;;  %v2852_v44 = vpop.permute.xlu1 %2851 }
 0x212   : > { %v2432_v56 = vadd.f32 %v2431_v20, %v2430_v2  ;;  %v4293_v2 = vsel %vm5819_vm8, %v5112_v12, %v4292_v62  ;;  %2899 = vst.msk [vmem:[#allocation3] sm:$0xf] %vm782_vm5, %v2852_v44  ;;  %v3100_v22 = vrot.slane %v3098_v21, 4  ;;  %v3020_v12 = vld [vmem:[#allocation2 + $0x38] sm:$0x1] }
 0x213   : > { %v2485_v26 = vsel %vm1316_vm12, %v2469_v35, 0.0  ;;  %v4294_v35 = vrot.slane %v4292_v62, 4  ;;  %v2710_v41 = vrot.slane %v2708_v23, 4  ;;  %v3104_v23 = vshll.u32 %v3020_v12, 16 }
 0x214   : > { %v2486_v63 = vadd.f32 %v2485_v26, %v2484_v43  ;;  %v4025_v26 = vrot.slane %v4023_v15, 5 }
 0x216   : > { %v4026_v4 = vsel %vm5588_vm4, %v4021_v16, %v4025_v26  ;;  %v6642_v16 = vld [vmem:[#allocation2 + $0x28] sm:$0xf]  ;;  %v3539_v26 = vld [vmem:[#allocation2 + $0xc] sm:$0xf] }
 0x218   : > { %v2395_v36 = vpop.f32.mrf.mxu1 }
 0x219   : > { %v2433_v7 = vsel %vm1316_vm12, %v2395_v36, 0.0  ;;  %v2470_v57 = vmul.f32 %v2395_v36, %v2395_v36  ;;  %3234 = vrot.lane.b32.xlu0 %v3083_v10, %s5442_s13  ;;  %2954 = vrot.lane.b32.xlu1 %v2919_v59, %s7492_s11  ;;  %v2719_v10 = vrot.slane %v2717_v24, 5  ;;  %v2723_v59 = vrot.slane %v2721_v25, 4  ;;  %v2920_v25 = vld [vmem:[#allocation2 + $0x30] sm:$0xf] }
 0x21a   : > { %v2434_v0 = vadd.f32 %v2433_v7, %v2432_v56  ;;  %2542 = vrot.lane.b32.xlu2 %v2395_v36, %s7492_s11  ;;  %v4295_v56 = vrot.slane %v4240_v29, 5  ;;  %v2714_v7 = vor.u32 %v2713_v30, %v2710_v41  ;;  %v3540_v41 = vld [vmem:[#allocation2 + $0x10] sm:$0xf] }
 0x21b   : > { %v2487_v33 = vsel %vm1316_vm12, %v2470_v57, 0.0  ;;  %v2724_v57 = vor.u32 %v2723_v59, %v2719_v10  ;;  %v6648_v59 = vld [vmem:[#allocation2 + $0x24] sm:$0xe] }
 0x21c   : > { %v2488_v3 = vadd.f32 %v2487_v33, %v2486_v63  ;;  %v4296_v36 = vsel %vm5819_vm8, %v4294_v35, %v4295_v56  ;;  %v3106_v56 = vrot.slane %v3104_v23, 5 }
 0x21d   : > { %v2725_v31 = vrot.slane %v2724_v57, 4  ;;  %v3573_v57 = vshll.u32 %v3540_v41, 16 }
 0x21f   : > { %v3229_v17 = vpop.permute.xlu2 %3228 }
 0x220   : > { %v2397_v39 = vpop.f32.mrf.mxu1 }
 0x221   : > { %v2435_v37 = vsel %vm1316_vm12, %v2397_v39, 0.0  ;;  %v2471_v42 = vmul.f32 %v2397_v39, %v2397_v39  ;;  %3895 = vrot.lane.b32.xlu1 %v3845_v11, %s5440_s12  ;;  %2544 = vrot.lane.b32.xlu0 %v2397_v39, %s7492_s11  ;;  %v3090_v39 = vrot.slane %v3088_v6, 5 }
 0x222   : > { %v2436_v45 = vadd.f32 %v2435_v37, %v2434_v0  ;;  %3897 = vrot.lane.b32.xlu2 %v3848_v8, %s5440_s12  ;;  %v2727_v0 = vshll.u32 %v2643_v40, 16  ;;  %v3087_v8 = vrot.slane %v3085_v9, 4  ;;  %v2949_v37 = vpop.permute.xlu0 %2948  ;;  %v3564_v40 = vshrl.u32 %v3539_v26, 16 }
 0x223   : > { %v2489_v18 = vsel %vm1316_vm12, %v2471_v42, 0.0  ;;  %v3094_v42 = vshll.u32 %v3019_v19, 16  ;;  %2996 = vst.msk [vmem:[#allocation3] sm:$0xf] %vm880_vm9, %v2949_v37 }
 0x224   : > { %v2490_v27 = vadd.f32 %v2489_v18, %v2488_v3  ;;  %v2715_v3 = vrot.slane %v2714_v7, 4  ;;  %v2729_v11 = vrot.slane %v2727_v0, 5  ;;  %3276 = vst.msk [vmem:[#allocation3] sm:$0xf] %vm1161_vm10, %v3229_v17  ;;  %v3091_v47 = vor.u32 %v3090_v39, %v3087_v8  ;;  %v3961_v7 = vld [vmem:[#allocation2 + $0x30] sm:$0xf] }
 0x225   : > { %v3577_v0 = vshrl.u32 %v3540_v41, 16  ;;  %v3566_v6 = vrot.slane %v3564_v40, 4  ;;  %v2921_v8 = vld [vmem:[#allocation2 + $0x34] sm:$0xf]  ;;  %v4028_v39 = vshrl.u32 %v3961_v7, 16  ;;  %v4031_v21 = vshll.u32 %v3961_v7, 16 }
 0x226   : > { %v2730_v34 = vsel %vm5588_vm4, %v2725_v31, %v2729_v11  ;;  %v3092_v29 = vrot.slane %v3091_v47, 4  ;;  %v3575_v31 = vrot.slane %v3573_v57, 5 }
 0x227   : > { %v6626_v46 = vpop.permute.xlu2 %3893  ;;  %v3579_v11 = vrot.slane %v3577_v0, 4 }
 0x228   : > { %v2400_v20 = vpop.f32.mrf.mxu1 }
 0x229   : > { %v2437_v28 = vsel %vm1316_vm12, %v2400_v20, 0.0  ;;  %v2472_v43 = vmul.f32 %v2400_v20, %v2400_v20  ;;  %4175 = vrot.lane.b32.xlu0 %v4016_v55, %s7492_s11  ;;  %2546 = vrot.lane.b32.xlu1 %v2400_v20, %s7492_s11  ;;  %v2951_v55 = vpop.permute.xlu1 %2950 }
 0x22a   : > { %v2438_v63 = vadd.f32 %v2437_v28, %v2436_v45  ;;  %4343 = vrot.lane.b32.xlu2 %v4293_v2, %s5442_s13  ;;  %v2720_v45 = vsel %vm5588_vm4, %v2715_v3, %v2719_v10  ;;  %2997 = vst.msk [vmem:[#allocation3 + $0x4] sm:$0xf] %vm880_vm9, %v2951_v55  ;;  %v3231_v24 = vpop.permute.xlu0 %3230  ;;  %v4030_v55 = vrot.slane %v4028_v39, 4 }
 0x22b   : > { %v2491_v60 = vsel %vm1316_vm12, %v2472_v43, 0.0  ;;  %3277 = vst.msk [vmem:[#allocation3 + $0x4] sm:$0xf] %vm1161_vm10, %v3231_v24  ;;  %v3962_v43 = vld [vmem:[#allocation2 + $0x34] sm:$0xf] }
 0x22c   : > { %v2492_v14 = vadd.f32 %v2491_v60, %v2490_v27  ;;  %v3096_v27 = vrot.slane %v3094_v42, 5  ;;  %v3851_v60 = vrot.slane %v6642_v16, 5  ;;  %v4041_v3 = vshrl.u32 %v3962_v43, 16 }
 0x22d   : > { %v5105_v42 = vrot.slane %v6648_v59, 9 }
 0x22e   : > { %v3101_v15 = vor.u32 %v3100_v22, %v3096_v27  ;;  %v3097_v20 = vsel %vm5588_vm4, %v3092_v29, %v3096_v27  ;;  %v3795_v22 = vld [vmem:[#allocation2 + $0x2c] sm:$0x1]  ;;  %v4043_v29 = vrot.slane %v4041_v3, 4 }
 0x22f   : > { %v6638_v2 = vpop.permute.xlu2 %4339 }
 0x230   : > { %v2402_v33 = vpop.f32.mrf.mxu1  ;;  %v3102_v35 = vrot.slane %v3101_v15, 4 }
 0x231   : > { %v2439_v53 = vsel %vm1316_vm12, %v2402_v33, 0.0  ;;  %v2473_v1 = vmul.f32 %v2402_v33, %v2402_v33  ;;  %4345 = vrot.lane.b32.xlu0 %v4296_v36, %s5442_s13  ;;  %4177 = vrot.lane.b32.xlu1 %v4026_v4, %s7492_s11  ;;  %v4037_v4 = vshll.u32 %v3962_v43, 16  ;;  %v2645_v43 = vld [vmem:[#allocation2 + $0x34] sm:$0xf] }
 0x232   : > { %v2440_v13 = vadd.f32 %v2439_v53, %v2438_v63  ;;  %2548 = vrot.lane.b32.xlu2 %v2402_v33, %s7492_s11  ;;  %v3107_v9 = vsel %vm5588_vm4, %v3102_v35, %v3106_v56  ;;  %v2644_v35 = vld [vmem:[#allocation2 + $0x30] sm:$0xf]  ;;  %v2745_v7 = vshrl.u32 %v2645_v43, 16 }
 0x233   : > { %v2493_v51 = vsel %vm1316_vm12, %v2473_v1, 0.0  ;;  %v5045_v1 = vld [vmem:[#allocation3] sm:$0xf]  ;;  %v6662_v12 = vrot.slane %v4037_v4, 5  ;;  %v2732_v40 = vshrl.u32 %v2644_v35, 16  ;;  %v2741_v4 = vshll.u32 %v2645_v43, 16 }
 0x234   : > { %v2494_v52 = vadd.f32 %v2493_v51, %v2492_v14  ;;  %v3567_v14 = vshll.u32 %v3539_v26, 16  ;;  %v3541_v51 = vld [vmem:[#allocation2 + $0x14] sm:$0x1]  ;;  %v3023_v43 = vld [vmem:[#allocation2 + $0x44] sm:$0x1] }
 0x235   : > { %v3583_v37 = vshll.u32 %v3541_v51, 16  ;;  %v4044_v41 = vor.u32 %v4043_v29, %v6662_v12  ;;  %v2646_v51 = vld [vmem:[#allocation2 + $0x38] sm:$0x1] }
 0x236   : > { %v3569_v33 = vrot.slane %v3567_v14, 5  ;;  %v2735_v14 = vshll.u32 %v2644_v35, 16 }
 0x237   : > { %v3892_v53 = vpop.permute.xlu1 %3891 }
 0x238   : > { %v2405_v18 = vpop.f32.mrf.mxu1  ;;  %v3570_v44 = vor.u32 %v3569_v33, %v3566_v6  ;;  %v5226_v33 = vld [vmem:[%s7488_s3 + $0x18] sm:$0xff] }
 0x239   : > { %v2441_v62 = vsel %vm1316_vm12, %v2405_v18, 0.0  ;;  %v2474_v48 = vmul.f32 %v2405_v18, %v2405_v18  ;;  %2859 = vrot.lane.b32.xlu1 %v2720_v45, %s5440_s12  ;;  %2550 = vrot.lane.b32.xlu0 %v2405_v18, %s7492_s11  ;;  %v3580_v45 = vor.u32 %v3579_v11, %v3575_v31  ;;  %v3853_v18 = vrot.slane %v3851_v60, 4 }
 0x23a   : > { %v2442_v49 = vadd.f32 %v2441_v62, %v2440_v13  ;;  %2861 = vrot.lane.b32.xlu2 %v2730_v34, %s5440_s12  ;;  %v5209_v13 = vld [vmem:[#allocation3] sm:$0xf0]  ;;  %v3571_v62 = vrot.slane %v3570_v44, 4  ;;  %v2747_v11 = vrot.slane %v2745_v7, 4  ;;  %4499 = vmatpush.bf16.msra.mxu3 %v5226_v33  ;;  %v3798_v33 = vld [vmem:[#allocation2 + $0x38] sm:$0x1] }
 0x23b   : > { %v2495_v50 = vsel %vm1316_vm12, %v2474_v48, 0.0  ;;  %v5046_v19 = vor.u32 %v5209_v13, %v5045_v1  ;;  %v3585_v48 = vrot.slane %v3583_v37, 5  ;;  %v3581_v15 = vrot.slane %v3580_v45, 4  ;;  %v4243_v45 = vld [vmem:[#allocation2 + $0x38] sm:$0x1] }
 0x23c   : > { %v2496_v38 = vadd.f32 %v2495_v50, %v2494_v52  ;;  %v2858_v52 = vpop.permute.xlu2 %2857  ;;  %v3963_v50 = vld [vmem:[#allocation2 + $0x38] sm:$0x1]  ;;  %v3576_v24 = vsel %vm5588_vm4, %v3571_v62, %v3575_v31  ;;  %v2734_v1 = vrot.slane %v2732_v40, 4  ;;  %v2737_v13 = vrot.slane %v2735_v14, 5  ;;  %v3796_v14 = vld [vmem:[#allocation2 + $0x30] sm:$0xe] }
 0x23d   : > { %2902 = vst.msk [vmem:[#allocation3 + $0xc] sm:$0xf] %vm782_vm5, %v2858_v52  ;;  %5079 = vmatmul.msk.bf16.vlgmr.msra.gmra.mxu2 %vm1242_vm11, %v5046_v19  ;;  %v3586_v26 = vsel %vm5588_vm4, %v3581_v15, %v3585_v48  ;;  %v2743_v31 = vrot.slane %v2741_v4, 5  ;;  %v3128_v40 = vshll.u32 %v3023_v43, 16 }
 0x23e   : > { %3771 = vst.msk [vmem:[#allocation3] sm:$0xf] %vm443_vm0, %v3576_v24  ;;  %v2738_v52 = vor.u32 %v2737_v13, %v2734_v1 }
 0x23f   : > { %v4172_v34 = vpop.permute.xlu0 %4171  ;;  %3939 = vst.msk [vmem:[#allocation3] sm:$0xf] %vm782_vm5, %v3892_v53  ;;  %v2748_v37 = vor.u32 %v2747_v11, %v2743_v31  ;;  %v3130_v1 = vrot.slane %v3128_v40, 5 }
 0x240   : > { %v2407_v28 = vpop.f32.mrf.mxu1  ;;  %4219 = vst.msk [vmem:[#allocation3] sm:$0xf] %vm880_vm9, %v4172_v34  ;;  %v4174_v5 = vpop.permute.xlu1 %4173  ;;  %v2739_v62 = vrot.slane %v2738_v52, 4  ;;  %v2647_v52 = vld [vmem:[#allocation2 + $0x3c] sm:$0xf] }
 0x241   : > { %v2443_v63 = vsel %vm1316_vm12, %v2407_v28, 0.0  ;;  %v2475_v30 = vmul.f32 %v2407_v28, %v2407_v28  ;;  %2956 = vrot.lane.b32.xlu0 %v2920_v25, %s7492_s11  ;;  %2552 = vrot.lane.b32.xlu1 %v2407_v28, %s7492_s11  ;;  %v4047_v28 = vshll.u32 %v3963_v50, 16  ;;  %4387 = vst.msk [vmem:[#allocation3] sm:$0xf] %vm1161_vm10, %v6638_v2  ;;  %v4045_v2 = vrot.slane %v4044_v41, 4 }
 0x242   : > { %v2444_v10 = vadd.f32 %v2443_v63, %v2442_v49  ;;  %3236 = vrot.lane.b32.xlu2 %v3097_v20, %s5442_s13  ;;  %v3854_v20 = vrot.slane %v3795_v22, 5  ;;  %v4241_v63 = vld [vmem:[#allocation2 + $0x30] sm:$0xe]  ;;  %3772 = vst.msk [vmem:[#allocation3 + $0x4] sm:$0xf] %vm443_vm0, %v3586_v26 }
 0x243   : > { %v2497_v36 = vsel %vm1316_vm12, %v2475_v30, 0.0  ;;  %v3852_v30 = vsel %vm5819_vm8, %v5105_v42, %v3851_v60  ;;  %v4049_v0 = vrot.slane %v4047_v28, 5  ;;  %3940 = vst.msk [vmem:[#allocation3 + $0x4] sm:$0xf] %vm782_vm5, %v6626_v46  ;;  %v2751_v42 = vshll.u32 %v2646_v51, 16 }
 0x244   : > { %v2498_v17 = vadd.f32 %v2497_v36, %v2496_v38  ;;  %v4033_v38 = vrot.slane %v4031_v21, 5  ;;  %v3855_v36 = vsel %vm5819_vm8, %v3853_v18, %v3854_v20  ;;  %4220 = vst.msk [vmem:[#allocation3 + $0x4] sm:$0xf] %vm880_vm9, %v4174_v5  ;;  %v3022_v50 = vld [vmem:[#allocation2 + $0x40] sm:$0xf]  ;;  %v6738_v51 = vpop.permute.xlu2 %3232 }
 0x245   : > { %v4050_v39 = vsel %vm5588_vm4, %v4045_v2, %v4049_v0  ;;  %v3965_v41 = vld [vmem:[#allocation2 + $0x40] sm:$0xf]  ;;  %v1348_v0 = vrot.slane %v6575_v61, 4 }
 0x246   : > { %v4034_v59 = vor.u32 %v4033_v38, %v4030_v55  ;;  %v2744_v38 = vsel %vm5588_vm4, %v2739_v62, %v2743_v31  ;;  %v4061_v5 = vshll.u32 %v3965_v41, 16 }
 0x247   : > { %v4342_v57 = vpop.permute.xlu0 %4341 }
 0x248   : > { %v2410_v47 = vpop.f32.mrf.mxu1  ;;  %v4035_v46 = vrot.slane %v4034_v59, 4  ;;  %4388 = vst.msk [vmem:[#allocation3 + $0x4] sm:$0xf] %vm1161_vm10, %v4342_v57  ;;  %v3797_v59 = vld [vmem:[#allocation2 + $0x34] sm:$0xf]  ;;  %v6735_v13 = vrot.slane %v4061_v5, 5 }
 0x249   : > { %v2445_v27 = vsel %vm1316_vm12, %v2410_v47, 0.0  ;;  %v2476_v49 = vmul.f32 %v2410_v47, %v2410_v47  ;;  %3238 = vrot.lane.b32.xlu0 %v3107_v9, %s5442_s13  ;;  %2958 = vrot.lane.b32.xlu1 %v2921_v8, %s7492_s11  ;;  %v3021_v8 = vld [vmem:[#allocation2 + $0x3c] sm:$0xf]  ;;  %v2923_v57 = vld [vmem:[#allocation2 + $0x40] sm:$0xf] }
 0x24a   : > { %v2446_v23 = vadd.f32 %v2445_v27, %v2444_v10  ;;  %2554 = vrot.lane.b32.xlu2 %v2410_v47, %s7492_s11  ;;  %v4242_v10 = vld [vmem:[#allocation2 + $0x34] sm:$0xf]  ;;  %v4040_v44 = vsel %vm5588_vm4, %v4035_v46, %v6662_v12  ;;  %v3109_v34 = vshrl.u32 %v3021_v8, 16  ;;  %v3112_v47 = vshll.u32 %v3021_v8, 16  ;;  %v3966_v8 = vld [vmem:[#allocation2 + $0x44] sm:$0x1] }
 0x24b   : > { %v2499_v25 = vsel %vm1316_vm12, %v2476_v49, 0.0  ;;  %v4299_v6 = vrot.slane %v4242_v10, 5  ;;  %v4302_v27 = vrot.slane %v4243_v45, 5  ;;  %v2749_v49 = vrot.slane %v2748_v37, 4  ;;  %v2648_v37 = vld [vmem:[#allocation2 + $0x40] sm:$0xf] }
 0x24c   : > { %v2500_v56 = vadd.f32 %v2499_v25, %v2498_v17  ;;  %v5113_v17 = vrot.slane %v4241_v63, 9  ;;  %v2753_v12 = vrot.slane %v2751_v42, 5  ;;  %v3111_v29 = vrot.slane %v3109_v34, 4  ;;  %v3964_v63 = vld [vmem:[#allocation2 + $0x3c] sm:$0xf] }
 0x24d   : > { %v4301_v48 = vrot.slane %v4299_v6, 4  ;;  %v3114_v15 = vrot.slane %v3112_v47, 5  ;;  %v3118_v25 = vshll.u32 %v3022_v50, 16  ;;  %v4052_v4 = vshrl.u32 %v3964_v63, 16 }
 0x24e   : > { %v4300_v21 = vsel %vm5819_vm8, %v5113_v17, %v4299_v6  ;;  %v2754_v20 = vsel %vm5588_vm4, %v2749_v49, %v2753_v12  ;;  %v4055_v7 = vshll.u32 %v3964_v63, 16  ;;  %v5106_v6 = vrot.slane %v3796_v14, 9 }
 0x24f   : > { %v5218_v18 = vld [vmem:[#allocation3] sm:$0xff]  ;;  %v4303_v24 = vsel %vm5819_vm8, %v4301_v48, %v4302_v27  ;;  %v3115_v35 = vor.u32 %v3114_v15, %v3111_v29  ;;  %v3120_v26 = vrot.slane %v3118_v25, 5  ;;  %v4054_v31 = vrot.slane %v4052_v4, 4 }
 0x250   : > { %v2412_v16 = vpop.f32.mrf.mxu1  ;;  %5157 = vmatmul.msk.bf16.vlgmr.msra.gmra.mxu3 %vm1242_vm11, %v5218_v18  ;;  %v2856_v55 = vpop.permute.xlu1 %2855  ;;  %v4057_v11 = vrot.slane %v4055_v7, 5  ;;  %v4071_v18 = vshll.u32 %v3966_v8, 16  ;;  %v2756_v48 = vshrl.u32 %v2647_v52, 16  ;;  %v2759_v27 = vshll.u32 %v2647_v52, 16  ;;  %v4244_v15 = vld [vmem:[#allocation2 + $0x3c] sm:$0xe] }
 0x251   : > { %v2447_v60 = vsel %vm1316_vm12, %v2412_v16, 0.0  ;;  %v2477_v9 = vmul.f32 %v2412_v16, %v2412_v16  ;;  %3899 = vrot.lane.b32.xlu1 %v3852_v30, %s5440_s12  ;;  %2556 = vrot.lane.b32.xlu0 %v2412_v16, %s7492_s11  ;;  %2901 = vst.msk [vmem:[#allocation3 + $0x8] sm:$0xf] %vm782_vm5, %v2856_v55  ;;  %v3116_v30 = vrot.slane %v3115_v35, 4  ;;  %v2922_v16 = vld [vmem:[#allocation2 + $0x3c] sm:$0xf] }
 0x252   : > { %v6695_v53 = vadd.f32 %v2447_v60, %v2446_v23  ;;  %3901 = vrot.lane.b32.xlu2 %v3855_v36, %s5440_s12  ;;  %v3122_v23 = vshrl.u32 %v3022_v50, 16  ;;  %v4065_v36 = vshrl.u32 %v3965_v41, 16  ;;  %v3858_v60 = vrot.slane %v3797_v59, 5  ;;  %v3024_v41 = vld [vmem:[#allocation2 + $0x48] sm:$0xf] }
 0x253   : > { %v2501_v3 = vsel %vm1316_vm12, %v2477_v9, 0.0  ;;  %v3121_v17 = vsel %vm5588_vm4, %v3116_v30, %v3120_v26  ;;  %v1402_v9 = vrot.slane %v6578_v58, 4  ;;  %v4058_v62 = vor.u32 %v4057_v11, %v4054_v31 }
 0x254   : > { %v6700_v19 = vadd.f32 %v2501_v3, %v2500_v56  ;;  %v3124_v28 = vrot.slane %v3122_v23, 4  ;;  %v4067_v3 = vrot.slane %v4065_v36, 4  ;;  %v3859_v45 = vsel %vm5819_vm8, %v5106_v6, %v3858_v60  ;;  %v4245_v23 = vld [vmem:[#allocation2 + $0x40] sm:$0xf] }
 0x255   : > { %v1403_v42 = vadd.f32 %v1402_v9, %v6578_v58  ;;  %v2765_v49 = vshll.u32 %v2648_v37, 16  ;;  %v4059_v25 = vrot.slane %v4058_v62, 4  ;;  %v2758_v35 = vrot.slane %v2756_v48, 4 }
 0x256   : > { %v3125_v10 = vor.u32 %v3124_v28, %v3120_v26  ;;  %v4068_v47 = vor.u32 %v4067_v3, %v6735_v13  ;;  %v2761_v28 = vrot.slane %v2759_v27, 5  ;;  %v5114_v63 = vrot.slane %v4244_v15, 9 }
 0x257   : > { %v1404_v29 = vrot.slane %v1403_v42, 2  ;;  %v6756_v43 = vrot.slane %v2765_v49, 5  ;;  %v4306_v30 = vrot.slane %v4245_v23, 5  ;;  %v3133_v7 = vshrl.u32 %v3024_v41, 16 }
 0x258   : > { %v6709_v22 = vpop.f32.mrf.mxu1  ;;  %v3126_v46 = vrot.slane %v3125_v10, 4 }
 0x259   : > { %4181 = vrot.lane.b32.xlu1 %v4050_v39, %s7492_s11  ;;  %4179 = vrot.lane.b32.xlu0 %v4040_v44, %s7492_s11  ;;  %v1349_v39 = vadd.f32 %v1348_v0, %v6575_v61  ;;  %v3861_v44 = vrot.slane %v3798_v33, 5  ;;  %v2769_v61 = vshrl.u32 %v2648_v37, 16  ;;  %v2478_v55 = vmul.f32 %v6709_v22, %v6709_v22 }
 0x25a   : > { %4347 = vrot.lane.b32.xlu2 %v4300_v21, %s5442_s13  ;;  %v3860_v21 = vrot.slane %v3858_v60, 4  ;;  %v3131_v34 = vsel %vm5588_vm4, %v3126_v46, %v3130_v1  ;;  %v2449_v59 = vsel %vm1316_vm12, %v6709_v22, 0.0  ;;  %v6764_v36 = vadd.f32 %v1404_v29, %v1403_v42  ;;  %v4246_v1 = vld [vmem:[#allocation2 + $0x44] sm:$0x1] }
 0x25b   : > { %v1350_v12 = vrot.slane %v1349_v39, 2  ;;  %v2771_v26 = vrot.slane %v2769_v61, 4  ;;  %v2503_v4 = vsel %vm1316_vm12, %v2478_v55, 0.0  ;;  %v4064_v0 = vsel %vm5588_vm4, %v4059_v25, %v6735_v13 }
 0x25c   : > { %v3862_v50 = vsel %vm5819_vm8, %v3860_v21, %v3861_v44  ;;  %v2450_v9 = vadd.f32 %v2449_v59, %v6695_v53  ;;  %v4307_v46 = vsel %vm5819_vm8, %v5114_v63, %v4306_v30  ;;  %v2504_v3 = vadd.f32 %v2503_v4, %v6700_v19  ;;  %v3542_v19 = vld [vmem:[#allocation2 + $0x18] sm:$0xf] }
 0x25d   : > { %v6758_v10 = vadd.f32 %v1350_v12, %v1349_v39  ;;  %v2772_v60 = vor.u32 %v2771_v26, %v6756_v43  ;;  %v4308_v8 = vrot.slane %v4306_v30, 4  ;;  %v3135_v21 = vrot.slane %v3133_v7, 4 }
 0x25e   : > { %v3591_v29 = vshll.u32 %v3542_v19, 16 }
 0x25f   : > { %v2773_v42 = vrot.slane %v2772_v60, 4 }
 0x260   : > { %v6722_v56 = vpop.f32.mrf.mxu1 }
 0x261   : > { %2863 = vrot.lane.b32.xlu1 %v2744_v38, %s5440_s12  ;;  %4349 = vrot.lane.b32.xlu0 %v4303_v24, %s5442_s13  ;;  %v4069_v38 = vrot.slane %v4068_v47, 4  ;;  %v4073_v24 = vrot.slane %v4071_v18, 5  ;;  %v2479_v40 = vmul.f32 %v6722_v56, %v6722_v56  ;;  %v2451_v6 = vsel %vm1316_vm12, %v6722_v56, 0.0 }
 0x262   : > { %2865 = vrot.lane.b32.xlu2 %v2754_v20, %s5440_s12  ;;  %v2649_v20 = vld [vmem:[#allocation2 + $0x44] sm:$0x1]  ;;  %v2452_v52 = vadd.f32 %v2451_v6, %v2450_v9  ;;  %v3800_v6 = vld [vmem:[#allocation2 + $0x40] sm:$0xf] }
 0x263   : > { %v2775_v5 = vshll.u32 %v2649_v20, 16  ;;  %v2505_v31 = vsel %vm1316_vm12, %v2479_v40, 0.0  ;;  %v3543_v40 = vld [vmem:[#allocation2 + $0x1c] sm:$0xf] }
 0x264   : > { %v2506_v49 = vadd.f32 %v2505_v31, %v2504_v3 }
 0x265   : > { %v2777_v11 = vrot.slane %v2775_v5, 5  ;;  %v3593_v5 = vrot.slane %v3591_v29, 5 }
 0x267   : > { %v2778_v26 = vsel %vm5588_vm4, %v2773_v42, %v2777_v11  ;;  %v3597_v11 = vshll.u32 %v3543_v40, 16 }
 0x268   : > { %v6731_v2 = vpop.f32.mrf.mxu1 }
 0x269   : > { %2962 = vrot.lane.b32.xlu1 %v2923_v57, %s7492_s11  ;;  %2960 = vrot.lane.b32.xlu0 %v2922_v16, %s7492_s11  ;;  %v3136_v57 = vshll.u32 %v3024_v41, 16  ;;  %v4074_v16 = vsel %vm5588_vm4, %v4069_v38, %v4073_v24  ;;  %v2480_v33 = vmul.f32 %v6731_v2, %v6731_v2  ;;  %v2453_v53 = vsel %vm1316_vm12, %v6731_v2, 0.0 }
 0x26a   : > { %3240 = vrot.lane.b32.xlu2 %v3121_v17, %s5442_s13  ;;  %v2762_v17 = vor.u32 %v2761_v28, %v2758_v35  ;;  %v2454_v61 = vadd.f32 %v2453_v53, %v2452_v52  ;;  %v3967_v53 = vld [vmem:[#allocation2 + $0x48] sm:$0xf]  ;;  %v3799_v52 = vld [vmem:[#allocation2 + $0x3c] sm:$0xe] }
 0x26b   : > { %v3138_v44 = vrot.slane %v3136_v57, 5  ;;  %v2507_v47 = vsel %vm1316_vm12, %v2480_v33, 0.0  ;;  %v3968_v33 = vld [vmem:[#allocation2 + $0x4c] sm:$0xf] }
 0x26c   : > { %v2763_v37 = vrot.slane %v2762_v17, 4  ;;  %v2508_v24 = vadd.f32 %v2507_v47, %v2506_v49  ;;  %v1406_v17 = vrot.slane %v6764_v36, 1  ;;  %v4085_v47 = vshll.u32 %v3968_v33, 16 }
 0x26d   : > { %v3139_v55 = vor.u32 %v3138_v44, %v3135_v21  ;;  %v4076_v49 = vshrl.u32 %v3967_v53, 16 }
 0x26e   : > { %v2768_v20 = vsel %vm5588_vm4, %v2763_v37, %v6756_v43 }
 0x26f   : > { %v3140_v7 = vrot.slane %v3139_v55, 4 }
 0x270   : > { %v6749_v58 = vpop.f32.mrf.mxu1 }
 0x271   : > { %3903 = vrot.lane.b32.xlu1 %v3859_v45, %s5440_s12  ;;  %3242 = vrot.lane.b32.xlu0 %v3131_v34, %s5442_s13  ;;  %v2481_v39 = vmul.f32 %v6749_v58, %v6749_v58  ;;  %v4309_v45 = vrot.slane %v4246_v1, 5  ;;  %v3025_v34 = vld [vmem:[#allocation2 + $0x4c] sm:$0xf]  ;;  %v2455_v18 = vsel %vm1316_vm12, %v6749_v58, 0.0 }
 0x272   : > { %3905 = vrot.lane.b32.xlu2 %v3862_v50, %s5440_s12  ;;  %v3146_v27 = vshrl.u32 %v3025_v34, 16  ;;  %v3588_v50 = vshrl.u32 %v3542_v19, 16  ;;  %v3142_v38 = vshll.u32 %v3025_v34, 16  ;;  %v2456_v25 = vadd.f32 %v2455_v18, %v2454_v61  ;;  %v2925_v19 = vld [vmem:[#allocation2 + $0x4c] sm:$0xf] }
 0x273   : > { %v2509_v15 = vsel %vm1316_vm12, %v2481_v39, 0.0  ;;  %v4310_v35 = vsel %vm5819_vm8, %v4308_v8, %v4309_v45  ;;  %v3601_v8 = vshrl.u32 %v3543_v40, 16  ;;  %v3865_v34 = vrot.slane %v3800_v6, 5 }
 0x274   : > { %v2543_v14 = vpop.permute.xlu2 %2542  ;;  %v3148_v41 = vrot.slane %v3146_v27, 4  ;;  %v2510_v63 = vadd.f32 %v2509_v15, %v2508_v24  ;;  %v3144_v57 = vrot.slane %v3142_v38, 5  ;;  %v4089_v18 = vshrl.u32 %v3968_v33, 16  ;;  %v2924_v27 = vld [vmem:[#allocation2 + $0x48] sm:$0xf] }
 0x275   : > { %2589 = vst.msk [vmem:[%s6406_s8 + $0x20] sm:$0xff] %vm2586_vm13, %v2543_v14  ;;  %v3590_v14 = vrot.slane %v3588_v50, 4  ;;  %v4079_v61 = vshll.u32 %v3967_v53, 16  ;;  %v5107_v50 = vrot.slane %v3799_v52, 9  ;;  %v3599_v15 = vrot.slane %v3597_v11, 5 }
 0x276   : > { %v3149_v31 = vor.u32 %v3148_v41, %v3144_v57  ;;  %v3145_v45 = vsel %vm5588_vm4, %v3140_v7, %v3144_v57  ;;  %v4091_v41 = vrot.slane %v4089_v18, 4  ;;  %v4078_v40 = vrot.slane %v4076_v49, 4 }
 0x277   : > { %v3594_v42 = vor.u32 %v3593_v5, %v3590_v14  ;;  %v4081_v14 = vrot.slane %v4079_v61, 5  ;;  %v2650_v5 = vld [vmem:[#allocation2 + $0x48] sm:$0xf]  ;;  %v3867_v7 = vrot.slane %v3865_v34, 4  ;;  %v1407_v52 = vadd.f32 %v1406_v17, %v6764_v36 }
 0x278   : > { %v6784_v13 = vpop.f32.mrf.mxu1  ;;  %v3150_v29 = vrot.slane %v3149_v31, 4  ;;  %v2780_v11 = vshrl.u32 %v2650_v5, 16 }
 0x279   : > { %4185 = vrot.lane.b32.xlu1 %v4074_v16, %s7492_s11  ;;  %4183 = vrot.lane.b32.xlu0 %v4064_v0, %s7492_s11  ;;  %v2482_v62 = vmul.f32 %v6784_v13, %v6784_v13  ;;  %v2457_v23 = vsel %vm1316_vm12, %v6784_v13, 0.0  ;;  %v3026_v16 = vld [vmem:[#allocation2 + $0x50] sm:$0x1]  ;;  %v1352_v0 = vrot.slane %v6758_v10, 1 }
 0x27a   : > { %4351 = vrot.lane.b32.xlu2 %v4307_v46, %s5442_s13  ;;  %v2458_v30 = vadd.f32 %v2457_v23, %v2456_v25  ;;  %v3152_v37 = vshll.u32 %v3026_v16, 16  ;;  %v3603_v23 = vrot.slane %v3601_v8, 4  ;;  %v3595_v25 = vrot.slane %v3594_v42, 4 }
 0x27b   : > { %v2539_v48 = vpop.permute.xlu0 %2538  ;;  %v2511_v28 = vsel %vm1316_vm12, %v2482_v62, 0.0 }
 0x27c   : > { %2587 = vst.msk [vmem:[%s6406_s8] sm:$0xff] %vm2586_vm13, %v2539_v48  ;;  %v6800_v12 = vpop.permute.xlu2 %3897  ;;  %v2512_v60 = vadd.f32 %v2511_v28, %v2510_v63  ;;  %v3154_v24 = vrot.slane %v3152_v37, 5  ;;  %v3969_v28 = vld [vmem:[#allocation2 + $0x50] sm:$0x1]  ;;  %v3604_v16 = vor.u32 %v3603_v23, %v3599_v15  ;;  %v3600_v6 = vsel %vm5588_vm4, %v3595_v25, %v3599_v15 }
 0x27d   : > { %v4095_v31 = vshll.u32 %v3969_v28, 16 }
 0x27e   : > { %v3605_v18 = vrot.slane %v3604_v16, 4 }
 0x27f   : > { %v4097_v36 = vrot.slane %v4095_v31, 5 }
 0x280   : > { %v6813_v59 = vpop.f32.mrf.mxu1 }
 0x281   : > { %v2459_v4 = vsel %vm1316_vm12, %v6813_v59, 0.0  ;;  %v2483_v43 = vmul.f32 %v6813_v59, %v6813_v59  ;;  %2867 = vrot.lane.b32.xlu1 %v2768_v20, %s5440_s12  ;;  %4353 = vrot.lane.b32.xlu0 %v4310_v35, %s5442_s13  ;;  %v1353_v20 = vadd.f32 %v1352_v0, %v6758_v10  ;;  %v3544_v35 = vld [vmem:[#allocation2 + $0x20] sm:$0x1]  ;;  %v3866_v10 = vsel %vm5819_vm8, %v5107_v50, %v3865_v34 }
 0x282   : > { %v2460_v9 = vadd.f32 %v2459_v4, %v2458_v30  ;;  %2869 = vrot.lane.b32.xlu2 %v2778_v26, %s5440_s12  ;;  %v6837_v26 = vrot.slane %v4085_v47, 5  ;;  %v3607_v33 = vshll.u32 %v3544_v35, 16  ;;  %v2782_v50 = vrot.slane %v2780_v11, 4 }
 0x283   : > { %v2513_v46 = vsel %vm1316_vm12, %v2483_v43, 0.0  ;;  %v2953_v1 = vpop.permute.xlu0 %2952  ;;  %v2541_v3 = vpop.permute.xlu1 %2540 }
 0x284   : > { %v2461_v39 = vrot.slane %v2460_v9, 4  ;;  %v2514_v21 = vadd.f32 %v2513_v46, %v2512_v60  ;;  %2998 = vst.msk [vmem:[#allocation3 + $0x8] sm:$0xf] %vm880_vm9, %v2953_v1  ;;  %v6826_v44 = vpop.permute.xlu2 %4343  ;;  %v2651_v46 = vld [vmem:[#allocation2 + $0x4c] sm:$0xf]  ;;  %v3155_v1 = vsel %vm5588_vm4, %v3150_v29, %v3154_v24 }
 0x285   : > { %3278 = vst.msk [vmem:[#allocation3 + $0x8] sm:$0xf] %vm1161_vm10, %v6738_v51  ;;  %v3801_v51 = vld [vmem:[#allocation2 + $0x44] sm:$0x1]  ;;  %v2789_v42 = vshll.u32 %v2651_v46, 16 }
 0x286   : > { %v2462_v62 = vadd.f32 %v2461_v39, %v2460_v9  ;;  %v2515_v48 = vrot.slane %v2514_v21, 4  ;;  %2588 = vst.msk [vmem:[%s6406_s8 + $0x8] sm:$0xff] %vm2586_vm13, %v2541_v3  ;;  %v3868_v57 = vrot.slane %v3801_v51, 5  ;;  %v4092_v3 = vor.u32 %v4091_v41, %v6837_v26  ;;  %v2652_v24 = vld [vmem:[#allocation2 + $0x50] sm:$0x1] }
 0x287   : > { %v2791_v51 = vrot.slane %v2789_v42, 5  ;;  %v3027_v41 = vld [vmem:[#allocation2 + $0x54] sm:$0xf] }
 0x288   : > { %v2463_v55 = vrot.slane %v2462_v62, 2  ;;  %v2516_v38 = vadd.f32 %v2515_v48, %v2514_v21  ;;  %v4082_v21 = vor.u32 %v4081_v14, %v4078_v40  ;;  %v3869_v37 = vsel %vm5819_vm8, %v3867_v7, %v3868_v57  ;;  %v4247_v48 = vld [vmem:[#allocation2 + $0x48] sm:$0xe] }
 0x289   : > { %2966 = vrot.lane.b32.xlu1 %v2925_v19, %s7492_s11  ;;  %2964 = vrot.lane.b32.xlu0 %v2924_v27, %s7492_s11  ;;  %v2783_v19 = vshll.u32 %v2650_v5, 16  ;;  %v4248_v27 = vld [vmem:[#allocation2 + $0x4c] sm:$0xf]  ;;  %v4093_v49 = vrot.slane %v4092_v3, 4  ;;  %v2799_v5 = vshll.u32 %v2652_v24, 16  ;;  %v3157_v7 = vshrl.u32 %v3027_v41, 16 }
 0x28a   : > { %v2464_v63 = vadd.f32 %v2463_v55, %v2462_v62  ;;  %v2517_v30 = vrot.slane %v2516_v38, 2  ;;  %3244 = vrot.lane.b32.xlu2 %v3145_v45, %s5442_s13  ;;  %v2793_v45 = vshrl.u32 %v2651_v46, 16  ;;  %v3609_v62 = vrot.slane %v3607_v33, 5  ;;  %v3804_v24 = vld [vmem:[#allocation2 + $0x50] sm:$0x1] }
 0x28b   : > { %v3235_v4 = vpop.permute.xlu0 %3234  ;;  %v2955_v43 = vpop.permute.xlu1 %2954  ;;  %v4083_v61 = vrot.slane %v4082_v21, 4  ;;  %v2785_v29 = vrot.slane %v2783_v19, 5  ;;  %v5115_v55 = vrot.slane %v4247_v48, 9  ;;  %v3160_v57 = vshll.u32 %v3027_v41, 16  ;;  %v2927_v48 = vld [vmem:[#allocation2 + $0x58] sm:$0xf] }
 0x28c   : > { %v2465_v0 = vrot.slane %v2464_v63, 1  ;;  %v2518_v60 = vadd.f32 %v2517_v30, %v2516_v38  ;;  %2999 = vst.msk [vmem:[#allocation3 + $0xc] sm:$0xf] %vm880_vm9, %v2955_v43  ;;  %v2549_v9 = vpop.permute.xlu2 %2548  ;;  %v5049_v39 = vld [vmem:[#allocation3 + $0x8] sm:$0xf]  ;;  %v4313_v38 = vrot.slane %v4248_v27, 5  ;;  %v3610_v28 = vsel %vm5588_vm4, %v3605_v18, %v3609_v62 }
 0x28d   : > { %3279 = vst.msk [vmem:[#allocation3 + $0xc] sm:$0xf] %vm1161_vm10, %v3235_v4  ;;  %v2795_v25 = vrot.slane %v2793_v45, 4  ;;  %v4098_v30 = vsel %vm5588_vm4, %v4093_v49, %v4097_v36  ;;  %v4088_v40 = vsel %vm5588_vm4, %v4083_v61, %v6837_v26  ;;  %v2786_v14 = vor.u32 %v2785_v29, %v2782_v50  ;;  %v3970_v18 = vld [vmem:[#allocation2 + $0x54] sm:$0xf] }
 0x28e   : > { %v2466_v8 = vadd.f32 %v2465_v0, %v2464_v63  ;;  %v2519_v53 = vrot.slane %v2518_v60, 1  ;;  %2592 = vst.msk [vmem:[%s6406_s8 + $0x48] sm:$0xff] %vm2586_vm13, %v2549_v9  ;;  %v4314_v4 = vsel %vm5819_vm8, %v5115_v55, %v4313_v38  ;;  %v4315_v16 = vrot.slane %v4313_v38, 4  ;;  %v3803_v27 = vld [vmem:[#allocation2 + $0x4c] sm:$0xf] }
 0x28f   : > { %3773 = vst.msk [vmem:[#allocation3 + $0x8] sm:$0xf] %vm443_vm0, %v3600_v6  ;;  %v2796_v43 = vor.u32 %v2795_v25, %v2791_v51  ;;  %v2787_v26 = vrot.slane %v2786_v14, 4  ;;  %v2801_v33 = vrot.slane %v2799_v5, 5  ;;  %v3159_v46 = vrot.slane %v3157_v7, 4 }
 0x290   : > { %v6857_v34 = vadd.f32 %v2466_v8, %v1353_v20  ;;  %v2520_v47 = vadd.f32 %v2519_v53, %v2518_v60  ;;  %v2926_v61 = vld [vmem:[#allocation2 + $0x54] sm:$0xf]  ;;  %v4103_v55 = vshll.u32 %v3970_v18, 16  ;;  %v3875_v7 = vrot.slane %v3804_v24, 5 }
 0x291   : > { %3907 = vrot.lane.b32.xlu1 %v3866_v10, %s5440_s12  ;;  %3246 = vrot.lane.b32.xlu0 %v3155_v1, %s5442_s13  ;;  %v4249_v10 = vld [vmem:[#allocation2 + $0x50] sm:$0x1]  ;;  %v2797_v6 = vrot.slane %v2796_v43, 4  ;;  %v3162_v1 = vrot.slane %v3160_v57, 5  ;;  %v2792_v11 = vsel %vm5588_vm4, %v2787_v26, %v2791_v51  ;;  %v3872_v51 = vrot.slane %v3803_v27, 5 }
 0x292   : > { %v6861_v17 = vadd.f32 %v2520_v47, %v1407_v52  ;;  %3909 = vrot.lane.b32.xlu2 %v3869_v37, %s5440_s12  ;;  %v4316_v0 = vrot.slane %v4249_v10, 5  ;;  %v3029_v52 = vld [vmem:[#allocation2 + $0x5c] sm:$0x1]  ;;  %v4105_v14 = vrot.slane %v4103_v55, 5  ;;  %v2653_v5 = vld [vmem:[#allocation2 + $0x54] sm:$0xf] }
 0x293   : > { %v3896_v15 = vpop.permute.xlu1 %3895  ;;  %v2545_v23 = vpop.permute.xlu0 %2544  ;;  %v2802_v53 = vsel %vm5588_vm4, %v2797_v6, %v2801_v33  ;;  %v3176_v29 = vshll.u32 %v3029_v52, 16  ;;  %v3874_v10 = vrot.slane %v3872_v51, 4  ;;  %v2654_v57 = vld [vmem:[#allocation2 + $0x58] sm:$0xf] }
 0x294   : > { %3941 = vst.msk [vmem:[#allocation3 + $0x8] sm:$0xf] %vm782_vm5, %v3896_v15  ;;  %v2862_v20 = vpop.permute.xlu2 %2861  ;;  %v5210_v35 = vld [vmem:[#allocation3 + $0x8] sm:$0xf0]  ;;  %v4317_v8 = vsel %vm5819_vm8, %v4315_v16, %v4316_v0  ;;  %v3802_v15 = vld [vmem:[#allocation2 + $0x48] sm:$0xe] }
 0x295   : > { %2590 = vst.msk [vmem:[%s6406_s8 + $0x28] sm:$0xff] %vm2586_vm13, %v2545_v23  ;;  %v5050_v63 = vor.u32 %v5210_v35, %v5049_v39  ;;  %v3163_v39 = vor.u32 %v3162_v1, %v3159_v46  ;;  %v4100_v23 = vshrl.u32 %v3970_v18, 16  ;;  %v5108_v35 = vrot.slane %v3802_v15, 9 }
 0x296   : > { %2904 = vst.msk [vmem:[#allocation3 + $0x14] sm:$0xf] %vm782_vm5, %v2862_v20  ;;  %v3178_v41 = vrot.slane %v3176_v29, 5  ;;  %v2804_v46 = vshrl.u32 %v2653_v5, 16  ;;  %v2807_v1 = vshll.u32 %v2653_v5, 16 }
 0x297   : > { %5080 = vmatmul.msk.bf16.gmra.mxu2 %vm1242_vm11, %v5050_v63  ;;  %3774 = vst.msk [vmem:[#allocation3 + $0xc] sm:$0xf] %vm443_vm0, %v3610_v28  ;;  %v3164_v45 = vrot.slane %v3163_v39, 4  ;;  %v3545_v63 = vld [vmem:[#allocation2 + $0x24] sm:$0xf]  ;;  %v3873_v6 = vsel %vm5819_vm8, %v5108_v35, %v3872_v51  ;;  %v3876_v39 = vsel %vm5819_vm8, %v3874_v10, %v3875_v7 }
 0x298   : > { %3942 = vst.msk [vmem:[#allocation3 + $0xc] sm:$0xf] %vm782_vm5, %v6800_v12  ;;  %v3028_v12 = vld [vmem:[#allocation2 + $0x58] sm:$0xf]  ;;  %v2809_v18 = vrot.slane %v2807_v1, 5 }
 0x299   : > { %4189 = vrot.lane.b32.xlu1 %v4098_v30, %s7492_s11  ;;  %4187 = vrot.lane.b32.xlu0 %v4088_v40, %s7492_s11  ;;  %v3170_v31 = vshrl.u32 %v3028_v12, 16  ;;  %v3166_v21 = vshll.u32 %v3028_v12, 16  ;;  %v3972_v30 = vld [vmem:[#allocation2 + $0x5c] sm:$0x1]  ;;  %v4102_v40 = vrot.slane %v4100_v23, 4 }
 0x29a   : > { %4355 = vrot.lane.b32.xlu2 %v4314_v4, %s5442_s13  ;;  %v4119_v33 = vshll.u32 %v3972_v30, 16 }
 0x29b   : > { %v4176_v60 = vpop.permute.xlu0 %4175  ;;  %v2547_v9 = vpop.permute.xlu1 %2546  ;;  %v3172_v19 = vrot.slane %v3170_v31, 4  ;;  %v3168_v47 = vrot.slane %v3166_v21, 5  ;;  %v4250_v31 = vld [vmem:[#allocation2 + $0x54] sm:$0xe]  ;;  %v4251_v21 = vld [vmem:[#allocation2 + $0x58] sm:$0xf] }
 0x29c   : > { %4221 = vst.msk [vmem:[#allocation3 + $0x8] sm:$0xf] %vm880_vm9, %v4176_v60  ;;  %v6885_v3 = vpop.permute.xlu2 %3236  ;;  %v3612_v60 = vshrl.u32 %v3545_v63, 16 }
 0x29d   : > { %4389 = vst.msk [vmem:[#allocation3 + $0x8] sm:$0xf] %vm1161_vm10, %v6826_v44  ;;  %v3971_v44 = vld [vmem:[#allocation2 + $0x58] sm:$0xf]  ;;  %v3173_v50 = vor.u32 %v3172_v19, %v3168_v47  ;;  %v3169_v38 = vsel %vm5588_vm4, %v3164_v45, %v3168_v47  ;;  %v5116_v45 = vrot.slane %v4250_v31, 9  ;;  %v2806_v47 = vrot.slane %v2804_v46, 4 }
 0x29e   : > { %2591 = vst.msk [vmem:[%s6406_s8 + $0x40] sm:$0xff] %vm2586_vm13, %v2547_v9  ;;  %v4109_v49 = vshll.u32 %v3971_v44, 16  ;;  %v4113_v36 = vshrl.u32 %v3971_v44, 16  ;;  %v3615_v9 = vshll.u32 %v3545_v63, 16  ;;  %v3546_v44 = vld [vmem:[#allocation2 + $0x28] sm:$0xf] }
 0x29f   : > { %v3174_v28 = vrot.slane %v3173_v50, 4  ;;  %v3614_v52 = vrot.slane %v3612_v60, 4  ;;  %v3621_v29 = vshll.u32 %v3546_v44, 16  ;;  %v3625_v15 = vshrl.u32 %v3546_v44, 16  ;;  %v4252_v63 = vld [vmem:[#allocation2 + $0x5c] sm:$0x1] }
 0x2a0   : > { %v6913_v25 = vrot.slane %v4109_v49, 5  ;;  %v4115_v20 = vrot.slane %v4113_v36, 4  ;;  %v2655_v49 = vld [vmem:[#allocation2 + $0x5c] sm:$0x1]  ;;  %v2810_v51 = vor.u32 %v2809_v18, %v2806_v47  ;;  %v3032_v18 = vld [vmem:[#allocation2 + $0x68] sm:$0x1] }
 0x2a1   : > { %2871 = vrot.lane.b32.xlu1 %v2792_v11, %s5440_s12  ;;  %4357 = vrot.lane.b32.xlu0 %v4317_v8, %s5442_s13  ;;  %v3179_v12 = vsel %vm5588_vm4, %v3174_v28, %v3178_v41  ;;  %v4106_v11 = vor.u32 %v4105_v14, %v4102_v40  ;;  %v2813_v8 = vshll.u32 %v2654_v57, 16  ;;  %v2823_v24 = vshll.u32 %v2655_v49, 16 }
 0x2a2   : > { %2873 = vrot.lane.b32.xlu2 %v2802_v53, %s5440_s12  ;;  %v4116_v0 = vor.u32 %v4115_v20, %v6913_v25  ;;  %v2817_v53 = vshrl.u32 %v2654_v57, 16  ;;  %v3623_v30 = vrot.slane %v3621_v29, 5  ;;  %v3627_v40 = vrot.slane %v3625_v15, 4 }
 0x2a3   : > { %v4346_v37 = vpop.permute.xlu0 %4345  ;;  %v4178_v42 = vpop.permute.xlu1 %4177  ;;  %v6944_v27 = vrot.slane %v2813_v8, 5  ;;  %v4323_v57 = vrot.slane %v4252_v63, 5  ;;  %v478_v63 = vld [vmem:[%s6965_s29 + $0x8] sm:$0x1] }
 0x2a4   : > { %4222 = vst.msk [vmem:[#allocation3 + $0xc] sm:$0xf] %vm880_vm9, %v4178_v42  ;;  %v2555_v62 = vpop.permute.xlu2 %2554  ;;  %v4117_v19 = vrot.slane %v4116_v0, 4  ;;  %v4121_v42 = vrot.slane %v4119_v33, 5  ;;  %v2819_v36 = vrot.slane %v2817_v53, 4 }
 0x2a5   : > { %4390 = vst.msk [vmem:[#allocation3 + $0xc] sm:$0xf] %vm1161_vm10, %v4346_v37  ;;  %v3617_v37 = vrot.slane %v3615_v9, 5  ;;  %v476_v0 = vld [vmem:[%s6965_s29] sm:$0xf] }
 0x2a6   : > { %2595 = vst.msk [vmem:[%s6406_s8 + $0x80] sm:$0xff] %vm2586_vm13, %v2555_v62  ;;  %v4320_v62 = vrot.slane %v4251_v21, 5  ;;  %v4122_v20 = vsel %vm5588_vm4, %v4117_v19, %v4121_v42  ;;  %v2820_v41 = vor.u32 %v2819_v36, %v6944_v27  ;;  %v477_v19 = vld [vmem:[%s6965_s29 + $0x4] sm:$0xf]  ;;  %s4756_s29 = sshll.u32 %s369_s20, 4  ;;  %s4757_s29 = int_to_ptr.vmem [resolvable:$true] %s4756_s29 }
 0x2a7   : > { %v3618_v55 = vor.u32 %v3617_v37, %v3614_v52  ;;  %480 = vst.msk [vmem:[#allocation2 + $0x6c] sm:$0xf] %vm443_vm0, %v476_v0 }
 0x2a8   : > { %v4321_v35 = vsel %vm5819_vm8, %v5116_v45, %v4320_v62  ;;  %v4322_v10 = vrot.slane %v4320_v62, 4  ;;  %v2821_v7 = vrot.slane %v2820_v41, 4  ;;  %481 = vst.msk [vmem:[#allocation2 + $0x70] sm:$0xf] %vm443_vm0, %v477_v19  ;;  %v3974_v62 = vld [vmem:[#allocation2 + $0x64] sm:$0xf] }
 0x2a9   : > { %2970 = vrot.lane.b32.xlu1 %v2927_v48, %s7492_s11  ;;  %2968 = vrot.lane.b32.xlu0 %v2926_v61, %s7492_s11  ;;  %v4107_v48 = vrot.slane %v4106_v11, 4  ;;  %v3619_v5 = vrot.slane %v3618_v55, 4  ;;  %v2929_v55 = vld [vmem:[#allocation2 + $0x64] sm:$0xf]  ;;  %v4137_v41 = vshrl.u32 %v3974_v62, 16 }
 0x2aa   : > { %3248 = vrot.lane.b32.xlu2 %v3169_v38, %s5442_s13  ;;  %v3030_v38 = vld [vmem:[#allocation2 + $0x60] sm:$0xf]  ;;  %482 = vst.msk [vmem:[#allocation2 + $0x74] sm:$0x1] %vm446_vm1, %v478_v63 }
 0x2ab   : > { %v2860_v4 = vpop.permute.xlu1 %2859  ;;  %v2551_v43 = vpop.permute.xlu0 %2550  ;;  %v4112_v28 = vsel %vm5588_vm4, %v4107_v48, %v6913_v25  ;;  %v3184_v14 = vshll.u32 %v3030_v38, 16  ;;  %v2811_v25 = vrot.slane %v2810_v51, 4  ;;  %v3624_v31 = vsel %vm5588_vm4, %v3619_v5, %v3623_v30  ;;  %v3805_v51 = vld [vmem:[#allocation2 + $0x54] sm:$0xe] }
 0x2ac   : > { %2903 = vst.msk [vmem:[#allocation3 + $0x10] sm:$0xf] %vm782_vm5, %v2860_v4  ;;  %v6925_v26 = vpop.permute.xlu2 %3901  ;;  %v5219_v16 = vld [vmem:[#allocation3 + $0x8] sm:$0xff]  ;;  %v3547_v4 = vld [vmem:[#allocation2 + $0x2c] sm:$0x1]  ;;  %v5109_v5 = vrot.slane %v3805_v51, 9 }
 0x2ad   : > { %2593 = vst.msk [vmem:[%s6406_s8 + $0x60] sm:$0xff] %vm2586_vm13, %v2551_v43  ;;  %5158 = vmatmul.msk.bf16.gmra.mxu3 %vm1242_vm11, %v5219_v16  ;;  %v2825_v43 = vrot.slane %v2823_v24, 5  ;;  %v3031_v16 = vld [vmem:[#allocation2 + $0x64] sm:$0xf]  ;;  %v3631_v33 = vshll.u32 %v3547_v4, 16  ;;  %v3186_v1 = vrot.slane %v3184_v14, 5  ;;  %v2816_v53 = vsel %vm5588_vm4, %v2811_v25, %v6944_v27 }
 0x2ae   : > { %v3194_v11 = vshrl.u32 %v3031_v16, 16  ;;  %v3190_v8 = vshll.u32 %v3031_v16, 16  ;;  %v3807_v4 = vld [vmem:[#allocation2 + $0x5c] sm:$0x1] }
 0x2af   : > { %v2826_v44 = vsel %vm5588_vm4, %v2821_v7, %v2825_v43  ;;  %v3633_v37 = vrot.slane %v3631_v33, 5  ;;  %v3882_v33 = vrot.slane %v3807_v4, 5  ;;  %v4255_v4 = vld [vmem:[#allocation2 + $0x68] sm:$0x1] }
 0x2b0   : > { %v3196_v45 = vrot.slane %v3194_v11, 4  ;;  %v3192_v47 = vrot.slane %v3190_v8, 5 }
 0x2b1   : > { %3911 = vrot.lane.b32.xlu1 %v3873_v6, %s5440_s12  ;;  %3250 = vrot.lane.b32.xlu0 %v3179_v12, %s5442_s13  ;;  %v3628_v6 = vor.u32 %v3627_v40, %v3623_v30 }
 0x2b2   : > { %3913 = vrot.lane.b32.xlu2 %v3876_v39, %s5440_s12  ;;  %v4324_v39 = vsel %vm5819_vm8, %v4322_v10, %v4323_v57  ;;  %v3197_v24 = vor.u32 %v3196_v45, %v3192_v47  ;;  %v3975_v10 = vld [vmem:[#allocation2 + $0x68] sm:$0x1]  ;;  %v4139_v57 = vrot.slane %v4137_v41, 4  ;;  %v3033_v41 = vld [vmem:[#allocation2 + $0x6c] sm:$0xf] }
 0x2b3   : > { %v2957_v61 = vpop.permute.xlu0 %2956  ;;  %v2553_v50 = vpop.permute.xlu1 %2552  ;;  %v3629_v52 = vrot.slane %v3628_v6, 4 }
 0x2b4   : > { %3000 = vst.msk [vmem:[#allocation3 + $0x10] sm:$0xf] %vm880_vm9, %v2957_v61  ;;  %v6947_v23 = vpop.permute.xlu2 %4347  ;;  %v3806_v61 = vld [vmem:[#allocation2 + $0x58] sm:$0xf]  ;;  %v3198_v25 = vrot.slane %v3197_v24, 4 }
 0x2b5   : > { %3280 = vst.msk [vmem:[#allocation3 + $0x10] sm:$0xf] %vm1161_vm10, %v6885_v3  ;;  %v3181_v3 = vshrl.u32 %v3030_v38, 16  ;;  %v3634_v49 = vsel %vm5588_vm4, %v3629_v52, %v3633_v37  ;;  %v2928_v38 = vld [vmem:[#allocation2 + $0x60] sm:$0xf]  ;;  %v3879_v30 = vrot.slane %v3806_v61, 5 }
 0x2b6   : > { %2594 = vst.msk [vmem:[%s6406_s8 + $0x68] sm:$0xff] %vm2586_vm13, %v2553_v50  ;;  %v3973_v50 = vld [vmem:[#allocation2 + $0x60] sm:$0xf]  ;;  %v3549_v24 = vld [vmem:[#allocation2 + $0x34] sm:$0xf] }
 0x2b7   : > { %v3183_v46 = vrot.slane %v3181_v3, 4  ;;  %v4124_v40 = vshrl.u32 %v3973_v50, 16  ;;  %v4127_v3 = vshll.u32 %v3973_v50, 16  ;;  %v3880_v11 = vsel %vm5819_vm8, %v5109_v5, %v3879_v30 }
 0x2b9   : > { %4193 = vrot.lane.b32.xlu1 %v4122_v20, %s7492_s11  ;;  %4191 = vrot.lane.b32.xlu0 %v4112_v28, %s7492_s11  ;;  %v3187_v42 = vor.u32 %v3186_v1, %v3183_v46  ;;  %v4133_v28 = vshll.u32 %v3974_v62, 16  ;;  %v4126_v16 = vrot.slane %v4124_v40, 4  ;;  %v4129_v0 = vrot.slane %v4127_v3, 5  ;;  %v2656_v46 = vld [vmem:[#allocation2 + $0x60] sm:$0xf] }
 0x2ba   : > { %4359 = vrot.lane.b32.xlu2 %v4321_v35, %s5442_s13  ;;  %v3200_v35 = vshll.u32 %v3032_v18, 16  ;;  %v2657_v1 = vld [vmem:[#allocation2 + $0x64] sm:$0xf]  ;;  %v2831_v52 = vshll.u32 %v2656_v46, 16 }
 0x2bb   : > { %v3239_v60 = vpop.permute.xlu0 %3238  ;;  %v2959_v9 = vpop.permute.xlu1 %2958  ;;  %v3188_v36 = vrot.slane %v3187_v42, 4  ;;  %v7007_v7 = vrot.slane %v4133_v28, 5  ;;  %v4130_v19 = vor.u32 %v4129_v0, %v4126_v16  ;;  %v2837_v37 = vshll.u32 %v2657_v1, 16 }
 0x2bc   : > { %3001 = vst.msk [vmem:[#allocation3 + $0x14] sm:$0xf] %vm880_vm9, %v2959_v9  ;;  %v2866_v12 = vpop.permute.xlu2 %2865  ;;  %v5053_v21 = vld [vmem:[#allocation3 + $0x10] sm:$0xf]  ;;  %v3202_v43 = vrot.slane %v3200_v35, 5  ;;  %v2841_v45 = vshrl.u32 %v2657_v1, 16 }
 0x2bd   : > { %3281 = vst.msk [vmem:[#allocation3 + $0x14] sm:$0xf] %vm1161_vm10, %v3239_v60  ;;  %v3193_v14 = vsel %vm5588_vm4, %v3188_v36, %v3192_v47  ;;  %v2833_v36 = vrot.slane %v2831_v52, 5  ;;  %v2839_v61 = vrot.slane %v2837_v37, 5  ;;  %v3649_v16 = vshrl.u32 %v3549_v24, 16 }
 0x2be   : > { %2906 = vst.msk [vmem:[#allocation3 + $0x1c] sm:$0xf] %vm782_vm5, %v2866_v12  ;;  %v3203_v8 = vsel %vm5588_vm4, %v3198_v25, %v3202_v43  ;;  %v2843_v51 = vrot.slane %v2841_v45, 4  ;;  %v3645_v25 = vshll.u32 %v3549_v24, 16  ;;  %v3205_v43 = vshrl.u32 %v3033_v41, 16 }
 0x2bf   : > { %3775 = vst.msk [vmem:[#allocation3 + $0x10] sm:$0xf] %vm443_vm0, %v3624_v31  ;;  %v4143_v31 = vshll.u32 %v3975_v10, 16  ;;  %v3208_v10 = vshll.u32 %v3033_v41, 16  ;;  %v3550_v45 = vld [vmem:[#allocation2 + $0x38] sm:$0x1] }
 0x2c0   : > { %v7010_v60 = vpop.f32.mrf.mxu2  ;;  %v2844_v5 = vor.u32 %v2843_v51, %v2839_v61  ;;  %v3976_v51 = vld [vmem:[#allocation2 + $0x6c] sm:$0xf]  ;;  %v2931_v41 = vld [vmem:[#allocation2 + $0x70] sm:$0xf] }
 0x2c1   : > { %2875 = vrot.lane.b32.xlu1 %v2816_v53, %s5440_s12  ;;  %4361 = vrot.lane.b32.xlu0 %v4324_v39, %s5442_s13  ;;  %5087 = vst.msk [vmem:[%s6406_s8 + $0x10] sm:$0xff] %vm1316_vm12, %v7010_v60  ;;  %v4140_v53 = vor.u32 %v4139_v57, %v7007_v7  ;;  %v4253_v39 = vld [vmem:[#allocation2 + $0x60] sm:$0xe]  ;;  %v4145_v18 = vrot.slane %v4143_v31, 5  ;;  %v3647_v31 = vrot.slane %v3645_v25, 5 }
 0x2c2   : > { %2877 = vrot.lane.b32.xlu2 %v2826_v44, %s5440_s12  ;;  %v2828_v44 = vshrl.u32 %v2656_v46, 16  ;;  %v5117_v62 = vrot.slane %v4253_v39, 9  ;;  %v2845_v1 = vrot.slane %v2844_v5, 4 }
 0x2c3   : > { %v3900_v48 = vpop.permute.xlu1 %3899  ;;  %v2557_v27 = vpop.permute.xlu0 %2556  ;;  %v4141_v47 = vrot.slane %v4140_v53, 4 }
 0x2c4   : > { %3943 = vst.msk [vmem:[#allocation3 + $0x10] sm:$0xf] %vm782_vm5, %v3900_v48  ;;  %v6993_v29 = vpop.permute.xlu2 %3240  ;;  %v5211_v15 = vld [vmem:[#allocation3 + $0x10] sm:$0xf0] }
 0x2c5   : > { %2596 = vst.msk [vmem:[%s6406_s8 + $0x88] sm:$0xff] %vm2586_vm13, %v2557_v27  ;;  %v5054_v20 = vor.u32 %v5211_v15, %v5053_v21  ;;  %v4254_v21 = vld [vmem:[#allocation2 + $0x64] sm:$0xf]  ;;  %v3548_v27 = vld [vmem:[#allocation2 + $0x30] sm:$0xf]  ;;  %v4146_v63 = vsel %vm5588_vm4, %v4141_v47, %v4145_v18 }
 0x2c6   : > { %3776 = vst.msk [vmem:[#allocation3 + $0x14] sm:$0xf] %vm443_vm0, %v3634_v49  ;;  %v4327_v48 = vrot.slane %v4254_v21, 5  ;;  %v2830_v49 = vrot.slane %v2828_v44, 4  ;;  %v3636_v35 = vshrl.u32 %v3548_v27, 16  ;;  %v3639_v28 = vshll.u32 %v3548_v27, 16 }
 0x2c7   : > { %5081 = vmatmul.msk.bf16.gmra.mxu2 %vm1242_vm11, %v5054_v20  ;;  %3944 = vst.msk [vmem:[#allocation3 + $0x14] sm:$0xf] %vm782_vm5, %v6925_v26  ;;  %v3881_v26 = vrot.slane %v3879_v30, 4  ;;  %v3034_v44 = vld [vmem:[#allocation2 + $0x70] sm:$0xf] }
 0x2c8   : > { %v7031_v50 = vpop.f32.mrf.mxu2  ;;  %v4328_v30 = vsel %vm5819_vm8, %v5117_v62, %v4327_v48  ;;  %v2834_v3 = vor.u32 %v2833_v36, %v2830_v49  ;;  %v3638_v57 = vrot.slane %v3636_v35, 4  ;;  %v3218_v52 = vshrl.u32 %v3034_v44, 16  ;;  %v3035_v36 = vld [vmem:[#allocation2 + $0x74] sm:$0x1] }
 0x2c9   : > { %2974 = vrot.lane.b32.xlu1 %v2929_v55, %s7492_s11  ;;  %2972 = vrot.lane.b32.xlu0 %v2928_v38, %s7492_s11  ;;  %v3883_v42 = vsel %vm5819_vm8, %v3881_v26, %v3882_v33  ;;  %v2658_v38 = vld [vmem:[#allocation2 + $0x68] sm:$0x1]  ;;  %5088 = vst.msk [vmem:[%s6406_s8 + $0x18] sm:$0xff] %vm1316_vm12, %v7031_v50  ;;  %v3641_v26 = vrot.slane %v3639_v28, 5  ;;  %v3214_v62 = vshll.u32 %v3034_v44, 16  ;;  %v3224_v5 = vshll.u32 %v3035_v36, 16 }
 0x2ca   : > { %3252 = vrot.lane.b32.xlu2 %v3193_v14, %s5442_s13  ;;  %v2847_v14 = vshll.u32 %v2658_v38, 16  ;;  %v2835_v0 = vrot.slane %v2834_v3, 4  ;;  %v3220_v49 = vrot.slane %v3218_v52, 4  ;;  %v3977_v38 = vld [vmem:[#allocation2 + $0x70] sm:$0xf] }
 0x2cb   : > { %v4182_v9 = vpop.permute.xlu1 %4181  ;;  %v4180_v6 = vpop.permute.xlu0 %4179  ;;  %v3642_v21 = vor.u32 %v3641_v26, %v3638_v57  ;;  %v3808_v3 = vld [vmem:[#allocation2 + $0x60] sm:$0xe]  ;;  %v4157_v25 = vshll.u32 %v3977_v38, 16  ;;  %v4151_v57 = vshll.u32 %v3976_v51, 16  ;;  %v3978_v44 = vld [vmem:[#allocation2 + $0x74] sm:$0x1] }
 0x2cc   : > { %4224 = vst.msk [vmem:[#allocation3 + $0x14] sm:$0xf] %vm880_vm9, %v4182_v9  ;;  %v7016_v12 = vpop.permute.xlu2 %3905  ;;  %v2849_v9 = vrot.slane %v2847_v14, 5  ;;  %v2840_v37 = vsel %vm5588_vm4, %v2835_v0, %v2839_v61  ;;  %v3810_v0 = vld [vmem:[#allocation2 + $0x68] sm:$0x1] }
 0x2cd   : > { %4223 = vst.msk [vmem:[#allocation3 + $0x10] sm:$0xf] %vm880_vm9, %v4180_v6  ;;  %v4329_v6 = vrot.slane %v4327_v48, 4  ;;  %v3643_v48 = vrot.slane %v3642_v21, 4 }
 0x2ce   : > { %4391 = vst.msk [vmem:[#allocation3 + $0x10] sm:$0xf] %vm1161_vm10, %v6947_v23  ;;  %v4131_v23 = vrot.slane %v4130_v19, 4  ;;  %v3651_v19 = vrot.slane %v3649_v16, 4  ;;  %v2850_v47 = vsel %vm5588_vm4, %v2845_v1, %v2849_v9 }
 0x2cf   : > { %v3648_v24 = vsel %vm5588_vm4, %v3643_v48, %v3647_v31 }
 0x2d0   : > { %v4136_v40 = vsel %vm5588_vm4, %v4131_v23, %v7007_v7  ;;  %v4330_v7 = vrot.slane %v4255_v4, 5  ;;  %v3652_v27 = vor.u32 %v3651_v19, %v3647_v31  ;;  %v3655_v23 = vshll.u32 %v3550_v45, 16 }
 0x2d1   : > { %3915 = vrot.lane.b32.xlu1 %v3880_v11, %s5440_s12  ;;  %3254 = vrot.lane.b32.xlu0 %v3203_v8, %s5442_s13  ;;  %v3207_v11 = vrot.slane %v3205_v43, 4  ;;  %v3210_v8 = vrot.slane %v3208_v10, 5  ;;  %v4161_v43 = vshrl.u32 %v3977_v38, 16  ;;  %v4148_v10 = vshrl.u32 %v3976_v51, 16 }
 0x2d2   : > { %3917 = vrot.lane.b32.xlu2 %v3883_v42, %s5440_s12  ;;  %v4331_v42 = vsel %vm5819_vm8, %v4329_v6, %v4330_v7  ;;  %v3653_v35 = vrot.slane %v3652_v27, 4  ;;  %v5110_v6 = vrot.slane %v3808_v3, 9  ;;  %v3889_v19 = vrot.slane %v3810_v0, 5  ;;  %v4257_v27 = vld [vmem:[#allocation2 + $0x70] sm:$0xf] }
 0x2d3   : > { %v2864_v15 = vpop.permute.xlu1 %2863  ;;  %v4350_v55 = vpop.permute.xlu0 %4349  ;;  %v3211_v18 = vor.u32 %v3210_v8, %v3207_v11  ;;  %v4163_v1 = vrot.slane %v4161_v43, 4  ;;  %v4150_v31 = vrot.slane %v4148_v10, 4  ;;  %v4153_v11 = vrot.slane %v4151_v57, 5 }
 0x2d4   : > { %2905 = vst.msk [vmem:[#allocation3 + $0x18] sm:$0xf] %vm782_vm5, %v2864_v15  ;;  %v7037_v20 = vpop.permute.xlu2 %4351  ;;  %v4334_v38 = vrot.slane %v4257_v27, 5  ;;  %v3430_v27 = vsel %vm1316_vm12, %v7010_v60, 0.0 }
 0x2d5   : > { %4392 = vst.msk [vmem:[#allocation3 + $0x14] sm:$0xf] %vm1161_vm10, %v4350_v55  ;;  %v3212_v55 = vrot.slane %v3211_v18, 4  ;;  %v4167_v18 = vshll.u32 %v3978_v44, 16 }
 0x2d7   : > { %v4169_v36 = vrot.slane %v4167_v18, 5 }
 0x2d9   : > { %4197 = vrot.lane.b32.xlu1 %v4146_v63, %s7492_s11  ;;  %4195 = vrot.lane.b32.xlu0 %v4136_v40, %s7492_s11  ;;  %v3809_v63 = vld [vmem:[#allocation2 + $0x64] sm:$0xf]  ;;  %v3657_v40 = vrot.slane %v3655_v23, 5  ;;  %v3551_v23 = vld [vmem:[#allocation2 + $0x3c] sm:$0xf] }
 0x2da   : > { %4363 = vrot.lane.b32.xlu2 %v4328_v30, %s5442_s13  ;;  %v2930_v30 = vld [vmem:[#allocation2 + $0x6c] sm:$0xf]  ;;  %v3886_v16 = vrot.slane %v3809_v63, 5  ;;  %v3552_v63 = vld [vmem:[#allocation2 + $0x40] sm:$0xf] }
 0x2db   : > { %v2963_v33 = vpop.permute.xlu1 %2962  ;;  %v2961_v46 = vpop.permute.xlu0 %2960  ;;  %v3658_v9 = vsel %vm5588_vm4, %v3653_v35, %v3657_v40  ;;  %v4258_v40 = vld [vmem:[#allocation2 + $0x74] sm:$0x1] }
 0x2dc   : > { %3003 = vst.msk [vmem:[#allocation3 + $0x1c] sm:$0xf] %vm880_vm9, %v2963_v33  ;;  %v2870_v53 = vpop.permute.xlu2 %2869  ;;  %v5220_v39 = vld [vmem:[#allocation3 + $0x10] sm:$0xff]  ;;  %v3226_v33 = vrot.slane %v3224_v5, 5  ;;  %v3888_v21 = vrot.slane %v3886_v16, 4  ;;  %v3669_v5 = vshll.u32 %v3552_v63, 16 }
 0x2dd   : > { %2908 = vst.msk [vmem:[#allocation3 + $0x24] sm:$0xf] %vm782_vm5, %v2870_v53  ;;  %5159 = vmatmul.msk.bf16.gmra.mxu3 %vm1242_vm11, %v5220_v39  ;;  %v4337_v43 = vrot.slane %v4258_v40, 5 }
 0x2de   : > { %3002 = vst.msk [vmem:[#allocation3 + $0x18] sm:$0xf] %vm880_vm9, %v2961_v46  ;;  %v4159_v46 = vrot.slane %v4157_v25, 5  ;;  %v3890_v48 = vsel %vm5819_vm8, %v3888_v21, %v3889_v19  ;;  %v4336_v25 = vrot.slane %v4334_v38, 4  ;;  %v7129_v19 = vpop.f32.mrf.mxu3 }
 0x2df   : > { %3282 = vst.msk [vmem:[#allocation3 + $0x18] sm:$0xf] %vm1161_vm10, %v6993_v29  ;;  %v3216_v29 = vrot.slane %v3214_v62, 5  ;;  %v4154_v62 = vor.u32 %v4153_v11, %v4150_v31 }
 0x2e1   : > { %2879 = vrot.lane.b32.xlu1 %v2840_v37, %s5440_s12  ;;  %4365 = vrot.lane.b32.xlu0 %v4331_v42, %s5442_s13  ;;  %v3221_v14 = vor.u32 %v3220_v49, %v3216_v29  ;;  %v3217_v26 = vsel %vm5588_vm4, %v3212_v55, %v3216_v29  ;;  %v3887_v42 = vsel %vm5819_vm8, %v5110_v6, %v3886_v16 }
 0x2e2   : > { %2881 = vrot.lane.b32.xlu2 %v2850_v47, %s5440_s12  ;;  %v4164_v47 = vor.u32 %v4163_v1, %v4159_v46 }
 0x2e3   : > { %v3904_v61 = vpop.permute.xlu1 %3903  ;;  %v3243_v15 = vpop.permute.xlu0 %3242  ;;  %v3222_v7 = vrot.slane %v3221_v14, 4 }
 0x2e4   : > { %v7067_v28 = vpop.permute.xlu2 %3244  ;;  %3283 = vst.msk [vmem:[#allocation3 + $0x1c] sm:$0xf] %vm1161_vm10, %v3243_v15  ;;  %v4165_v49 = vrot.slane %v4164_v47, 4 }
 0x2e5   : > { %v3227_v45 = vsel %vm5588_vm4, %v3222_v7, %v3226_v33  ;;  %v4338_v7 = vsel %vm5819_vm8, %v4336_v25, %v4337_v43  ;;  %v3553_v33 = vld [vmem:[#allocation2 + $0x44] sm:$0x1]  ;;  %v3556_v25 = vld [vmem:[#allocation2 + $0x50] sm:$0x1] }
 0x2e6   : > { %v5057_v4 = vld [vmem:[#allocation3 + $0x18] sm:$0xf]  ;;  %v4170_v35 = vsel %vm5588_vm4, %v4165_v49, %v4169_v36  ;;  %v3679_v31 = vshll.u32 %v3553_v33, 16 }
 0x2e7   : > { %3777 = vst.msk [vmem:[#allocation3 + $0x18] sm:$0xf] %vm443_vm0, %v3648_v24  ;;  %v3663_v24 = vshll.u32 %v3551_v23, 16 }
 0x2e8   : > { %3945 = vst.msk [vmem:[#allocation3 + $0x18] sm:$0xf] %vm782_vm5, %v3904_v61  ;;  %v4155_v61 = vrot.slane %v4154_v62, 4 }
 0x2e9   : > { %2978 = vrot.lane.b32.xlu1 %v2931_v41, %s7492_s11  ;;  %2976 = vrot.lane.b32.xlu0 %v2930_v30, %s7492_s11  ;;  %v3665_v14 = vrot.slane %v3663_v24, 5 }
 0x2ea   : > { %3256 = vrot.lane.b32.xlu2 %v3217_v26, %s5442_s13  ;;  %v4160_v41 = vsel %vm5588_vm4, %v4155_v61, %v4159_v46 }
 0x2eb   : > { %v4186_v8 = vpop.permute.xlu1 %4185  ;;  %v5212_v53 = vld [vmem:[#allocation3 + $0x18] sm:$0xf0]  ;;  %v4184_v39 = vpop.permute.xlu0 %4183 }
 0x2ec   : > { %3778 = vst.msk [vmem:[#allocation3 + $0x1c] sm:$0xf] %vm443_vm0, %v3658_v9  ;;  %v7080_v52 = vpop.permute.xlu2 %3909  ;;  %v5058_v37 = vor.u32 %v5212_v53, %v5057_v4  ;;  %v3673_v4 = vshrl.u32 %v3552_v63, 16  ;;  %v3671_v9 = vrot.slane %v3669_v5, 5 }
 0x2ed   : > { %3946 = vst.msk [vmem:[#allocation3 + $0x1c] sm:$0xf] %vm782_vm5, %v7016_v12  ;;  %v4256_v12 = vld [vmem:[#allocation2 + $0x6c] sm:$0xe] }
 0x2ee   : > { %4226 = vst.msk [vmem:[#allocation3 + $0x1c] sm:$0xf] %vm880_vm9, %v4186_v8  ;;  %5082 = vmatmul.msk.bf16.gmra.mxu2 %vm1242_vm11, %v5058_v37  ;;  %v5118_v29 = vrot.slane %v4256_v12, 9  ;;  %v3675_v6 = vrot.slane %v3673_v4, 4  ;;  %v3469_v12 = vmul.f32 %v7031_v50, %v7031_v50 }
 0x2ef   : > { %4225 = vst.msk [vmem:[#allocation3 + $0x18] sm:$0xf] %vm880_vm9, %v4184_v39  ;;  %v3681_v39 = vrot.slane %v3679_v31, 5 }
 0x2f0   : > { %4393 = vst.msk [vmem:[#allocation3 + $0x18] sm:$0xf] %vm1161_vm10, %v7037_v20  ;;  %v3660_v20 = vshrl.u32 %v3551_v23, 16  ;;  %v4335_v30 = vsel %vm5819_vm8, %v5118_v29, %v4334_v38  ;;  %v3676_v1 = vor.u32 %v3675_v6, %v3671_v9  ;;  %v3431_v23 = vsel %vm1316_vm12, %v7031_v50, 0.0 }
 0x2f1   : > { %3919 = vrot.lane.b32.xlu1 %v3887_v42, %s5440_s12  ;;  %3258 = vrot.lane.b32.xlu0 %v3227_v45, %s5442_s13  ;;  %v3432_v38 = vadd.f32 %v3431_v23, %v3430_v27 }
 0x2f2   : > { %3921 = vrot.lane.b32.xlu2 %v3890_v48, %s5440_s12  ;;  %v3662_v3 = vrot.slane %v3660_v20, 4  ;;  %v3468_v48 = vmul.f32 %v7010_v60, %v7010_v60  ;;  %s5187_s12 = sshll.u32 %s5426_s25, 1 }
 0x2f3   : > { %v2868_v15 = vpop.permute.xlu1 %2867  ;;  %v4354_v55 = vpop.permute.xlu0 %4353 }
 0x2f4   : > { %2907 = vst.msk [vmem:[#allocation3 + $0x20] sm:$0xf] %vm782_vm5, %v2868_v15  ;;  %v7099_v51 = vpop.permute.xlu2 %4355  ;;  %v3666_v0 = vor.u32 %v3665_v14, %v3662_v3  ;;  %v3484_v61 = vsel %vm1316_vm12, %v3468_v48, 0.0  ;;  %v3485_v15 = vsel %vm1316_vm12, %v3469_v12, 0.0 }
 0x2f5   : > { %4394 = vst.msk [vmem:[#allocation3 + $0x1c] sm:$0xf] %vm1161_vm10, %v4354_v55 }
 0x2f6   : > { %v3667_v46 = vrot.slane %v3666_v0, 4 }
 0x2f8   : > { %v3672_v54 = vsel %vm5588_vm4, %v3667_v46, %v3671_v9 }
 0x2f9   : > { %4201 = vrot.lane.b32.xlu1 %v4170_v35, %s7492_s11  ;;  %4199 = vrot.lane.b32.xlu0 %v4160_v41, %s7492_s11  ;;  %v3486_v41 = vadd.f32 %v3485_v15, %v3484_v61  ;;  %v3558_v15 = vld [vmem:[#allocation2 + $0x58] sm:$0xf] }
 0x2fa   : > { %4367 = vrot.lane.b32.xlu2 %v4335_v30, %s5442_s13 }
 0x2fb   : > { %v2967_v10 = vpop.permute.xlu1 %2966  ;;  %v2965_v57 = vpop.permute.xlu0 %2964 }
 0x2fc   : > { %3005 = vst.msk [vmem:[#allocation3 + $0x24] sm:$0xf] %vm880_vm9, %v2967_v10  ;;  %v2874_v26 = vpop.permute.xlu2 %2873  ;;  %v5221_v16 = vld [vmem:[#allocation3 + $0x18] sm:$0xff] }
 0x2fd   : > { %2910 = vst.msk [vmem:[#allocation3 + $0x2c] sm:$0xf] %vm782_vm5, %v2874_v26  ;;  %5160 = vmatmul.msk.bf16.gmra.mxu3 %vm1242_vm11, %v5221_v16 }
 0x2fe   : > { %3004 = vst.msk [vmem:[#allocation3 + $0x20] sm:$0xf] %vm880_vm9, %v2965_v57  ;;  %v3703_v57 = vshll.u32 %v3556_v25, 16  ;;  %v3559_v25 = vld [vmem:[#allocation2 + $0x5c] sm:$0x1] }
 0x2ff   : > { %3284 = vst.msk [vmem:[#allocation3 + $0x20] sm:$0xf] %vm1161_vm10, %v7067_v28  ;;  %v3677_v28 = vrot.slane %v3676_v1, 4 }
 0x301   : > { %4369 = vrot.lane.b32.xlu0 %v4338_v7, %s5442_s13  ;;  %2558 = vrot.lane.b32.xlu1 %v6709_v22, %s7492_s11  ;;  %v3682_v22 = vsel %vm5588_vm4, %v3677_v28, %v3681_v39  ;;  %s4752_s13 = sadd.s32 %s5422_s24, %s5187_s12 }
 0x302   : > { %2560 = vrot.lane.b32.xlu2 %v6722_v56, %s7492_s11  ;;  %s5188_s16 = sshll.u32 %s4752_s13, 1  ;;  %s4722_s13 = scalar_lea.sflag [#allocation7], %s6400_s28 }
 0x303   : > { %v3908_v11 = vpop.permute.xlu1 %3907  ;;  %v3247_v8 = vpop.permute.xlu0 %3246  ;;  %s4754_s19 = scalar_lea.hbm %s7491_s6, %s5188_s16 }
 0x304   : > { %v7126_v53 = vpop.permute.xlu2 %3248  ;;  %3285 = vst.msk [vmem:[#allocation3 + $0x24] sm:$0xf] %vm1161_vm10, %v3247_v8  ;;  %s4758_s12 = sshll.u32 %s4754_s19, 4  ;;  %s5332_s19 = scalar_lea.hbm %s7491_s6, 8  ;;  %s4759_s12 = int_to_ptr.hbm [resolvable:$true] %s4758_s12 }
 0x305   : > { %s5326_s16 = sshra.s32 %s4759_s12, 4  ;;  %s5327_s16 = int_to_ptr.hbm [resolvable:$true] %s5326_s16 }
 0x306   : > { %v5061_v21 = vld [vmem:[#allocation3 + $0x20] sm:$0xf]  ;;  %s5328_s17 = scalar_lea.hbm %s5327_s16, 2  ;;  %p5333_p6 = scmp.lt.s32.totalorder %s5327_s16, %s7491_s6 }
 0x307   : > { %3779 = vst.msk [vmem:[#allocation3 + $0x20] sm:$0xf] %vm443_vm0, %v3672_v54  ;;  %p5329_p2 = scmp.ne.s32.totalorder %s5327_s16, %s5328_s17  ;;  %p5334_p7 = scmp.lt.s32.totalorder %s5332_s19, %s5328_s17 }
 0x308   : > { %3947 = vst.msk [vmem:[#allocation3 + $0x20] sm:$0xf] %vm782_vm5, %v3908_v11  ;;  %v3705_v11 = vrot.slane %v3703_v57, 5  ;;  %v3727_v57 = vshll.u32 %v3559_v25, 16 }
 0x309   : > { %2562 = vrot.lane.b32.xlu0 %v6731_v2, %s7492_s11  ;;  %2564 = vrot.lane.b32.xlu1 %v6749_v58, %s7492_s11  ;;  %v7151_v2 = vpop.f32.mrf.mxu3  ;;  %v3554_v58 = vld [vmem:[#allocation2 + $0x48] sm:$0xf]  ;;  %p5330_p4 = pnand %p5329_p2, %p5530_p3  ;;  %p5335_p9 = por %p5334_p7, %p5333_p6 }
 0x30a   : > { %2566 = vrot.lane.b32.xlu2 %v6784_v13, %s7492_s11  ;;  %v3684_v18 = vshrl.u32 %v3554_v58, 16  ;;  %v3687_v62 = vshll.u32 %v3554_v58, 16  ;;  %v4542_v58 = vsel %vm1316_vm12, %v7151_v2, 0.0 }
 0x30b   : > { %v4190_v56 = vpop.permute.xlu1 %4189  ;;  %v5213_v44 = vld [vmem:[#allocation3 + $0x20] sm:$0xf0]  ;;  %v4188_v37 = vpop.permute.xlu0 %4187  ;;  %p5331_p5 = pneg %p5330_p4 }
 0x30c   : > { %3780 = vst.msk [vmem:[#allocation3 + $0x24] sm:$0xf] %vm443_vm0, %v3682_v22  ;;  %v7142_v42 = vpop.permute.xlu2 %3913  ;;  %v5062_v45 = vor.u32 %v5213_v44, %v5061_v21  ;;  %v3686_v49 = vrot.slane %v3684_v18, 4  ;;  %v3689_v36 = vrot.slane %v3687_v62, 5  ;;  %v4579_v22 = vmul.f32 %v7129_v19, %v7129_v19  ;;  %v3557_v62 = vld [vmem:[#allocation2 + $0x54] sm:$0xf] }
 0x30d   : > { %3948 = vst.msk [vmem:[#allocation3 + $0x24] sm:$0xf] %vm782_vm5, %v7080_v52  ;;  %v3711_v61 = vshll.u32 %v3557_v62, 16  ;;  %p5336_p10 = pnand %p5335_p9, %p5331_p5 }
 0x30e   : > { %4228 = vst.msk [vmem:[#allocation3 + $0x24] sm:$0xf] %vm880_vm9, %v4190_v56  ;;  %5083 = vmatmul.msk.bf16.gmra.mxu2 %vm1242_vm11, %v5062_v45  ;;  %v3690_v40 = vor.u32 %v3689_v36, %v3686_v49  ;;  %v4580_v56 = vmul.f32 %v7151_v2, %v7151_v2  ;;  %v4541_v45 = vsel %vm1316_vm12, %v7129_v19, 0.0  ;;  %v3708_v36 = vshrl.u32 %v3557_v62, 16 }
 0x30f   : > { %4227 = vst.msk [vmem:[#allocation3 + $0x20] sm:$0xf] %vm880_vm9, %v4188_v37 }
 0x310   : > { %4395 = vst.msk [vmem:[#allocation3 + $0x20] sm:$0xf] %vm1161_vm10, %v7099_v51  ;;  %v3691_v43 = vrot.slane %v3690_v40, 4 }
 0x311   : > { %4649 = vrot.lane.b32.xlu1 %v7129_v19, %s7492_s11  ;;  %2568 = vrot.lane.b32.xlu0 %v6813_v59, %s7492_s11  ;;  %v3555_v59 = vld [vmem:[#allocation2 + $0x4c] sm:$0xf] }
 0x312   : > { %4651 = vrot.lane.b32.xlu2 %v7151_v2, %s7492_s11  ;;  %v3693_v55 = vshll.u32 %v3555_v59, 16  ;;  %v3697_v29 = vshrl.u32 %v3555_v59, 16 }
 0x313   : > { %v2872_v13 = vpop.permute.xlu1 %2871  ;;  %v4358_v52 = vpop.permute.xlu0 %4357 }
 0x314   : > { %2909 = vst.msk [vmem:[#allocation3 + $0x28] sm:$0xf] %vm782_vm5, %v2872_v13  ;;  %v7160_v47 = vpop.permute.xlu2 %4359  ;;  %v3695_v14 = vrot.slane %v3693_v55, 5  ;;  %v3699_v5 = vrot.slane %v3697_v29, 4  ;;  %v4595_v13 = vsel %vm1316_vm12, %v4579_v22, 0.0  ;;  %v3710_v55 = vrot.slane %v3708_v36, 4 }
 0x315   : > { %4396 = vst.msk [vmem:[#allocation3 + $0x24] sm:$0xf] %vm1161_vm10, %v4358_v52  ;;  %v4596_v52 = vsel %vm1316_vm12, %v4580_v56, 0.0  ;;  %v3713_v29 = vrot.slane %v3711_v61, 5 }
 0x316   : > { %v3700_v10 = vor.u32 %v3699_v5, %v3695_v14  ;;  %v3696_v33 = vsel %vm5588_vm4, %v3691_v43, %v3695_v14  ;;  %v4597_v2 = vadd.f32 %v4596_v52, %v4595_v13 }
 0x318   : > { %v3701_v31 = vrot.slane %v3700_v10, 4 }
 0x31a   : > { %v3395_v51 = vpop.f32.mrf.mxu2 }
 0x31b   : > { %v3433_v20 = vsel %vm1316_vm12, %v3395_v51, 0.0  ;;  %v3470_v24 = vmul.f32 %v3395_v51, %v3395_v51  ;;  %5089 = vst.msk [vmem:[%s6406_s8 + $0x30] sm:$0xff] %vm1316_vm12, %v3395_v51  ;;  %v2971_v35 = vpop.permute.xlu1 %2970  ;;  %v2969_v60 = vpop.permute.xlu0 %2968  ;;  %v3717_v51 = vshll.u32 %v3558_v15, 16 }
 0x31c   : > { %v3434_v63 = vadd.f32 %v3433_v20, %v3432_v38  ;;  %3007 = vst.msk [vmem:[#allocation3 + $0x2c] sm:$0xf] %vm880_vm9, %v2971_v35  ;;  %v2878_v50 = vpop.permute.xlu2 %2877  ;;  %v5222_v30 = vld [vmem:[#allocation3 + $0x20] sm:$0xff]  ;;  %v3721_v20 = vshrl.u32 %v3558_v15, 16 }
 0x31d   : > { %v3487_v3 = vsel %vm1316_vm12, %v3470_v24, 0.0  ;;  %2912 = vst.msk [vmem:[#allocation3 + $0x34] sm:$0xf] %vm782_vm5, %v2878_v50  ;;  %5161 = vmatmul.msk.bf16.gmra.mxu3 %vm1242_vm11, %v5222_v30  ;;  %v3719_v5 = vrot.slane %v3717_v51, 5  ;;  %v3562_v51 = vld [vmem:[#allocation2 + $0x68] sm:$0x1] }
 0x31e   : > { %v3488_v4 = vadd.f32 %v3487_v3, %v3486_v41  ;;  %3006 = vst.msk [vmem:[#allocation3 + $0x28] sm:$0xf] %vm880_vm9, %v2969_v60  ;;  %v3714_v3 = vor.u32 %v3713_v29, %v3710_v55 }
 0x31f   : > { %3286 = vst.msk [vmem:[#allocation3 + $0x28] sm:$0xf] %vm1161_vm10, %v7126_v53  ;;  %v3706_v53 = vsel %vm5588_vm4, %v3701_v31, %v3705_v11 }
 0x320   : > { %v3715_v43 = vrot.slane %v3714_v3, 4 }
 0x322   : > { %v3397_v26 = vpop.f32.mrf.mxu2 }
 0x323   : > { %v3435_v16 = vsel %vm1316_vm12, %v3397_v26, 0.0  ;;  %v3471_v0 = vmul.f32 %v3397_v26, %v3397_v26  ;;  %5090 = vst.msk [vmem:[%s6406_s8 + $0x38] sm:$0xff] %vm1316_vm12, %v3397_v26  ;;  %v3912_v9 = vpop.permute.xlu1 %3911  ;;  %v3251_v6 = vpop.permute.xlu0 %3250 }
 0x324   : > { %v7186_v7 = vadd.f32 %v3435_v16, %v3434_v63  ;;  %v7190_v46 = vpop.permute.xlu2 %3252  ;;  %3287 = vst.msk [vmem:[#allocation3 + $0x2c] sm:$0xf] %vm1161_vm10, %v3251_v6 }
 0x325   : > { %v3489_v1 = vsel %vm1316_vm12, %v3471_v0, 0.0  ;;  %v3720_v0 = vsel %vm5588_vm4, %v3715_v43, %v3719_v5 }
 0x326   : > { %v7194_v8 = vadd.f32 %v3489_v1, %v3488_v4  ;;  %v5065_v54 = vld [vmem:[#allocation3 + $0x28] sm:$0xf]  ;;  %v3723_v4 = vrot.slane %v3721_v20, 4 }
 0x327   : > { %3781 = vst.msk [vmem:[#allocation3 + $0x28] sm:$0xf] %vm443_vm0, %v3696_v33  ;;  %v3729_v33 = vrot.slane %v3727_v57, 5 }
 0x328   : > { %3949 = vst.msk [vmem:[#allocation3 + $0x28] sm:$0xf] %vm782_vm5, %v3912_v9  ;;  %v3724_v10 = vor.u32 %v3723_v4, %v3719_v5 }
 0x32a   : > { %v3725_v6 = vrot.slane %v3724_v10, 4 }
 0x32b   : > { %v4194_v28 = vpop.permute.xlu1 %4193  ;;  %v5214_v39 = vld [vmem:[#allocation3 + $0x28] sm:$0xf0]  ;;  %v4192_v21 = vpop.permute.xlu0 %4191 }
 0x32c   : > { %3782 = vst.msk [vmem:[#allocation3 + $0x2c] sm:$0xf] %vm443_vm0, %v3706_v53  ;;  %v7205_v44 = vpop.permute.xlu2 %3917  ;;  %v5066_v37 = vor.u32 %v5214_v39, %v5065_v54 }
 0x32d   : > { %3950 = vst.msk [vmem:[#allocation3 + $0x2c] sm:$0xf] %vm782_vm5, %v7142_v42  ;;  %v4543_v42 = vadd.f32 %v4542_v58, %v4541_v45 }
 0x32e   : > { %4230 = vst.msk [vmem:[#allocation3 + $0x2c] sm:$0xf] %vm880_vm9, %v4194_v28  ;;  %5084 = vmatmul.msk.bf16.gmra.mxu2 %vm1242_vm11, %v5066_v37 }
 0x32f   : > { %4229 = vst.msk [vmem:[#allocation3 + $0x28] sm:$0xf] %vm880_vm9, %v4192_v21 }
 0x330   : > { %4397 = vst.msk [vmem:[#allocation3 + $0x28] sm:$0xf] %vm1161_vm10, %v7160_v47  ;;  %v4506_v18 = vpop.f32.mrf.mxu3 }
 0x331   : > { %v4544_v19 = vsel %vm1316_vm12, %v4506_v18, 0.0  ;;  %v4581_v48 = vmul.f32 %v4506_v18, %v4506_v18  ;;  %4653 = vrot.lane.b32.xlu0 %v4506_v18, %s7492_s11 }
 0x332   : > { %v4545_v12 = vadd.f32 %v4544_v19, %v4543_v42 }
 0x333   : > { %v2876_v59 = vpop.permute.xlu1 %2875  ;;  %v4362_v27 = vpop.permute.xlu0 %4361  ;;  %v4598_v23 = vsel %vm1316_vm12, %v4581_v48, 0.0 }
 0x334   : > { %2911 = vst.msk [vmem:[#allocation3 + $0x30] sm:$0xf] %vm782_vm5, %v2876_v59  ;;  %v4364_v49 = vpop.permute.xlu2 %4363  ;;  %v4599_v47 = vadd.f32 %v4598_v23, %v4597_v2 }
 0x335   : > { %4398 = vst.msk [vmem:[#allocation3 + $0x2c] sm:$0xf] %vm1161_vm10, %v4362_v27 }
 0x338   : > { %v4508_v38 = vpop.f32.mrf.mxu3 }
 0x339   : > { %v4546_v24 = vsel %vm1316_vm12, %v4508_v38, 0.0  ;;  %v4582_v35 = vmul.f32 %v4508_v38, %v4508_v38  ;;  %4655 = vrot.lane.b32.xlu1 %v4508_v38, %s7492_s11 }
 0x33a   : > { %v7227_v60 = vadd.f32 %v4546_v24, %v4545_v12  ;;  %v3561_v12 = vld [vmem:[#allocation2 + $0x64] sm:$0xf] }
 0x33b   : > { %v2975_v41 = vpop.permute.xlu1 %2974  ;;  %v2973_v63 = vpop.permute.xlu0 %2972  ;;  %v4600_v50 = vsel %vm1316_vm12, %v4582_v35, 0.0  ;;  %v3741_v23 = vshll.u32 %v3561_v12, 16 }
 0x33c   : > { %3009 = vst.msk [vmem:[#allocation3 + $0x34] sm:$0xf] %vm880_vm9, %v2975_v41  ;;  %v2882_v30 = vpop.permute.xlu2 %2881  ;;  %v5223_v40 = vld [vmem:[#allocation3 + $0x28] sm:$0xff]  ;;  %v7231_v14 = vadd.f32 %v4600_v50, %v4599_v47  ;;  %v3751_v41 = vshll.u32 %v3562_v51, 16 }
 0x33d   : > { %2914 = vst.msk [vmem:[#allocation3 + $0x3c] sm:$0xf] %vm782_vm5, %v2882_v30  ;;  %5162 = vmatmul.msk.bf16.gmra.mxu3 %vm1242_vm11, %v5223_v40  ;;  %v3743_v29 = vrot.slane %v3741_v23, 5 }
 0x33e   : > { %3008 = vst.msk [vmem:[#allocation3 + $0x30] sm:$0xf] %vm880_vm9, %v2973_v63 }
 0x33f   : > { %3288 = vst.msk [vmem:[#allocation3 + $0x30] sm:$0xf] %vm1161_vm10, %v7190_v46  ;;  %v3730_v46 = vsel %vm5588_vm4, %v3725_v6, %v3729_v33 }
 0x343   : > { %v3916_v26 = vpop.permute.xlu1 %3915  ;;  %v3255_v16 = vpop.permute.xlu0 %3254 }
 0x344   : > { %v3257_v9 = vpop.permute.xlu2 %3256  ;;  %3289 = vst.msk [vmem:[#allocation3 + $0x34] sm:$0xf] %vm1161_vm10, %v3255_v16 }
 0x346   : > { %v5069_v1 = vld [vmem:[#allocation3 + $0x30] sm:$0xf] }
 0x347   : > { %3783 = vst.msk [vmem:[#allocation3 + $0x30] sm:$0xf] %vm443_vm0, %v3720_v0 }
 0x348   : > { %3951 = vst.msk [vmem:[#allocation3 + $0x30] sm:$0xf] %vm782_vm5, %v3916_v26  ;;  %v3753_v26 = vrot.slane %v3751_v41, 5 }
 0x34a   : > { %v3400_v31 = vpop.f32.mrf.mxu2 }
 0x34b   : > { %v3437_v11 = vsel %vm1316_vm12, %v3400_v31, 0.0  ;;  %v3472_v54 = vmul.f32 %v3400_v31, %v3400_v31  ;;  %5091 = vst.msk [vmem:[%s6406_s8 + $0x50] sm:$0xff] %vm1316_vm12, %v3400_v31  ;;  %v4198_v53 = vpop.permute.xlu1 %4197  ;;  %v5215_v28 = vld [vmem:[#allocation3 + $0x30] sm:$0xf0]  ;;  %v4196_v39 = vpop.permute.xlu0 %4195 }
 0x34c   : > { %v3438_v21 = vadd.f32 %v3437_v11, %v7186_v7  ;;  %3784 = vst.msk [vmem:[#allocation3 + $0x34] sm:$0xf] %vm443_vm0, %v3730_v46  ;;  %v7250_v22 = vpop.permute.xlu2 %3921  ;;  %v5070_v56 = vor.u32 %v5215_v28, %v5069_v1  ;;  %v3560_v7 = vld [vmem:[#allocation2 + $0x60] sm:$0xf] }
 0x34d   : > { %v3491_v37 = vsel %vm1316_vm12, %v3472_v54, 0.0  ;;  %3952 = vst.msk [vmem:[#allocation3 + $0x34] sm:$0xf] %vm782_vm5, %v7205_v44  ;;  %v3732_v44 = vshrl.u32 %v3560_v7, 16  ;;  %v3735_v62 = vshll.u32 %v3560_v7, 16 }
 0x34e   : > { %v3492_v45 = vadd.f32 %v3491_v37, %v7194_v8  ;;  %4232 = vst.msk [vmem:[#allocation3 + $0x34] sm:$0xf] %vm880_vm9, %v4198_v53  ;;  %5085 = vmatmul.msk.bf16.gmra.mxu2 %vm1242_vm11, %v5070_v56 }
 0x34f   : > { %4231 = vst.msk [vmem:[#allocation3 + $0x30] sm:$0xf] %vm880_vm9, %v4196_v39  ;;  %v3734_v59 = vrot.slane %v3732_v44, 4  ;;  %v3737_v27 = vrot.slane %v3735_v62, 5 }
 0x350   : > { %4399 = vst.msk [vmem:[#allocation3 + $0x30] sm:$0xf] %vm1161_vm10, %v4364_v49  ;;  %v3745_v49 = vshrl.u32 %v3561_v12, 16 }
 0x351   : > { %v3738_v47 = vor.u32 %v3737_v27, %v3734_v59 }
 0x352   : > { %v3402_v58 = vpop.f32.mrf.mxu2  ;;  %v3747_v38 = vrot.slane %v3745_v49, 4 }
 0x353   : > { %v3439_v13 = vsel %vm1316_vm12, %v3402_v58, 0.0  ;;  %v3473_v52 = vmul.f32 %v3402_v58, %v3402_v58  ;;  %5092 = vst.msk [vmem:[%s6406_s8 + $0x58] sm:$0xff] %vm1316_vm12, %v3402_v58  ;;  %v2880_v42 = vpop.permute.xlu1 %2879  ;;  %v4366_v18 = vpop.permute.xlu0 %4365  ;;  %v3739_v20 = vrot.slane %v3738_v47, 4 }
 0x354   : > { %v7263_v8 = vadd.f32 %v3439_v13, %v3438_v21  ;;  %2913 = vst.msk [vmem:[#allocation3 + $0x38] sm:$0xf] %vm782_vm5, %v2880_v42  ;;  %v4368_v19 = vpop.permute.xlu2 %4367  ;;  %v3748_v35 = vor.u32 %v3747_v38, %v3743_v29 }
 0x355   : > { %v3493_v48 = vsel %vm1316_vm12, %v3473_v52, 0.0  ;;  %4400 = vst.msk [vmem:[#allocation3 + $0x34] sm:$0xf] %vm1161_vm10, %v4366_v18  ;;  %v3744_v40 = vsel %vm5588_vm4, %v3739_v20, %v3743_v29 }
 0x356   : > { %v7268_v2 = vadd.f32 %v3493_v48, %v3492_v45  ;;  %v3749_v10 = vrot.slane %v3748_v35, 4 }
 0x358   : > { %v3754_v16 = vsel %vm5588_vm4, %v3749_v10, %v3753_v26 }
 0x35b   : > { %v2979_v36 = vpop.permute.xlu1 %2978  ;;  %v2977_v61 = vpop.permute.xlu0 %2976 }
 0x35c   : > { %3011 = vst.msk [vmem:[#allocation3 + $0x3c] sm:$0xf] %vm880_vm9, %v2979_v36  ;;  %v2561_v15 = vpop.permute.xlu2 %2560  ;;  %v5224_v55 = vld [vmem:[#allocation3 + $0x30] sm:$0xff] }
 0x35d   : > { %3010 = vst.msk [vmem:[#allocation3 + $0x38] sm:$0xf] %vm880_vm9, %v2977_v61  ;;  %5163 = vmatmul.msk.bf16.gmra.mxu3 %vm1242_vm11, %v5224_v55 }
 0x35e   : > { %3290 = vst.msk [vmem:[#allocation3 + $0x38] sm:$0xf] %vm1161_vm10, %v3257_v9 }
 0x35f   : > { %2598 = vst.msk [vmem:[%s6406_s8 + $0xa8] sm:$0xff] %vm2586_vm13, %v2561_v15 }
 0x360   : > { %v4511_v24 = vpop.f32.mrf.mxu3 }
 0x361   : > { %v4548_v63 = vsel %vm1316_vm12, %v4511_v24, 0.0  ;;  %v4583_v50 = vmul.f32 %v4511_v24, %v4511_v24  ;;  %4657 = vrot.lane.b32.xlu2 %v4511_v24, %s7492_s11 }
 0x362   : > { %v4549_v30 = vadd.f32 %v4548_v63, %v7227_v60 }
 0x363   : > { %v3920_v3 = vpop.permute.xlu1 %3919  ;;  %v3259_v5 = vpop.permute.xlu0 %3258  ;;  %v4602_v4 = vsel %vm1316_vm12, %v4583_v50, 0.0 }
 0x364   : > { %3291 = vst.msk [vmem:[#allocation3 + $0x3c] sm:$0xf] %vm1161_vm10, %v3259_v5  ;;  %v2567_v25 = vpop.permute.xlu2 %2566  ;;  %v4603_v43 = vadd.f32 %v4602_v4, %v7231_v14 }
 0x365   : > { %v5073_v57 = vld [vmem:[#allocation3 + $0x38] sm:$0xf]  ;;  %2601 = vst.msk [vmem:[%s6406_s8 + $0xe0] sm:$0xff] %vm2586_vm13, %v2567_v25 }
 0x366   : > { %3785 = vst.msk [vmem:[#allocation3 + $0x38] sm:$0xf] %vm443_vm0, %v3744_v40 }
 0x367   : > { %3953 = vst.msk [vmem:[#allocation3 + $0x38] sm:$0xf] %vm782_vm5, %v3920_v3 }
 0x368   : > { %v4513_v60 = vpop.f32.mrf.mxu3 }
 0x369   : > { %v4550_v0 = vsel %vm1316_vm12, %v4513_v60, 0.0  ;;  %v4584_v9 = vmul.f32 %v4513_v60, %v4513_v60  ;;  %4659 = vrot.lane.b32.xlu0 %v4513_v60, %s7492_s11 }
 0x36a   : > { %v4551_v14 = vadd.f32 %v4550_v0, %v4549_v30 }
 0x36b   : > { %v4202_v6 = vpop.permute.xlu1 %4201  ;;  %v5216_v33 = vld [vmem:[#allocation3 + $0x38] sm:$0xf0]  ;;  %v4200_v1 = vpop.permute.xlu0 %4199  ;;  %v4604_v46 = vsel %vm1316_vm12, %v4584_v9, 0.0 }
 0x36c   : > { %3786 = vst.msk [vmem:[#allocation3 + $0x3c] sm:$0xf] %vm443_vm0, %v3754_v16  ;;  %v5074_v31 = vor.u32 %v5216_v33, %v5073_v57  ;;  %v4605_v11 = vadd.f32 %v4604_v46, %v4603_v43  ;;  %v4652_v32 = vpop.permute.xlu2 %4651 }
 0x36d   : > { %3954 = vst.msk [vmem:[#allocation3 + $0x3c] sm:$0xf] %vm782_vm5, %v7250_v22 }
 0x36e   : > { %4234 = vst.msk [vmem:[#allocation3 + $0x3c] sm:$0xf] %vm880_vm9, %v4202_v6  ;;  %5086 = vmatmul.msk.bf16.gmra.mxu2 %vm1242_vm11, %v5074_v31 }
 0x36f   : > { %4233 = vst.msk [vmem:[#allocation3 + $0x38] sm:$0xf] %vm880_vm9, %v4200_v1 }
 0x370   : > { %4401 = vst.msk [vmem:[#allocation3 + $0x38] sm:$0xf] %vm1161_vm10, %v4368_v19 }
 0x371   : > { %5166 = vst.msk [vmem:[%s6406_s8 + $0x18] sm:$0xff] %vm2586_vm13, %v4652_v32  ;;  %v3405_v54 = vpop.f32.mrf.mxu2 }
 0x372   : > { %v3441_v53 = vsel %vm1316_vm12, %v3405_v54, 0.0  ;;  %v3474_v28 = vmul.f32 %v3405_v54, %v3405_v54  ;;  %5093 = vst.msk [vmem:[%s6406_s8 + $0x70] sm:$0xff] %vm1316_vm12, %v3405_v54 }
 0x373   : > { %v3442_v39 = vadd.f32 %v3441_v53, %v7263_v8  ;;  %v4370_v21 = vpop.permute.xlu0 %4369  ;;  %v2559_v22 = vpop.permute.xlu1 %2558 }
 0x374   : > { %v3495_v56 = vsel %vm1316_vm12, %v3474_v28, 0.0  ;;  %4402 = vst.msk [vmem:[#allocation3 + $0x3c] sm:$0xf] %vm1161_vm10, %v4370_v21 }
 0x375   : > { %v3496_v37 = vadd.f32 %v3495_v56, %v7268_v2  ;;  %2597 = vst.msk [vmem:[%s6406_s8 + $0xa0] sm:$0xff] %vm2586_vm13, %v2559_v22 }
 0x379   : > { %v3407_v45 = vpop.f32.mrf.mxu2 }
 0x37a   : > { %v3443_v7 = vsel %vm1316_vm12, %v3407_v45, 0.0  ;;  %v3475_v58 = vmul.f32 %v3407_v45, %v3407_v45  ;;  %5094 = vst.msk [vmem:[%s6406_s8 + $0x78] sm:$0xff] %vm1316_vm12, %v3407_v45 }
 0x37b   : > { %v3444_v13 = vadd.f32 %v3443_v7, %v3442_v39  ;;  %v2563_v52 = vpop.permute.xlu0 %2562  ;;  %v2565_v42 = vpop.permute.xlu1 %2564  ;;  %v5225_v18 = vld [vmem:[#allocation3 + $0x38] sm:$0xff] }
 0x37c   : > { %v3497_v44 = vsel %vm1316_vm12, %v3475_v58, 0.0  ;;  %2599 = vst.msk [vmem:[%s6406_s8 + $0xc0] sm:$0xff] %vm2586_vm13, %v2563_v52  ;;  %5164 = vmatmul.msk.bf16.gmra.mxu3 %vm1242_vm11, %v5225_v18 }
 0x37d   : > { %v3498_v62 = vadd.f32 %v3497_v44, %v3496_v37  ;;  %2600 = vst.msk [vmem:[%s6406_s8 + $0xc8] sm:$0xff] %vm2586_vm13, %v2565_v42 }
 0x380   : > { %v4516_v8 = vpop.f32.mrf.mxu3 }
 0x381   : > { %v4552_v19 = vsel %vm1316_vm12, %v4516_v8, 0.0  ;;  %v4585_v48 = vmul.f32 %v4516_v8, %v4516_v8  ;;  %4661 = vrot.lane.b32.xlu1 %v4516_v8, %s7492_s11 }
 0x382   : > { %v4553_v2 = vadd.f32 %v4552_v19, %v4551_v14 }
 0x383   : > { %v4650_v12 = vpop.permute.xlu1 %4649  ;;  %v2569_v59 = vpop.permute.xlu0 %2568  ;;  %v4606_v27 = vsel %vm1316_vm12, %v4585_v48, 0.0 }
 0x384   : > { %5165 = vst.msk [vmem:[%s6406_s8 + $0x10] sm:$0xff] %vm2586_vm13, %v4650_v12  ;;  %v4607_v23 = vadd.f32 %v4606_v27, %v4605_v11 }
 0x385   : > { %2602 = vst.msk [vmem:[%s6406_s8 + $0xe8] sm:$0xff] %vm2586_vm13, %v2569_v59 }
 0x388   : > { %v4518_v49 = vpop.f32.mrf.mxu3 }
 0x389   : > { %v4554_v36 = vsel %vm1316_vm12, %v4518_v49, 0.0  ;;  %v4586_v61 = vmul.f32 %v4518_v49, %v4518_v49  ;;  %4663 = vrot.lane.b32.xlu2 %v4518_v49, %s7492_s11 }
 0x38a   : > { %v4555_v47 = vadd.f32 %v4554_v36, %v4553_v2 }
 0x38b   : > { %v4608_v15 = vsel %vm1316_vm12, %v4586_v61, 0.0 }
 0x38c   : > { %v4609_v55 = vadd.f32 %v4608_v15, %v4607_v23 }
 0x391   : > { %v3410_v29 = vpop.f32.mrf.mxu2 }
 0x392   : > { %v3445_v38 = vsel %vm1316_vm12, %v3410_v29, 0.0  ;;  %v3476_v51 = vmul.f32 %v3410_v29, %v3410_v29  ;;  %5095 = vst.msk [vmem:[%s6406_s8 + $0x90] sm:$0xff] %vm1316_vm12, %v3410_v29 }
 0x393   : > { %v3446_v20 = vadd.f32 %v3445_v38, %v3444_v13 }
 0x394   : > { %v3499_v24 = vsel %vm1316_vm12, %v3476_v51, 0.0 }
 0x395   : > { %v3500_v35 = vadd.f32 %v3499_v24, %v3498_v62 }
 0x399   : > { %v3412_v41 = vpop.f32.mrf.mxu2 }
 0x39a   : > { %v3447_v63 = vsel %vm1316_vm12, %v3412_v41, 0.0  ;;  %v3477_v50 = vmul.f32 %v3412_v41, %v3412_v41  ;;  %5096 = vst.msk [vmem:[%s6406_s8 + $0x98] sm:$0xff] %vm1316_vm12, %v3412_v41 }
 0x39b   : > { %v3448_v30 = vadd.f32 %v3447_v63, %v3446_v20 }
 0x39c   : > { %v3501_v40 = vsel %vm1316_vm12, %v3477_v50, 0.0 }
 0x39d   : > { %v3502_v3 = vadd.f32 %v3501_v40, %v3500_v35 }
 0x3a0   : > { %v4521_v5 = vpop.f32.mrf.mxu3 }
 0x3a1   : > { %v4556_v4 = vsel %vm1316_vm12, %v4521_v5, 0.0  ;;  %v4587_v25 = vmul.f32 %v4521_v5, %v4521_v5  ;;  %4665 = vrot.lane.b32.xlu0 %v4521_v5, %s7492_s11 }
 0x3a2   : > { %v4557_v43 = vadd.f32 %v4556_v4, %v4555_v47 }
 0x3a3   : > { %v4610_v10 = vsel %vm1316_vm12, %v4587_v25, 0.0  ;;  %v4654_v57 = vpop.permute.xlu0 %4653 }
 0x3a4   : > { %v4611_v26 = vadd.f32 %v4610_v10, %v4609_v55  ;;  %5167 = vst.msk [vmem:[%s6406_s8 + $0x30] sm:$0xff] %vm2586_vm13, %v4654_v57 }
 0x3a8   : > { %v4523_v60 = vpop.f32.mrf.mxu3 }
 0x3a9   : > { %v4558_v16 = vsel %vm1316_vm12, %v4523_v60, 0.0  ;;  %v4588_v0 = vmul.f32 %v4523_v60, %v4523_v60  ;;  %4667 = vrot.lane.b32.xlu1 %v4523_v60, %s7492_s11 }
 0x3aa   : > { %v7345_v9 = vadd.f32 %v4558_v16, %v4557_v43 }
 0x3ab   : > { %v4612_v14 = vsel %vm1316_vm12, %v4588_v0, 0.0  ;;  %v4656_v6 = vpop.permute.xlu1 %4655 }
 0x3ac   : > { %v7348_v33 = vadd.f32 %v4612_v14, %v4611_v26  ;;  %5168 = vst.msk [vmem:[%s6406_s8 + $0x38] sm:$0xff] %vm2586_vm13, %v4656_v6 }
 0x3b1   : > { %v3415_v1 = vpop.f32.mrf.mxu2 }
 0x3b2   : > { %v3449_v46 = vsel %vm1316_vm12, %v3415_v1, 0.0  ;;  %v3478_v31 = vmul.f32 %v3415_v1, %v3415_v1  ;;  %5097 = vst.msk [vmem:[%s6406_s8 + $0xb0] sm:$0xff] %vm1316_vm12, %v3415_v1 }
 0x3b3   : > { %v3450_v11 = vadd.f32 %v3449_v46, %v3448_v30 }
 0x3b4   : > { %v3503_v32 = vsel %vm1316_vm12, %v3478_v31, 0.0 }
 0x3b5   : > { %v3504_v54 = vadd.f32 %v3503_v32, %v3502_v3 }
 0x3b9   : > { %v3417_v53 = vpop.f32.mrf.mxu2 }
 0x3ba   : > { %v3451_v28 = vsel %vm1316_vm12, %v3417_v53, 0.0  ;;  %v3479_v39 = vmul.f32 %v3417_v53, %v3417_v53  ;;  %5098 = vst.msk [vmem:[%s6406_s8 + $0xb8] sm:$0xff] %vm1316_vm12, %v3417_v53 }
 0x3bb   : > { %v3452_v21 = vadd.f32 %v3451_v28, %v3450_v11  ;;  %v4658_v56 = vpop.permute.xlu2 %4657 }
 0x3bc   : > { %v3505_v22 = vsel %vm1316_vm12, %v3479_v39, 0.0  ;;  %5169 = vst.msk [vmem:[%s6406_s8 + $0x50] sm:$0xff] %vm2586_vm13, %v4658_v56 }
 0x3bd   : > { %v3506_v37 = vadd.f32 %v3505_v22, %v3504_v54 }
 0x3c0   : > { %v4526_v45 = vpop.f32.mrf.mxu3 }
 0x3c1   : > { %4669 = vrot.lane.b32.xlu2 %v4526_v45, %s7492_s11  ;;  %v4589_v24 = vmul.f32 %v4526_v45, %v4526_v45  ;;  %v4560_v30 = vsel %vm1316_vm12, %v4526_v45, 0.0 }
 0x3c2   : > { %v4561_v57 = vadd.f32 %v4560_v30, %v7345_v9 }
 0x3c3   : > { %v4614_v4 = vsel %vm1316_vm12, %v4589_v24, 0.0 }
 0x3c4   : > { %v4615_v1 = vadd.f32 %v4614_v4, %v7348_v33 }
 0x3c8   : > { %v4528_v7 = vpop.f32.mrf.mxu3 }
 0x3c9   : > { %4671 = vrot.lane.b32.xlu0 %v4528_v7, %s7492_s11  ;;  %v4590_v63 = vmul.f32 %v4528_v7, %v4528_v7  ;;  %v4562_v25 = vsel %vm1316_vm12, %v4528_v7, 0.0 }
 0x3ca   : > { %v4563_v46 = vadd.f32 %v4562_v25, %v4561_v57 }
 0x3cb   : > { %v4616_v26 = vsel %vm1316_vm12, %v4590_v63, 0.0 }
 0x3cc   : > { %v4617_v53 = vadd.f32 %v4616_v26, %v4615_v1 }
 0x3d1   : > { %v3420_v58 = vpop.f32.mrf.mxu2 }
 0x3d2   : > { %5099 = vst.msk [vmem:[%s6406_s8 + $0xd0] sm:$0xff] %vm1316_vm12, %v3420_v58  ;;  %v3480_v62 = vmul.f32 %v3420_v58, %v3420_v58  ;;  %v3453_v19 = vsel %vm1316_vm12, %v3420_v58, 0.0 }
 0x3d3   : > { %v3454_v23 = vadd.f32 %v3453_v19, %v3452_v21 }
 0x3d4   : > { %v3507_v2 = vsel %vm1316_vm12, %v3480_v62, 0.0 }
 0x3d5   : > { %v3508_v61 = vadd.f32 %v3507_v2, %v3506_v37 }
 0x3d9   : > { %v3422_v13 = vpop.f32.mrf.mxu2 }
 0x3da   : > { %5100 = vst.msk [vmem:[%s6406_s8 + $0xd8] sm:$0xff] %vm1316_vm12, %v3422_v13  ;;  %v3481_v48 = vmul.f32 %v3422_v13, %v3422_v13  ;;  %v3455_v12 = vsel %vm1316_vm12, %v3422_v13, 0.0 }
 0x3db   : > { %v4660_v52 = vpop.permute.xlu0 %4659  ;;  %v3456_v47 = vadd.f32 %v3455_v12, %v3454_v23 }
 0x3dc   : > { %5170 = vst.msk [vmem:[%s6406_s8 + $0x58] sm:$0xff] %vm2586_vm13, %v4660_v52  ;;  %v3509_v49 = vsel %vm1316_vm12, %v3481_v48, 0.0 }
 0x3dd   : > { %v3510_v55 = vadd.f32 %v3509_v49, %v3508_v61 }
 0x3e0   : > { %v4531_v42 = vpop.f32.mrf.mxu3 }
 0x3e1   : > { %4673 = vrot.lane.b32.xlu1 %v4531_v42, %s7492_s11  ;;  %v4591_v5 = vmul.f32 %v4531_v42, %v4531_v42  ;;  %v4564_v16 = vsel %vm1316_vm12, %v4531_v42, 0.0 }
 0x3e2   : > { %v4565_v28 = vadd.f32 %v4564_v16, %v4563_v46 }
 0x3e3   : > { %v4664_v18 = vpop.permute.xlu2 %4663  ;;  %v4618_v31 = vsel %vm1316_vm12, %v4591_v5, 0.0 }
 0x3e4   : > { %5172 = vst.msk [vmem:[%s6406_s8 + $0x78] sm:$0xff] %vm2586_vm13, %v4664_v18  ;;  %v4619_v37 = vadd.f32 %v4618_v31, %v4617_v53 }
 0x3e8   : > { %v4533_v44 = vpop.f32.mrf.mxu3 }
 0x3e9   : > { %4675 = vrot.lane.b32.xlu2 %v4533_v44, %s7492_s11  ;;  %v4592_v0 = vmul.f32 %v4533_v44, %v4533_v44  ;;  %v4566_v11 = vsel %vm1316_vm12, %v4533_v44, 0.0 }
 0x3ea   : > { %v4567_v45 = vadd.f32 %v4566_v11, %v4565_v28 }
 0x3eb   : > { %v4620_v39 = vsel %vm1316_vm12, %v4592_v0, 0.0 }
 0x3ec   : > { %v4621_v13 = vadd.f32 %v4620_v39, %v4619_v37 }
 0x3f1   : > { %v3425_v8 = vpop.f32.mrf.mxu2 }
 0x3f2   : > { %5101 = vst.msk [vmem:[%s6406_s8 + $0xf0] sm:$0xff] %vm1316_vm12, %v3425_v8  ;;  %v3482_v59 = vmul.f32 %v3425_v8, %v3425_v8  ;;  %v3457_v36 = vsel %vm1316_vm12, %v3425_v8, 0.0 }
 0x3f3   : > { %v4662_v27 = vpop.permute.xlu1 %4661  ;;  %v3458_v29 = vadd.f32 %v3457_v36, %v3456_v47 }
 0x3f4   : > { %5171 = vst.msk [vmem:[%s6406_s8 + $0x70] sm:$0xff] %vm2586_vm13, %v4662_v27  ;;  %v3511_v15 = vsel %vm1316_vm12, %v3482_v59, 0.0 }
 0x3f5   : > { %v3512_v35 = vadd.f32 %v3511_v15, %v3510_v55 }
 0x3f9   : > { %v3427_v38 = vpop.f32.mrf.mxu2 }
 0x3fa   : > { %v3459_v51 = vsel %vm1316_vm12, %v3427_v38, 0.0  ;;  %v3483_v20 = vmul.f32 %v3427_v38, %v3427_v38  ;;  %5102 = vst.msk [vmem:[%s6406_s8 + $0xf8] sm:$0xff] %vm1316_vm12, %v3427_v38 }
 0x3fb   : > { %v3460_v41 = vadd.f32 %v3459_v51, %v3458_v29 }
 0x3fc   : > { %v3513_v50 = vsel %vm1316_vm12, %v3483_v20, 0.0 }
 0x3fd   : > { %v3461_v40 = vrot.slane %v3460_v41, 4  ;;  %v3514_v3 = vadd.f32 %v3513_v50, %v3512_v35 }
 0x3ff   : > { %v3462_v43 = vadd.f32 %v3461_v40, %v3460_v41  ;;  %v3515_v10 = vrot.slane %v3514_v3, 4  ;;  %v4536_v60 = vpop.f32.mrf.mxu3 }
 0x400   : > { %4677 = vrot.lane.b32.xlu0 %v4536_v60, %s7492_s11  ;;  %v4593_v9 = vmul.f32 %v4536_v60, %v4536_v60  ;;  %v4568_v56 = vsel %vm1316_vm12, %v4536_v60, 0.0 }
 0x401   : > { %v3463_v14 = vrot.slane %v3462_v43, 2  ;;  %v3516_v6 = vadd.f32 %v3515_v10, %v3514_v3  ;;  %v4569_v52 = vadd.f32 %v4568_v56, %v4567_v45 }
 0x402   : > { %v4622_v58 = vsel %vm1316_vm12, %v4593_v9, 0.0 }
 0x403   : > { %v3464_v32 = vadd.f32 %v3463_v14, %v3462_v43  ;;  %v3517_v54 = vrot.slane %v3516_v6, 2  ;;  %v4623_v19 = vadd.f32 %v4622_v58, %v4621_v13 }
 0x405   : > { %v3465_v21 = vrot.slane %v3464_v32, 1  ;;  %v3518_v22 = vadd.f32 %v3517_v54, %v3516_v6 }
 0x407   : > { %v3466_v33 = vadd.f32 %v3465_v21, %v3464_v32  ;;  %v3519_v7 = vrot.slane %v3518_v22, 1  ;;  %v4538_v42 = vpop.f32.mrf.mxu3 }
 0x408   : > { %v4570_v62 = vsel %vm1316_vm12, %v4538_v42, 0.0  ;;  %v4594_v8 = vmul.f32 %v4538_v42, %v4538_v42  ;;  %4679 = vrot.lane.b32.xlu1 %v4538_v42, %s7492_s11 }
 0x409   : > { %v3467_v18 = vadd.f32 %v3466_v33, %v6857_v34  ;;  %v3520_v44 = vadd.f32 %v3519_v7, %v3518_v22  ;;  %v4571_v48 = vadd.f32 %v4570_v62, %v4569_v52 }
 0x40a   : > { %v4624_v2 = vsel %vm1316_vm12, %v4594_v8, 0.0 }
 0x40b   : > { %v3521_v12 = vadd.f32 %v3520_v44, %v6861_v17  ;;  %v4572_v59 = vrot.slane %v4571_v48, 4  ;;  %v4625_v27 = vadd.f32 %v4624_v2, %v4623_v19 }
 0x40d   : > { %v4573_v23 = vadd.f32 %v4572_v59, %v4571_v48  ;;  %v4626_v49 = vrot.slane %v4625_v27, 4 }
 0x40f   : > { %v4574_v34 = vrot.slane %v4573_v23, 2  ;;  %v4627_v36 = vadd.f32 %v4626_v49, %v4625_v27 }
 0x411   : > { %v4575_v61 = vadd.f32 %v4574_v34, %v4573_v23  ;;  %v4628_v47 = vrot.slane %v4627_v36, 2 }
 0x413   : > { %v4576_v15 = vrot.slane %v4575_v61, 1  ;;  %v4629_v55 = vadd.f32 %v4628_v47, %v4627_v36  ;;  %v4666_v29 = vpop.permute.xlu0 %4665 }
 0x414   : > { %5173 = vst.msk [vmem:[%s6406_s8 + $0x90] sm:$0xff] %vm2586_vm13, %v4666_v29 }
 0x415   : > { %v4577_v17 = vadd.f32 %v4576_v15, %v4575_v61  ;;  %v4630_v38 = vrot.slane %v4629_v55, 1 }
 0x417   : > { %v4631_v51 = vadd.f32 %v4630_v38, %v4629_v55  ;;  %v4578_v20 = vadd.f32 %v4577_v17, %v3467_v18 }
 0x419   : > { %v4632_v24 = vadd.f32 %v4631_v51, %v3521_v12  ;;  %4714 = vst.msk [vmem:[%s369_s20] sm:$0x1] %vm4713_vm14, %v4578_v20 }
 0x41b   : > { %v4668_v35 = vpop.permute.xlu1 %4667  ;;  %v4670_v41 = vpop.permute.xlu2 %4669  ;;  %4715 = vst.msk [vmem:[%s369_s20 + $0x1] sm:$0x1] %vm4713_vm14, %v4632_v24 }
 0x41c   : > { %5174 = vst.msk [vmem:[%s6406_s8 + $0x98] sm:$0xff] %vm2586_vm13, %v4668_v35 }
 0x41d   : > { %5339 = shalt.err (!%p5336_p10)
}
 0x41e   : > { %5233 = dma.vmem_to_hbm [thread:$0]  (%p5530_p3), %s4757_s29, 32, %s4759_s12, %s4722_s13   ;;  %5175 = vst.msk [vmem:[%s6406_s8 + $0xb0] sm:$0xff] %vm2586_vm13, %v4670_v41 }
 0x41f   : > { %s5227_s0 = sshll.u32 %s5422_s24, 5  ;;  %s5185_s11 = sshll.u32 %s5426_s25, 6 }
 0x420   : > { %s4734_s20 = sadd.s32 %s5227_s0, %s5185_s11  ;;  %s4737_s17 = sshll.u32 %s6406_s8, 4  ;;  %s4738_s17 = int_to_ptr.vmem [resolvable:$true] %s4737_s17 }
 0x421   : > { %s5186_s16 = sshll.u32 %s4734_s20, 3  ;;  %s4717_s18 = scalar_lea.sflag [#allocation5], %s6400_s28 }
 0x422   : > { %s4736_s13 = scalar_lea.hbm %s7490_s5, %s5186_s16  ;;  %s5360_s11 = scalar_lea.hbm %s7490_s5, 1024 }
 0x423   : > { %s4739_s15 = sshll.u32 %s4736_s13, 4  ;;  %s4740_s15 = int_to_ptr.hbm [resolvable:$true] %s4739_s15 }
 0x424   : > { %s5354_s24 = sshra.s32 %s4740_s15, 4  ;;  %s5355_s24 = int_to_ptr.hbm [resolvable:$true] %s5354_s24 }
 0x425   : > { %s5356_s25 = scalar_lea.hbm %s5355_s24, 256  ;;  %p5361_p0 = scmp.lt.s32.totalorder %s5355_s24, %s7490_s5 }
 0x426   : > { %p5357_p11 = scmp.ne.s32.totalorder %s5355_s24, %s5356_s25  ;;  %p5362_p1 = scmp.lt.s32.totalorder %s5360_s11, %s5356_s25 }
 0x428   : > { %p5358_p12 = pnand %p5357_p11, %p5530_p3  ;;  %p5363_p2 = por %p5362_p1, %p5361_p0 }
 0x42a   : > { %p5359_p13 = pneg %p5358_p12 }
 0x42c   : > { %p5364_p4 = pnand %p5363_p2, %p5359_p13 }
 0x43b   : > { %v4672_v63 = vpop.permute.xlu0 %4671 }
 0x43c   : > { %5176 = vst.msk [vmem:[%s6406_s8 + $0xb8] sm:$0xff] %vm2586_vm13, %v4672_v63 }
 0x443   : > { %v4676_v50 = vpop.permute.xlu2 %4675 }
 0x444   : > { %5178 = vst.msk [vmem:[%s6406_s8 + $0xd8] sm:$0xff] %vm2586_vm13, %v4676_v50 }
 0x453   : > { %v4674_v30 = vpop.permute.xlu1 %4673 }
 0x454   : > { %5177 = vst.msk [vmem:[%s6406_s8 + $0xd0] sm:$0xff] %vm2586_vm13, %v4674_v30 }
 0x472   : > { %v4678_v40 = vpop.permute.xlu0 %4677 }
 0x473   : > { %5179 = vst.msk [vmem:[%s6406_s8 + $0xf0] sm:$0xff] %vm2586_vm13, %v4678_v40 }
 0x47a   : > { %v4680_v3 = vpop.permute.xlu1 %4679 }
 0x47b   : > { %5180 = vst.msk [vmem:[%s6406_s8 + $0xf8] sm:$0xff] %vm2586_vm13, %v4680_v3 }
 0x47c   : > { %5367 = shalt.err (!%p5364_p4)
}
 0x47d   : > { %s5443_s28 = smov 128   ;;  %s7503_s8 = smov 8  }
 0x47e   : > { %5232 = dma.vmem_to_hbm [thread:$0]  (%p5530_p3), %s4738_s17, 4096, %s4740_s15, %s4717_s18, %s5443_s28, %s5443_s28, %s7503_s8  }
 0x47f PF: > { %p5243_p5 = scmp.ge.s32.totalorder %s5438_s27, 2  ;;  %s4770_s29 = sand.u32 1, %s5410_s21  }
 0x480   : > { %s4771_s12 = scalar_lea.sflag [#allocation5], %s4770_s29 }
 0x481   : > { %p5237_p6 = pnand %p5243_p5, %p5539_p8 }
 0x483   : > { %p5238_p7 = pneg %p5237_p6 }
 0x485   : > { %5401 = dma.done.wait (%p5238_p7), %s4771_s12, 4096  }
 0x486   : > { %5403 = vsyncadd (%p5238_p7), %s4771_s12, 4294963200  ;;  %s4781_s13 = scalar_lea.sflag [#allocation7], %s4770_s29 }
 0x487   : > { %5405 = dma.done.wait (%p5238_p7), %s4781_s13, 32  }
 0x488   : > { %5407 = vsyncadd (%p5238_p7), %s4781_s13, 4294967264  ;;  %s23_s27 = sadd.s32 1, %s5438_s27   ;;  %s7504_s21 = smov %s5414_s22 }
 0x489   : > { %p20_p9 = scmp.ge.s32.totalorder %s23_s27, 6   ;;  %s7505_s22 = smov %s5418_s23 }
 0x48a   : > { %s7506_s23 = smov %s5548_s14  ;;  %s7507_s24 = smov %s5430_s4 }
 0x48b   : > { %s7508_s25 = smov %s5434_s26  ;;  %s7509_s4 = smov %s7512_s30 }
 0x48c   : > { %s7510_s26 = smov %s7516_s7  ;;  %22 = sbr.rel (!%p20_p9) target bundleno = 9 (0x9), region = 106 }
 0x491   :  { %4787 = vsyncpa [#allocation5], 1 }
 0x492   :  { %4789 = vsyncpa [#allocation5 + $0x1], 1 }
 0x493   :  { %4790 = vsyncpa [#allocation7], 1 }
 0x494   :  { %4792 = vsyncpa [#allocation7 + $0x1], 1 }

</bundles_post_ra>
